<compile_context>
chip_gen: v5e
topology: v5e:2x2
jax: 0.10.0
libtpu: 0.0.40
codegen_flags: <defaults>
</compile_context>

<pallas_src>
import math

import numpy as np
import jax
import jax.numpy as jnp
from jax.experimental import pallas as pl
from jax.experimental.pallas import tpu as pltpu

C = 16  # matches `c = 16` in the PyTorch source


def _layer_specs():
    # (cin, cout, stride) for the 8 convs (4 Conv2 blocks: stride-2 conv, stride-1 conv)
    return [(3, C, 2), (C, C, 1),
            (C, 2 * C, 2), (2 * C, 2 * C, 1),
            (2 * C, 4 * C, 2), (4 * C, 4 * C, 1),
            (4 * C, 8 * C, 2), (8 * C, 8 * C, 1)]


def _conv_out(n, stride):
    # kernel=3, padding=1
    return (n - 1) // stride + 1


def init_params(key):
    """Per-layer (weight(3,3,cin,cout), bias(cout,), prelu_alpha(cout,)), torch-like init."""
    params = []
    for i, (cin, cout, _) in enumerate(_layer_specs()):
        kw, kb = jax.random.split(jax.random.fold_in(key, i))
        bound = 1.0 / math.sqrt(9 * cin)
        w = jax.random.uniform(kw, (3, 3, cin, cout), jnp.float32, -bound, bound)
        b = jax.random.uniform(kb, (cout,), jnp.float32, -bound, bound)
        a = jnp.full((cout,), 0.25, jnp.float32)  # nn.PReLU(out_planes) init value
        params.append((w, b, a))
    return params


def prepare_params(params, in_h, in_w):
    """Host-side, one-time weight prep.

    For each layer and each ky, build a 'slab weight' (W_in*Cin, W_out*Cout) that folds
    the three kx taps, the W zero-padding and the W stride into one matmul operand.
    Bias / PReLU alpha are tiled to the (1, W_out*Cout) slab layout.
    """
    cfgs, w_slabs, b_slabs, a_slabs = [], [], [], []
    hi, wi = in_h, in_w
    for (w, b, a), (cin, cout, s) in zip(params, _layer_specs()):
        ho, wo = _conv_out(hi, s), _conv_out(wi, s)
        wnp = np.asarray(w, np.float32)
        slab = np.zeros((3, wi * cin, wo * cout), np.float32)
        for ky in range(3):
            for kx in range(3):
                for woi in range(wo):
                    xin = woi * s + kx - 1            # input column (padding=1)
                    if 0 <= xin < wi:                 # out of range -> zero pad -> drop
                        slab[ky, xin * cin:(xin + 1) * cin,
                             woi * cout:(woi + 1) * cout] = wnp[ky, kx]
        w_slabs.append(jnp.asarray(slab))
        b_slabs.append(jnp.asarray(np.tile(np.asarray(b, np.float32), wo).reshape(1, wo * cout)))
        a_slabs.append(jnp.asarray(np.tile(np.asarray(a, np.float32), wo).reshape(1, wo * cout)))
        cfgs.append((s, hi, wi, cin, ho, wo, cout))
        hi, wi = ho, wo
    return tuple(w_slabs), tuple(b_slabs), tuple(a_slabs), tuple(cfgs)


def _build_pyramid_kernel(cfgs, nb):
    n_layers = len(cfgs)
    n_in = 1 + 3 * n_layers        # input slab, L slab-weights, L biases, L alphas
    n_out = n_layers // 2          # one feature map per Conv2 block

    def kernel(*refs):
        x0_ref = refs[0]
        w_refs = refs[1:1 + n_layers]
        b_refs = refs[1 + n_layers:1 + 2 * n_layers]
        a_refs = refs[1 + 2 * n_layers:1 + 3 * n_layers]
        out_refs = refs[n_in:n_in + n_out]
        pad_refs = refs[n_in + n_out:]          # padded input slab for layer l+1

        # Zero the padded scratch slabs once: the two H-pad rows per image must read 0.
        for p in pad_refs:
            p[...] = jnp.zeros_like(p)

        src = x0_ref
        oi = 0
        for li, (s, hi, wi, cin, ho, wo, cout) in enumerate(cfgs):
            hp = hi + 2
            nxt = pad_refs[li] if li + 1 < n_layers else None
            bias = b_refs[li][...]                        # (1, wo*cout)
            alpha = a_refs[li][...]                       # (1, wo*cout)
            wk = [w_refs[li][ky] for ky in range(3)]      # 3 x (wi*cin, wo*cout)
            for n in range(nb):
                acc = jnp.zeros((ho, wo * cout), jnp.float32)
                for ky in range(3):
                    r0 = n * hp + ky
                    if s == 1 or ho == 1:
                        rows = src[pl.ds(r0, ho), :]
                    else:                                  # stride-2: strided row read
                        rows = src[pl.ds(r0, ho, s), :]
                    acc = acc + jnp.dot(rows, wk[ky],
                                        preferred_element_type=jnp.float32)
                o = acc + bias
                o = jnp.where(o >= 0.0, o, alpha * o)      # per-channel PReLU
                if nxt is not None:                        # feed next layer (stays in VMEM)
                    nxt[pl.ds(n * (ho + 2) + 1, ho), :] = o
                if li % 2 == 1:                            # end of a Conv2 block -> output
                    out_refs[oi][pl.ds(n * ho, ho), :] = o
            if li % 2 == 1:
                oi += 1
            src = nxt

    return kernel


def img_pyramid_forward(x_nchw, prepped):
    """Returns [x1, x2, x3, x4] in NCHW, matching ImgPyramid.forward."""
    w_slabs, b_slabs, a_slabs, cfgs = prepped
    nb, cin0, ih, iw = x_nchw.shape
    assert (ih, iw, cin0) == (cfgs[0][1], cfgs[0][2], cfgs[0][3]), \
        "input shape does not match prepared params"
    n_layers = len(cfgs)

    # Entry glue (once, on the tiny 3-channel input): NCHW -> NHWC, pad H by 1, flatten
    # to a lane-dense (N*(H+2), W*Cin) slab.  Everything else happens inside the kernel.
    x_nhwc = jnp.transpose(x_nchw, (0, 2, 3, 1))
    x_pad = jnp.pad(x_nhwc, ((0, 0), (1, 1), (0, 0), (0, 0)))
    x_slab = x_pad.reshape(nb * (ih + 2), iw * cin0)

    out_shapes, out_meta = [], []
    for li, (s, hi, wi, ci, ho, wo, co) in enumerate(cfgs):
        if li % 2 == 1:
            out_shapes.append(jax.ShapeDtypeStruct((nb * ho, wo * co), jnp.float32))
            out_meta.append((ho, wo, co))

    # VMEM scratch: H-padded input slab for layers 1..7 (holds the previous layer's output).
    scratch_shapes = [pltpu.VMEM((nb * (ho + 2), wo * co), jnp.float32)
                      for (s, hi, wi, ci, ho, wo, co) in cfgs[:-1]]

    n_inputs = 1 + 3 * n_layers
    vmem = pl.BlockSpec(memory_space=pltpu.MemorySpace.VMEM)

    outs = pl.pallas_call(
        _build_pyramid_kernel(cfgs, nb),
        out_shape=tuple(out_shapes),
        in_specs=[vmem] * n_inputs,
        out_specs=tuple([vmem] * len(out_shapes)),
        scratch_shapes=scratch_shapes,
    )(x_slab, *w_slabs, *b_slabs, *a_slabs)

    # Exit glue (once): slab -> NHWC -> NCHW for the 4 pyramid outputs.
    feats = []
    for o, (ho, wo, co) in zip(outs, out_meta):
        feats.append(jnp.transpose(o.reshape(nb, ho, wo, co), (0, 3, 1, 2)))
    return feats


def _reference_forward(x_nchw, params):
    """Plain-JAX (XLA) reference of the PyTorch module, for a numerics check."""
    feats, x = [], x_nchw
    for i, ((w, b, a), (_, _, s)) in enumerate(zip(params, _layer_specs())):
        y = jax.lax.conv_general_dilated(
            x, w, window_strides=(s, s), padding=((1, 1), (1, 1)),
            dimension_numbers=("NCHW", "HWIO", "NCHW"),
            precision=jax.lax.Precision.HIGHEST)
        y = y + b.reshape(1, -1, 1, 1)
        x = jnp.where(y >= 0.0, y, a.reshape(1, -1, 1, 1) * y)
        if i % 2 == 1:
            feats.append(x)
    return feats


if __name__ == "__main__":
    key = jax.random.PRNGKey(0)
    kx, kp = jax.random.split(key)

    # NCHW, 3 input channels, as the module implies
    x = jax.random.normal(kx, (2, 3, 16, 16), jnp.float32)
    params = init_params(kp)
    prepped = prepare_params(params, 16, 16)

    fwd = jax.jit(lambda inp: img_pyramid_forward(inp, prepped))
    outs = fwd(x)
    for o in outs:
        jax.block_until_ready(o)

    expected = [(2, 16, 8, 8), (2, 32, 4, 4), (2, 64, 2, 2), (2, 128, 1, 1)]
    got = [tuple(o.shape) for o in outs]
    assert got == expected, f"shape mismatch: {got} vs {expected}"
    assert all(o.dtype == jnp.float32 for o in outs)

    # Numerics vs the plain-JAX reference of the PyTorch module.
    refs = _reference_forward(x, params)
    for i, (o, r) in enumerate(zip(outs, refs)):
        err = float(jnp.max(jnp.abs(o - r)))
        scale = float(jnp.max(jnp.abs(r)))
        assert err <= 2e-2 * scale + 2e-3, f"output {i}: max err {err} (scale {scale})"

    print("KERNEL_OK")
</pallas_src>

<mosaic_0001>
module attributes {stable_mosaic.version = 11 : i64} {
  func.func @kernel(%arg0: memref<36x48xf32, #tpu.memory_space<vmem>>, %arg1: memref<3x48x128xf32, #tpu.memory_space<vmem>>, %arg2: memref<3x128x128xf32, #tpu.memory_space<vmem>>, %arg3: memref<3x128x128xf32, #tpu.memory_space<vmem>>, %arg4: memref<3x128x128xf32, #tpu.memory_space<vmem>>, %arg5: memref<3x128x128xf32, #tpu.memory_space<vmem>>, %arg6: memref<3x128x128xf32, #tpu.memory_space<vmem>>, %arg7: memref<3x128x128xf32, #tpu.memory_space<vmem>>, %arg8: memref<3x128x128xf32, #tpu.memory_space<vmem>>, %arg9: memref<1x128xf32, #tpu.memory_space<vmem>>, %arg10: memref<1x128xf32, #tpu.memory_space<vmem>>, %arg11: memref<1x128xf32, #tpu.memory_space<vmem>>, %arg12: memref<1x128xf32, #tpu.memory_space<vmem>>, %arg13: memref<1x128xf32, #tpu.memory_space<vmem>>, %arg14: memref<1x128xf32, #tpu.memory_space<vmem>>, %arg15: memref<1x128xf32, #tpu.memory_space<vmem>>, %arg16: memref<1x128xf32, #tpu.memory_space<vmem>>, %arg17: memref<1x128xf32, #tpu.memory_space<vmem>>, %arg18: memref<1x128xf32, #tpu.memory_space<vmem>>, %arg19: memref<1x128xf32, #tpu.memory_space<vmem>>, %arg20: memref<1x128xf32, #tpu.memory_space<vmem>>, %arg21: memref<1x128xf32, #tpu.memory_space<vmem>>, %arg22: memref<1x128xf32, #tpu.memory_space<vmem>>, %arg23: memref<1x128xf32, #tpu.memory_space<vmem>>, %arg24: memref<1x128xf32, #tpu.memory_space<vmem>>, %arg25: memref<16x128xf32, #tpu.memory_space<vmem>>, %arg26: memref<8x128xf32, #tpu.memory_space<vmem>>, %arg27: memref<4x128xf32, #tpu.memory_space<vmem>>, %arg28: memref<2x128xf32, #tpu.memory_space<vmem>>, %arg29: memref<20x128xf32, #tpu.memory_space<vmem>>, %arg30: memref<20x128xf32, #tpu.memory_space<vmem>>, %arg31: memref<12x128xf32, #tpu.memory_space<vmem>>, %arg32: memref<12x128xf32, #tpu.memory_space<vmem>>, %arg33: memref<8x128xf32, #tpu.memory_space<vmem>>, %arg34: memref<8x128xf32, #tpu.memory_space<vmem>>, %arg35: memref<6x128xf32, #tpu.memory_space<vmem>>) attributes {dimension_semantics = [], scalar_prefetch = 0 : i64, scratch_operands = 7 : i64, tpu.core_type = #tpu.core_type<tc>} {
    %cst = arith.constant 0.000000e+00 : f32
    %0 = vector.broadcast %cst : f32 to vector<20x128xf32>
    %c0 = arith.constant 0 : index
    %c0_0 = arith.constant 0 : index
    %1 = vector.load %arg29[%c0, %c0_0] : memref<20x128xf32, #tpu.memory_space<vmem>>, vector<20x128xf32>
    tpu.vector_store %arg29[%c0, %c0_0], %0 {strides = array<i32>} : memref<20x128xf32, #tpu.memory_space<vmem>>, vector<20x128xf32>,
    %cst_1 = arith.constant 0.000000e+00 : f32
    %2 = vector.broadcast %cst_1 : f32 to vector<20x128xf32>
    %c0_2 = arith.constant 0 : index
    %c0_3 = arith.constant 0 : index
    %3 = vector.load %arg30[%c0_2, %c0_3] : memref<20x128xf32, #tpu.memory_space<vmem>>, vector<20x128xf32>
    tpu.vector_store %arg30[%c0_2, %c0_3], %2 {strides = array<i32>} : memref<20x128xf32, #tpu.memory_space<vmem>>, vector<20x128xf32>,
    %cst_4 = arith.constant 0.000000e+00 : f32
    %4 = vector.broadcast %cst_4 : f32 to vector<12x128xf32>
    %c0_5 = arith.constant 0 : index
    %c0_6 = arith.constant 0 : index
    %5 = vector.load %arg31[%c0_5, %c0_6] : memref<12x128xf32, #tpu.memory_space<vmem>>, vector<12x128xf32>
    tpu.vector_store %arg31[%c0_5, %c0_6], %4 {strides = array<i32>} : memref<12x128xf32, #tpu.memory_space<vmem>>, vector<12x128xf32>,
    %cst_7 = arith.constant 0.000000e+00 : f32
    %6 = vector.broadcast %cst_7 : f32 to vector<12x128xf32>
    %c0_8 = arith.constant 0 : index
    %c0_9 = arith.constant 0 : index
    %7 = vector.load %arg32[%c0_8, %c0_9] : memref<12x128xf32, #tpu.memory_space<vmem>>, vector<12x128xf32>
    tpu.vector_store %arg32[%c0_8, %c0_9], %6 {strides = array<i32>} : memref<12x128xf32, #tpu.memory_space<vmem>>, vector<12x128xf32>,
    %cst_10 = arith.constant 0.000000e+00 : f32
    %8 = vector.broadcast %cst_10 : f32 to vector<8x128xf32>
    %c0_11 = arith.constant 0 : index
    %c0_12 = arith.constant 0 : index
    %9 = vector.load %arg33[%c0_11, %c0_12] : memref<8x128xf32, #tpu.memory_space<vmem>>, vector<8x128xf32>
    tpu.vector_store %arg33[%c0_11, %c0_12], %8 {strides = array<i32>} : memref<8x128xf32, #tpu.memory_space<vmem>>, vector<8x128xf32>,
    %cst_13 = arith.constant 0.000000e+00 : f32
    %10 = vector.broadcast %cst_13 : f32 to vector<8x128xf32>
    %c0_14 = arith.constant 0 : index
    %c0_15 = arith.constant 0 : index
    %11 = vector.load %arg34[%c0_14, %c0_15] : memref<8x128xf32, #tpu.memory_space<vmem>>, vector<8x128xf32>
    tpu.vector_store %arg34[%c0_14, %c0_15], %10 {strides = array<i32>} : memref<8x128xf32, #tpu.memory_space<vmem>>, vector<8x128xf32>,
    %cst_16 = arith.constant 0.000000e+00 : f32
    %12 = vector.broadcast %cst_16 : f32 to vector<6x128xf32>
    %c0_17 = arith.constant 0 : index
    %c0_18 = arith.constant 0 : index
    %13 = vector.load %arg35[%c0_17, %c0_18] : memref<6x128xf32, #tpu.memory_space<vmem>>, vector<6x128xf32>
    tpu.vector_store %arg35[%c0_17, %c0_18], %12 {strides = array<i32>} : memref<6x128xf32, #tpu.memory_space<vmem>>, vector<6x128xf32>,
    %c0_19 = arith.constant 0 : index
    %c0_20 = arith.constant 0 : index
    %14 = vector.load %arg9[%c0_19, %c0_20] : memref<1x128xf32, #tpu.memory_space<vmem>>, vector<1x128xf32>
    %c0_21 = arith.constant 0 : index
    %c0_22 = arith.constant 0 : index
    %15 = vector.load %arg17[%c0_21, %c0_22] : memref<1x128xf32, #tpu.memory_space<vmem>>, vector<1x128xf32>
    %c0_23 = arith.constant 0 : index
    %c0_24 = arith.constant 0 : index
    %c0_25 = arith.constant 0 : index
    %16 = vector.load %arg1[%c0_23, %c0_24, %c0_25] : memref<3x48x128xf32, #tpu.memory_space<vmem>>, vector<1x48x128xf32>
    %17 = vector.shape_cast %16 : vector<1x48x128xf32> to vector<48x128xf32>
    %c1 = arith.constant 1 : index
    %c0_26 = arith.constant 0 : index
    %c0_27 = arith.constant 0 : index
    %18 = vector.load %arg1[%c1, %c0_26, %c0_27] : memref<3x48x128xf32, #tpu.memory_space<vmem>>, vector<1x48x128xf32>
    %19 = vector.shape_cast %18 : vector<1x48x128xf32> to vector<48x128xf32>
    %c2 = arith.constant 2 : index
    %c0_28 = arith.constant 0 : index
    %c0_29 = arith.constant 0 : index
    %20 = vector.load %arg1[%c2, %c0_28, %c0_29] : memref<3x48x128xf32, #tpu.memory_space<vmem>>, vector<1x48x128xf32>
    %21 = vector.shape_cast %20 : vector<1x48x128xf32> to vector<48x128xf32>
    %cst_30 = arith.constant 0.000000e+00 : f32
    %22 = vector.broadcast %cst_30 : f32 to vector<8x128xf32>
    %c0_31 = arith.constant 0 : index
    %c0_32 = arith.constant 0 : index
    %23 = tpu.strided_load %arg0[%c0_31, %c0_32] {strides = array<i32: 2, 1>} : memref<36x48xf32, #tpu.memory_space<vmem>>, vector<8x48xf32>
    %cst_33 = arith.constant dense<0.000000e+00> : vector<8x128xf32>
    %24 = tpu.matmul %23, %17, %cst_33 {dimension_numbers = #tpu.dot_dimension_numbers<[1], [0], [0], [1], [0, 0, 1, 1], [], []>} : vector<8x48xf32>, vector<48x128xf32>, vector<8x128xf32> -> vector<8x128xf32>
    %25 = arith.addf %22, %24 : vector<8x128xf32>
    %c1_34 = arith.constant 1 : index
    %c0_35 = arith.constant 0 : index
    %26 = tpu.strided_load %arg0[%c1_34, %c0_35] {strides = array<i32: 2, 1>} : memref<36x48xf32, #tpu.memory_space<vmem>>, vector<8x48xf32>
    %cst_36 = arith.constant dense<0.000000e+00> : vector<8x128xf32>
    %27 = tpu.matmul %26, %19, %cst_36 {dimension_numbers = #tpu.dot_dimension_numbers<[1], [0], [0], [1], [0, 0, 1, 1], [], []>} : vector<8x48xf32>, vector<48x128xf32>, vector<8x128xf32> -> vector<8x128xf32>
    %28 = arith.addf %25, %27 : vector<8x128xf32>
    %c2_37 = arith.constant 2 : index
    %c0_38 = arith.constant 0 : index
    %29 = tpu.strided_load %arg0[%c2_37, %c0_38] {strides = array<i32: 2, 1>} : memref<36x48xf32, #tpu.memory_space<vmem>>, vector<8x48xf32>
    %cst_39 = arith.constant dense<0.000000e+00> : vector<8x128xf32>
    %30 = tpu.matmul %29, %21, %cst_39 {dimension_numbers = #tpu.dot_dimension_numbers<[1], [0], [0], [1], [0, 0, 1, 1], [], []>} : vector<8x48xf32>, vector<48x128xf32>, vector<8x128xf32> -> vector<8x128xf32>
    %31 = arith.addf %28, %30 : vector<8x128xf32>
    %32 = vector.broadcast %14 : vector<1x128xf32> to vector<8x128xf32>
    %33 = arith.addf %31, %32 : vector<8x128xf32>
    %cst_40 = arith.constant 0.000000e+00 : f32
    %34 = vector.broadcast %cst_40 : f32 to vector<8x128xf32>
    %35 = arith.cmpf oge, %33, %34 : vector<8x128xf32>
    %36 = vector.broadcast %15 : vector<1x128xf32> to vector<8x128xf32>
    %37 = arith.mulf %36, %33 : vector<8x128xf32>
    %38 = arith.select %35, %33, %37 : vector<8x128xi1>, vector<8x128xf32>
    %c1_41 = arith.constant 1 : index
    %c0_42 = arith.constant 0 : index
    %39 = vector.load %arg29[%c1_41, %c0_42] : memref<20x128xf32, #tpu.memory_space<vmem>>, vector<8x128xf32>
    tpu.vector_store %arg29[%c1_41, %c0_42], %38 {strides = array<i32>} : memref<20x128xf32, #tpu.memory_space<vmem>>, vector<8x128xf32>,
    %cst_43 = arith.constant 0.000000e+00 : f32
    %40 = vector.broadcast %cst_43 : f32 to vector<8x128xf32>
    %c18 = arith.constant 18 : index
    %c0_44 = arith.constant 0 : index
    %41 = tpu.strided_load %arg0[%c18, %c0_44] {strides = array<i32: 2, 1>} : memref<36x48xf32, #tpu.memory_space<vmem>>, vector<8x48xf32>
    %cst_45 = arith.constant dense<0.000000e+00> : vector<8x128xf32>
    %42 = tpu.matmul %41, %17, %cst_45 {dimension_numbers = #tpu.dot_dimension_numbers<[1], [0], [0], [1], [0, 0, 1, 1], [], []>} : vector<8x48xf32>, vector<48x128xf32>, vector<8x128xf32> -> vector<8x128xf32>
    %43 = arith.addf %40, %42 : vector<8x128xf32>
    %c19 = arith.constant 19 : index
    %c0_46 = arith.constant 0 : index
    %44 = tpu.strided_load %arg0[%c19, %c0_46] {strides = array<i32: 2, 1>} : memref<36x48xf32, #tpu.memory_space<vmem>>, vector<8x48xf32>
    %cst_47 = arith.constant dense<0.000000e+00> : vector<8x128xf32>
    %45 = tpu.matmul %44, %19, %cst_47 {dimension_numbers = #tpu.dot_dimension_numbers<[1], [0], [0], [1], [0, 0, 1, 1], [], []>} : vector<8x48xf32>, vector<48x128xf32>, vector<8x128xf32> -> vector<8x128xf32>
    %46 = arith.addf %43, %45 : vector<8x128xf32>
    %c20 = arith.constant 20 : index
    %c0_48 = arith.constant 0 : index
    %47 = tpu.strided_load %arg0[%c20, %c0_48] {strides = array<i32: 2, 1>} : memref<36x48xf32, #tpu.memory_space<vmem>>, vector<8x48xf32>
    %cst_49 = arith.constant dense<0.000000e+00> : vector<8x128xf32>
    %48 = tpu.matmul %47, %21, %cst_49 {dimension_numbers = #tpu.dot_dimension_numbers<[1], [0], [0], [1], [0, 0, 1, 1], [], []>} : vector<8x48xf32>, vector<48x128xf32>, vector<8x128xf32> -> vector<8x128xf32>
    %49 = arith.addf %46, %48 : vector<8x128xf32>
    %50 = vector.broadcast %14 : vector<1x128xf32> to vector<8x128xf32>
    %51 = arith.addf %49, %50 : vector<8x128xf32>
    %cst_50 = arith.constant 0.000000e+00 : f32
    %52 = vector.broadcast %cst_50 : f32 to vector<8x128xf32>
    %53 = arith.cmpf oge, %51, %52 : vector<8x128xf32>
    %54 = vector.broadcast %15 : vector<1x128xf32> to vector<8x128xf32>
    %55 = arith.mulf %54, %51 : vector<8x128xf32>
    %56 = arith.select %53, %51, %55 : vector<8x128xi1>, vector<8x128xf32>
    %c11 = arith.constant 11 : index
    %c0_51 = arith.constant 0 : index
    %57 = vector.load %arg29[%c11, %c0_51] : memref<20x128xf32, #tpu.memory_space<vmem>>, vector<8x128xf32>
    tpu.vector_store %arg29[%c11, %c0_51], %56 {strides = array<i32>} : memref<20x128xf32, #tpu.memory_space<vmem>>, vector<8x128xf32>,
    %c0_52 = arith.constant 0 : index
    %c0_53 = arith.constant 0 : index
    %58 = vector.load %arg10[%c0_52, %c0_53] : memref<1x128xf32, #tpu.memory_space<vmem>>, vector<1x128xf32>
    %c0_54 = arith.constant 0 : index
    %c0_55 = arith.constant 0 : index
    %59 = vector.load %arg18[%c0_54, %c0_55] : memref<1x128xf32, #tpu.memory_space<vmem>>, vector<1x128xf32>
    %c0_56 = arith.constant 0 : index
    %c0_57 = arith.constant 0 : index
    %c0_58 = arith.constant 0 : index
    %60 = vector.load %arg2[%c0_56, %c0_57, %c0_58] : memref<3x128x128xf32, #tpu.memory_space<vmem>>, vector<1x128x128xf32>
    %61 = vector.shape_cast %60 : vector<1x128x128xf32> to vector<128x128xf32>
    %c1_59 = arith.constant 1 : index
    %c0_60 = arith.constant 0 : index
    %c0_61 = arith.constant 0 : index
    %62 = vector.load %arg2[%c1_59, %c0_60, %c0_61] : memref<3x128x128xf32, #tpu.memory_space<vmem>>, vector<1x128x128xf32>
    %63 = vector.shape_cast %62 : vector<1x128x128xf32> to vector<128x128xf32>
    %c2_62 = arith.constant 2 : index
    %c0_63 = arith.constant 0 : index
    %c0_64 = arith.constant 0 : index
    %64 = vector.load %arg2[%c2_62, %c0_63, %c0_64] : memref<3x128x128xf32, #tpu.memory_space<vmem>>, vector<1x128x128xf32>
    %65 = vector.shape_cast %64 : vector<1x128x128xf32> to vector<128x128xf32>
    %cst_65 = arith.constant 0.000000e+00 : f32
    %66 = vector.broadcast %cst_65 : f32 to vector<8x128xf32>
    %c0_66 = arith.constant 0 : index
    %c0_67 = arith.constant 0 : index
    %67 = vector.load %arg29[%c0_66, %c0_67] : memref<20x128xf32, #tpu.memory_space<vmem>>, vector<8x128xf32>
    %cst_68 = arith.constant dense<0.000000e+00> : vector<8x128xf32>
    %68 = tpu.matmul %67, %61, %cst_68 {dimension_numbers = #tpu.dot_dimension_numbers<[1], [0], [0], [1], [0, 0, 1, 1], [], []>} : vector<8x128xf32>, vector<128x128xf32>, vector<8x128xf32> -> vector<8x128xf32>
    %69 = arith.addf %66, %68 : vector<8x128xf32>
    %c1_69 = arith.constant 1 : index
    %c0_70 = arith.constant 0 : index
    %70 = vector.load %arg29[%c1_69, %c0_70] : memref<20x128xf32, #tpu.memory_space<vmem>>, vector<8x128xf32>
    %cst_71 = arith.constant dense<0.000000e+00> : vector<8x128xf32>
    %71 = tpu.matmul %70, %63, %cst_71 {dimension_numbers = #tpu.dot_dimension_numbers<[1], [0], [0], [1], [0, 0, 1, 1], [], []>} : vector<8x128xf32>, vector<128x128xf32>, vector<8x128xf32> -> vector<8x128xf32>
    %72 = arith.addf %69, %71 : vector<8x128xf32>
    %c2_72 = arith.constant 2 : index
    %c0_73 = arith.constant 0 : index
    %73 = vector.load %arg29[%c2_72, %c0_73] : memref<20x128xf32, #tpu.memory_space<vmem>>, vector<8x128xf32>
    %cst_74 = arith.constant dense<0.000000e+00> : vector<8x128xf32>
    %74 = tpu.matmul %73, %65, %cst_74 {dimension_numbers = #tpu.dot_dimension_numbers<[1], [0], [0], [1], [0, 0, 1, 1], [], []>} : vector<8x128xf32>, vector<128x128xf32>, vector<8x128xf32> -> vector<8x128xf32>
    %75 = arith.addf %72, %74 : vector<8x128xf32>
    %76 = vector.broadcast %58 : vector<1x128xf32> to vector<8x128xf32>
    %77 = arith.addf %75, %76 : vector<8x128xf32>
    %cst_75 = arith.constant 0.000000e+00 : f32
    %78 = vector.broadcast %cst_75 : f32 to vector<8x128xf32>
    %79 = arith.cmpf oge, %77, %78 : vector<8x128xf32>
    %80 = vector.broadcast %59 : vector<1x128xf32> to vector<8x128xf32>
    %81 = arith.mulf %80, %77 : vector<8x128xf32>
    %82 = arith.select %79, %77, %81 : vector<8x128xi1>, vector<8x128xf32>
    %c1_76 = arith.constant 1 : index
    %c0_77 = arith.constant 0 : index
    %83 = vector.load %arg30[%c1_76, %c0_77] : memref<20x128xf32, #tpu.memory_space<vmem>>, vector<8x128xf32>
    tpu.vector_store %arg30[%c1_76, %c0_77], %82 {strides = array<i32>} : memref<20x128xf32, #tpu.memory_space<vmem>>, vector<8x128xf32>,
    %c0_78 = arith.constant 0 : index
    %c0_79 = arith.constant 0 : index
    %84 = vector.load %arg25[%c0_78, %c0_79] : memref<16x128xf32, #tpu.memory_space<vmem>>, vector<8x128xf32>
    tpu.vector_store %arg25[%c0_78, %c0_79], %82 {strides = array<i32>} : memref<16x128xf32, #tpu.memory_space<vmem>>, vector<8x128xf32>,
    %cst_80 = arith.constant 0.000000e+00 : f32
    %85 = vector.broadcast %cst_80 : f32 to vector<8x128xf32>
    %c10 = arith.constant 10 : index
    %c0_81 = arith.constant 0 : index
    %86 = vector.load %arg29[%c10, %c0_81] : memref<20x128xf32, #tpu.memory_space<vmem>>, vector<8x128xf32>
    %cst_82 = arith.constant dense<0.000000e+00> : vector<8x128xf32>
    %87 = tpu.matmul %86, %61, %cst_82 {dimension_numbers = #tpu.dot_dimension_numbers<[1], [0], [0], [1], [0, 0, 1, 1], [], []>} : vector<8x128xf32>, vector<128x128xf32>, vector<8x128xf32> -> vector<8x128xf32>
    %88 = arith.addf %85, %87 : vector<8x128xf32>
    %c11_83 = arith.constant 11 : index
    %c0_84 = arith.constant 0 : index
    %89 = vector.load %arg29[%c11_83, %c0_84] : memref<20x128xf32, #tpu.memory_space<vmem>>, vector<8x128xf32>
    %cst_85 = arith.constant dense<0.000000e+00> : vector<8x128xf32>
    %90 = tpu.matmul %89, %63, %cst_85 {dimension_numbers = #tpu.dot_dimension_numbers<[1], [0], [0], [1], [0, 0, 1, 1], [], []>} : vector<8x128xf32>, vector<128x128xf32>, vector<8x128xf32> -> vector<8x128xf32>
    %91 = arith.addf %88, %90 : vector<8x128xf32>
    %c12 = arith.constant 12 : index
    %c0_86 = arith.constant 0 : index
    %92 = vector.load %arg29[%c12, %c0_86] : memref<20x128xf32, #tpu.memory_space<vmem>>, vector<8x128xf32>
    %cst_87 = arith.constant dense<0.000000e+00> : vector<8x128xf32>
    %93 = tpu.matmul %92, %65, %cst_87 {dimension_numbers = #tpu.dot_dimension_numbers<[1], [0], [0], [1], [0, 0, 1, 1], [], []>} : vector<8x128xf32>, vector<128x128xf32>, vector<8x128xf32> -> vector<8x128xf32>
    %94 = arith.addf %91, %93 : vector<8x128xf32>
    %95 = vector.broadcast %58 : vector<1x128xf32> to vector<8x128xf32>
    %96 = arith.addf %94, %95 : vector<8x128xf32>
    %cst_88 = arith.constant 0.000000e+00 : f32
    %97 = vector.broadcast %cst_88 : f32 to vector<8x128xf32>
    %98 = arith.cmpf oge, %96, %97 : vector<8x128xf32>
    %99 = vector.broadcast %59 : vector<1x128xf32> to vector<8x128xf32>
    %100 = arith.mulf %99, %96 : vector<8x128xf32>
    %101 = arith.select %98, %96, %100 : vector<8x128xi1>, vector<8x128xf32>
    %c11_89 = arith.constant 11 : index
    %c0_90 = arith.constant 0 : index
    %102 = vector.load %arg30[%c11_89, %c0_90] : memref<20x128xf32, #tpu.memory_space<vmem>>, vector<8x128xf32>
    tpu.vector_store %arg30[%c11_89, %c0_90], %101 {strides = array<i32>} : memref<20x128xf32, #tpu.memory_space<vmem>>, vector<8x128xf32>,
    %c8 = arith.constant 8 : index
    %c0_91 = arith.constant 0 : index
    %103 = vector.load %arg25[%c8, %c0_91] : memref<16x128xf32, #tpu.memory_space<vmem>>, vector<8x128xf32>
    tpu.vector_store %arg25[%c8, %c0_91], %101 {strides = array<i32>} : memref<16x128xf32, #tpu.memory_space<vmem>>, vector<8x128xf32>,
    %c0_92 = arith.constant 0 : index
    %c0_93 = arith.constant 0 : index
    %104 = vector.load %arg11[%c0_92, %c0_93] : memref<1x128xf32, #tpu.memory_space<vmem>>, vector<1x128xf32>
    %c0_94 = arith.constant 0 : index
    %c0_95 = arith.constant 0 : index
    %105 = vector.load %arg19[%c0_94, %c0_95] : memref<1x128xf32, #tpu.memory_space<vmem>>, vector<1x128xf32>
    %c0_96 = arith.constant 0 : index
    %c0_97 = arith.constant 0 : index
    %c0_98 = arith.constant 0 : index
    %106 = vector.load %arg3[%c0_96, %c0_97, %c0_98] : memref<3x128x128xf32, #tpu.memory_space<vmem>>, vector<1x128x128xf32>
    %107 = vector.shape_cast %106 : vector<1x128x128xf32> to vector<128x128xf32>
    %c1_99 = arith.constant 1 : index
    %c0_100 = arith.constant 0 : index
    %c0_101 = arith.constant 0 : index
    %108 = vector.load %arg3[%c1_99, %c0_100, %c0_101] : memref<3x128x128xf32, #tpu.memory_space<vmem>>, vector<1x128x128xf32>
    %109 = vector.shape_cast %108 : vector<1x128x128xf32> to vector<128x128xf32>
    %c2_102 = arith.constant 2 : index
    %c0_103 = arith.constant 0 : index
    %c0_104 = arith.constant 0 : index
    %110 = vector.load %arg3[%c2_102, %c0_103, %c0_104] : memref<3x128x128xf32, #tpu.memory_space<vmem>>, vector<1x128x128xf32>
    %111 = vector.shape_cast %110 : vector<1x128x128xf32> to vector<128x128xf32>
    %cst_105 = arith.constant 0.000000e+00 : f32
    %112 = vector.broadcast %cst_105 : f32 to vector<4x128xf32>
    %c0_106 = arith.constant 0 : index
    %c0_107 = arith.constant 0 : index
    %113 = tpu.strided_load %arg30[%c0_106, %c0_107] {strides = array<i32: 2, 1>} : memref<20x128xf32, #tpu.memory_space<vmem>>, vector<4x128xf32>
    %cst_108 = arith.constant dense<0.000000e+00> : vector<4x128xf32>
    %114 = tpu.matmul %113, %107, %cst_108 {dimension_numbers = #tpu.dot_dimension_numbers<[1], [0], [0], [1], [0, 0, 1, 1], [], []>} : vector<4x128xf32>, vector<128x128xf32>, vector<4x128xf32> -> vector<4x128xf32>
    %115 = arith.addf %112, %114 : vector<4x128xf32>
    %c1_109 = arith.constant 1 : index
    %c0_110 = arith.constant 0 : index
    %116 = tpu.strided_load %arg30[%c1_109, %c0_110] {strides = array<i32: 2, 1>} : memref<20x128xf32, #tpu.memory_space<vmem>>, vector<4x128xf32>
    %cst_111 = arith.constant dense<0.000000e+00> : vector<4x128xf32>
    %117 = tpu.matmul %116, %109, %cst_111 {dimension_numbers = #tpu.dot_dimension_numbers<[1], [0], [0], [1], [0, 0, 1, 1], [], []>} : vector<4x128xf32>, vector<128x128xf32>, vector<4x128xf32> -> vector<4x128xf32>
    %118 = arith.addf %115, %117 : vector<4x128xf32>
    %c2_112 = arith.constant 2 : index
    %c0_113 = arith.constant 0 : index
    %119 = tpu.strided_load %arg30[%c2_112, %c0_113] {strides = array<i32: 2, 1>} : memref<20x128xf32, #tpu.memory_space<vmem>>, vector<4x128xf32>
    %cst_114 = arith.constant dense<0.000000e+00> : vector<4x128xf32>
    %120 = tpu.matmul %119, %111, %cst_114 {dimension_numbers = #tpu.dot_dimension_numbers<[1], [0], [0], [1], [0, 0, 1, 1], [], []>} : vector<4x128xf32>, vector<128x128xf32>, vector<4x128xf32> -> vector<4x128xf32>
    %121 = arith.addf %118, %120 : vector<4x128xf32>
    %122 = vector.broadcast %104 : vector<1x128xf32> to vector<4x128xf32>
    %123 = arith.addf %121, %122 : vector<4x128xf32>
    %cst_115 = arith.constant 0.000000e+00 : f32
    %124 = vector.broadcast %cst_115 : f32 to vector<4x128xf32>
    %125 = arith.cmpf oge, %123, %124 : vector<4x128xf32>
    %126 = vector.broadcast %105 : vector<1x128xf32> to vector<4x128xf32>
    %127 = arith.mulf %126, %123 : vector<4x128xf32>
    %128 = arith.select %125, %123, %127 : vector<4x128xi1>, vector<4x128xf32>
    %c1_116 = arith.constant 1 : index
    %c0_117 = arith.constant 0 : index
    %129 = vector.load %arg31[%c1_116, %c0_117] : memref<12x128xf32, #tpu.memory_space<vmem>>, vector<4x128xf32>
    tpu.vector_store %arg31[%c1_116, %c0_117], %128 {strides = array<i32>} : memref<12x128xf32, #tpu.memory_space<vmem>>, vector<4x128xf32>,
    %cst_118 = arith.constant 0.000000e+00 : f32
    %130 = vector.broadcast %cst_118 : f32 to vector<4x128xf32>
    %c10_119 = arith.constant 10 : index
    %c0_120 = arith.constant 0 : index
    %131 = tpu.strided_load %arg30[%c10_119, %c0_120] {strides = array<i32: 2, 1>} : memref<20x128xf32, #tpu.memory_space<vmem>>, vector<4x128xf32>
    %cst_121 = arith.constant dense<0.000000e+00> : vector<4x128xf32>
    %132 = tpu.matmul %131, %107, %cst_121 {dimension_numbers = #tpu.dot_dimension_numbers<[1], [0], [0], [1], [0, 0, 1, 1], [], []>} : vector<4x128xf32>, vector<128x128xf32>, vector<4x128xf32> -> vector<4x128xf32>
    %133 = arith.addf %130, %132 : vector<4x128xf32>
    %c11_122 = arith.constant 11 : index
    %c0_123 = arith.constant 0 : index
    %134 = tpu.strided_load %arg30[%c11_122, %c0_123] {strides = array<i32: 2, 1>} : memref<20x128xf32, #tpu.memory_space<vmem>>, vector<4x128xf32>
    %cst_124 = arith.constant dense<0.000000e+00> : vector<4x128xf32>
    %135 = tpu.matmul %134, %109, %cst_124 {dimension_numbers = #tpu.dot_dimension_numbers<[1], [0], [0], [1], [0, 0, 1, 1], [], []>} : vector<4x128xf32>, vector<128x128xf32>, vector<4x128xf32> -> vector<4x128xf32>
    %136 = arith.addf %133, %135 : vector<4x128xf32>
    %c12_125 = arith.constant 12 : index
    %c0_126 = arith.constant 0 : index
    %137 = tpu.strided_load %arg30[%c12_125, %c0_126] {strides = array<i32: 2, 1>} : memref<20x128xf32, #tpu.memory_space<vmem>>, vector<4x128xf32>
    %cst_127 = arith.constant dense<0.000000e+00> : vector<4x128xf32>
    %138 = tpu.matmul %137, %111, %cst_127 {dimension_numbers = #tpu.dot_dimension_numbers<[1], [0], [0], [1], [0, 0, 1, 1], [], []>} : vector<4x128xf32>, vector<128x128xf32>, vector<4x128xf32> -> vector<4x128xf32>
    %139 = arith.addf %136, %138 : vector<4x128xf32>
    %140 = vector.broadcast %104 : vector<1x128xf32> to vector<4x128xf32>
    %141 = arith.addf %139, %140 : vector<4x128xf32>
    %cst_128 = arith.constant 0.000000e+00 : f32
    %142 = vector.broadcast %cst_128 : f32 to vector<4x128xf32>
    %143 = arith.cmpf oge, %141, %142 : vector<4x128xf32>
    %144 = vector.broadcast %105 : vector<1x128xf32> to vector<4x128xf32>
    %145 = arith.mulf %144, %141 : vector<4x128xf32>
    %146 = arith.select %143, %141, %145 : vector<4x128xi1>, vector<4x128xf32>
    %c7 = arith.constant 7 : index
    %c0_129 = arith.constant 0 : index
    %147 = vector.load %arg31[%c7, %c0_129] : memref<12x128xf32, #tpu.memory_space<vmem>>, vector<4x128xf32>
    tpu.vector_store %arg31[%c7, %c0_129], %146 {strides = array<i32>} : memref<12x128xf32, #tpu.memory_space<vmem>>, vector<4x128xf32>,
    %c0_130 = arith.constant 0 : index
    %c0_131 = arith.constant 0 : index
    %148 = vector.load %arg12[%c0_130, %c0_131] : memref<1x128xf32, #tpu.memory_space<vmem>>, vector<1x128xf32>
    %c0_132 = arith.constant 0 : index
    %c0_133 = arith.constant 0 : index
    %149 = vector.load %arg20[%c0_132, %c0_133] : memref<1x128xf32, #tpu.memory_space<vmem>>, vector<1x128xf32>
    %c0_134 = arith.constant 0 : index
    %c0_135 = arith.constant 0 : index
    %c0_136 = arith.constant 0 : index
    %150 = vector.load %arg4[%c0_134, %c0_135, %c0_136] : memref<3x128x128xf32, #tpu.memory_space<vmem>>, vector<1x128x128xf32>
    %151 = vector.shape_cast %150 : vector<1x128x128xf32> to vector<128x128xf32>
    %c1_137 = arith.constant 1 : index
    %c0_138 = arith.constant 0 : index
    %c0_139 = arith.constant 0 : index
    %152 = vector.load %arg4[%c1_137, %c0_138, %c0_139] : memref<3x128x128xf32, #tpu.memory_space<vmem>>, vector<1x128x128xf32>
    %153 = vector.shape_cast %152 : vector<1x128x128xf32> to vector<128x128xf32>
    %c2_140 = arith.constant 2 : index
    %c0_141 = arith.constant 0 : index
    %c0_142 = arith.constant 0 : index
    %154 = vector.load %arg4[%c2_140, %c0_141, %c0_142] : memref<3x128x128xf32, #tpu.memory_space<vmem>>, vector<1x128x128xf32>
    %155 = vector.shape_cast %154 : vector<1x128x128xf32> to vector<128x128xf32>
    %cst_143 = arith.constant 0.000000e+00 : f32
    %156 = vector.broadcast %cst_143 : f32 to vector<4x128xf32>
    %c0_144 = arith.constant 0 : index
    %c0_145 = arith.constant 0 : index
    %157 = vector.load %arg31[%c0_144, %c0_145] : memref<12x128xf32, #tpu.memory_space<vmem>>, vector<4x128xf32>
    %cst_146 = arith.constant dense<0.000000e+00> : vector<4x128xf32>
    %158 = tpu.matmul %157, %151, %cst_146 {dimension_numbers = #tpu.dot_dimension_numbers<[1], [0], [0], [1], [0, 0, 1, 1], [], []>} : vector<4x128xf32>, vector<128x128xf32>, vector<4x128xf32> -> vector<4x128xf32>
    %159 = arith.addf %156, %158 : vector<4x128xf32>
    %c1_147 = arith.constant 1 : index
    %c0_148 = arith.constant 0 : index
    %160 = vector.load %arg31[%c1_147, %c0_148] : memref<12x128xf32, #tpu.memory_space<vmem>>, vector<4x128xf32>
    %cst_149 = arith.constant dense<0.000000e+00> : vector<4x128xf32>
    %161 = tpu.matmul %160, %153, %cst_149 {dimension_numbers = #tpu.dot_dimension_numbers<[1], [0], [0], [1], [0, 0, 1, 1], [], []>} : vector<4x128xf32>, vector<128x128xf32>, vector<4x128xf32> -> vector<4x128xf32>
    %162 = arith.addf %159, %161 : vector<4x128xf32>
    %c2_150 = arith.constant 2 : index
    %c0_151 = arith.constant 0 : index
    %163 = vector.load %arg31[%c2_150, %c0_151] : memref<12x128xf32, #tpu.memory_space<vmem>>, vector<4x128xf32>
    %cst_152 = arith.constant dense<0.000000e+00> : vector<4x128xf32>
    %164 = tpu.matmul %163, %155, %cst_152 {dimension_numbers = #tpu.dot_dimension_numbers<[1], [0], [0], [1], [0, 0, 1, 1], [], []>} : vector<4x128xf32>, vector<128x128xf32>, vector<4x128xf32> -> vector<4x128xf32>
    %165 = arith.addf %162, %164 : vector<4x128xf32>
    %166 = vector.broadcast %148 : vector<1x128xf32> to vector<4x128xf32>
    %167 = arith.addf %165, %166 : vector<4x128xf32>
    %cst_153 = arith.constant 0.000000e+00 : f32
    %168 = vector.broadcast %cst_153 : f32 to vector<4x128xf32>
    %169 = arith.cmpf oge, %167, %168 : vector<4x128xf32>
    %170 = vector.broadcast %149 : vector<1x128xf32> to vector<4x128xf32>
    %171 = arith.mulf %170, %167 : vector<4x128xf32>
    %172 = arith.select %169, %167, %171 : vector<4x128xi1>, vector<4x128xf32>
    %c1_154 = arith.constant 1 : index
    %c0_155 = arith.constant 0 : index
    %173 = vector.load %arg32[%c1_154, %c0_155] : memref<12x128xf32, #tpu.memory_space<vmem>>, vector<4x128xf32>
    tpu.vector_store %arg32[%c1_154, %c0_155], %172 {strides = array<i32>} : memref<12x128xf32, #tpu.memory_space<vmem>>, vector<4x128xf32>,
    %c0_156 = arith.constant 0 : index
    %c0_157 = arith.constant 0 : index
    %174 = vector.load %arg26[%c0_156, %c0_157] : memref<8x128xf32, #tpu.memory_space<vmem>>, vector<4x128xf32>
    tpu.vector_store %arg26[%c0_156, %c0_157], %172 {strides = array<i32>} : memref<8x128xf32, #tpu.memory_space<vmem>>, vector<4x128xf32>,
    %cst_158 = arith.constant 0.000000e+00 : f32
    %175 = vector.broadcast %cst_158 : f32 to vector<4x128xf32>
    %c6 = arith.constant 6 : index
    %c0_159 = arith.constant 0 : index
    %176 = vector.load %arg31[%c6, %c0_159] : memref<12x128xf32, #tpu.memory_space<vmem>>, vector<4x128xf32>
    %cst_160 = arith.constant dense<0.000000e+00> : vector<4x128xf32>
    %177 = tpu.matmul %176, %151, %cst_160 {dimension_numbers = #tpu.dot_dimension_numbers<[1], [0], [0], [1], [0, 0, 1, 1], [], []>} : vector<4x128xf32>, vector<128x128xf32>, vector<4x128xf32> -> vector<4x128xf32>
    %178 = arith.addf %175, %177 : vector<4x128xf32>
    %c7_161 = arith.constant 7 : index
    %c0_162 = arith.constant 0 : index
    %179 = vector.load %arg31[%c7_161, %c0_162] : memref<12x128xf32, #tpu.memory_space<vmem>>, vector<4x128xf32>
    %cst_163 = arith.constant dense<0.000000e+00> : vector<4x128xf32>
    %180 = tpu.matmul %179, %153, %cst_163 {dimension_numbers = #tpu.dot_dimension_numbers<[1], [0], [0], [1], [0, 0, 1, 1], [], []>} : vector<4x128xf32>, vector<128x128xf32>, vector<4x128xf32> -> vector<4x128xf32>
    %181 = arith.addf %178, %180 : vector<4x128xf32>
    %c8_164 = arith.constant 8 : index
    %c0_165 = arith.constant 0 : index
    %182 = vector.load %arg31[%c8_164, %c0_165] : memref<12x128xf32, #tpu.memory_space<vmem>>, vector<4x128xf32>
    %cst_166 = arith.constant dense<0.000000e+00> : vector<4x128xf32>
    %183 = tpu.matmul %182, %155, %cst_166 {dimension_numbers = #tpu.dot_dimension_numbers<[1], [0], [0], [1], [0, 0, 1, 1], [], []>} : vector<4x128xf32>, vector<128x128xf32>, vector<4x128xf32> -> vector<4x128xf32>
    %184 = arith.addf %181, %183 : vector<4x128xf32>
    %185 = vector.broadcast %148 : vector<1x128xf32> to vector<4x128xf32>
    %186 = arith.addf %184, %185 : vector<4x128xf32>
    %cst_167 = arith.constant 0.000000e+00 : f32
    %187 = vector.broadcast %cst_167 : f32 to vector<4x128xf32>
    %188 = arith.cmpf oge, %186, %187 : vector<4x128xf32>
    %189 = vector.broadcast %149 : vector<1x128xf32> to vector<4x128xf32>
    %190 = arith.mulf %189, %186 : vector<4x128xf32>
    %191 = arith.select %188, %186, %190 : vector<4x128xi1>, vector<4x128xf32>
    %c7_168 = arith.constant 7 : index
    %c0_169 = arith.constant 0 : index
    %192 = vector.load %arg32[%c7_168, %c0_169] : memref<12x128xf32, #tpu.memory_space<vmem>>, vector<4x128xf32>
    tpu.vector_store %arg32[%c7_168, %c0_169], %191 {strides = array<i32>} : memref<12x128xf32, #tpu.memory_space<vmem>>, vector<4x128xf32>,
    %c4 = arith.constant 4 : index
    %c0_170 = arith.constant 0 : index
    %193 = vector.load %arg26[%c4, %c0_170] : memref<8x128xf32, #tpu.memory_space<vmem>>, vector<4x128xf32>
    tpu.vector_store %arg26[%c4, %c0_170], %191 {strides = array<i32>} : memref<8x128xf32, #tpu.memory_space<vmem>>, vector<4x128xf32>,
    %c0_171 = arith.constant 0 : index
    %c0_172 = arith.constant 0 : index
    %194 = vector.load %arg13[%c0_171, %c0_172] : memref<1x128xf32, #tpu.memory_space<vmem>>, vector<1x128xf32>
    %c0_173 = arith.constant 0 : index
    %c0_174 = arith.constant 0 : index
    %195 = vector.load %arg21[%c0_173, %c0_174] : memref<1x128xf32, #tpu.memory_space<vmem>>, vector<1x128xf32>
    %c0_175 = arith.constant 0 : index
    %c0_176 = arith.constant 0 : index
    %c0_177 = arith.constant 0 : index
    %196 = vector.load %arg5[%c0_175, %c0_176, %c0_177] : memref<3x128x128xf32, #tpu.memory_space<vmem>>, vector<1x128x128xf32>
    %197 = vector.shape_cast %196 : vector<1x128x128xf32> to vector<128x128xf32>
    %c1_178 = arith.constant 1 : index
    %c0_179 = arith.constant 0 : index
    %c0_180 = arith.constant 0 : index
    %198 = vector.load %arg5[%c1_178, %c0_179, %c0_180] : memref<3x128x128xf32, #tpu.memory_space<vmem>>, vector<1x128x128xf32>
    %199 = vector.shape_cast %198 : vector<1x128x128xf32> to vector<128x128xf32>
    %c2_181 = arith.constant 2 : index
    %c0_182 = arith.constant 0 : index
    %c0_183 = arith.constant 0 : index
    %200 = vector.load %arg5[%c2_181, %c0_182, %c0_183] : memref<3x128x128xf32, #tpu.memory_space<vmem>>, vector<1x128x128xf32>
    %201 = vector.shape_cast %200 : vector<1x128x128xf32> to vector<128x128xf32>
    %cst_184 = arith.constant 0.000000e+00 : f32
    %202 = vector.broadcast %cst_184 : f32 to vector<2x128xf32>
    %c0_185 = arith.constant 0 : index
    %c0_186 = arith.constant 0 : index
    %203 = tpu.strided_load %arg32[%c0_185, %c0_186] {strides = array<i32: 2, 1>} : memref<12x128xf32, #tpu.memory_space<vmem>>, vector<2x128xf32>
    %cst_187 = arith.constant dense<0.000000e+00> : vector<2x128xf32>
    %204 = tpu.matmul %203, %197, %cst_187 {dimension_numbers = #tpu.dot_dimension_numbers<[1], [0], [0], [1], [0, 0, 1, 1], [], []>} : vector<2x128xf32>, vector<128x128xf32>, vector<2x128xf32> -> vector<2x128xf32>
    %205 = arith.addf %202, %204 : vector<2x128xf32>
    %c1_188 = arith.constant 1 : index
    %c0_189 = arith.constant 0 : index
    %206 = tpu.strided_load %arg32[%c1_188, %c0_189] {strides = array<i32: 2, 1>} : memref<12x128xf32, #tpu.memory_space<vmem>>, vector<2x128xf32>
    %cst_190 = arith.constant dense<0.000000e+00> : vector<2x128xf32>
    %207 = tpu.matmul %206, %199, %cst_190 {dimension_numbers = #tpu.dot_dimension_numbers<[1], [0], [0], [1], [0, 0, 1, 1], [], []>} : vector<2x128xf32>, vector<128x128xf32>, vector<2x128xf32> -> vector<2x128xf32>
    %208 = arith.addf %205, %207 : vector<2x128xf32>
    %c2_191 = arith.constant 2 : index
    %c0_192 = arith.constant 0 : index
    %209 = tpu.strided_load %arg32[%c2_191, %c0_192] {strides = array<i32: 2, 1>} : memref<12x128xf32, #tpu.memory_space<vmem>>, vector<2x128xf32>
    %cst_193 = arith.constant dense<0.000000e+00> : vector<2x128xf32>
    %210 = tpu.matmul %209, %201, %cst_193 {dimension_numbers = #tpu.dot_dimension_numbers<[1], [0], [0], [1], [0, 0, 1, 1], [], []>} : vector<2x128xf32>, vector<128x128xf32>, vector<2x128xf32> -> vector<2x128xf32>
    %211 = arith.addf %208, %210 : vector<2x128xf32>
    %212 = vector.broadcast %194 : vector<1x128xf32> to vector<2x128xf32>
    %213 = arith.addf %211, %212 : vector<2x128xf32>
    %cst_194 = arith.constant 0.000000e+00 : f32
    %214 = vector.broadcast %cst_194 : f32 to vector<2x128xf32>
    %215 = arith.cmpf oge, %213, %214 : vector<2x128xf32>
    %216 = vector.broadcast %195 : vector<1x128xf32> to vector<2x128xf32>
    %217 = arith.mulf %216, %213 : vector<2x128xf32>
    %218 = arith.select %215, %213, %217 : vector<2x128xi1>, vector<2x128xf32>
    %c1_195 = arith.constant 1 : index
    %c0_196 = arith.constant 0 : index
    %219 = vector.load %arg33[%c1_195, %c0_196] : memref<8x128xf32, #tpu.memory_space<vmem>>, vector<2x128xf32>
    tpu.vector_store %arg33[%c1_195, %c0_196], %218 {strides = array<i32>} : memref<8x128xf32, #tpu.memory_space<vmem>>, vector<2x128xf32>,
    %cst_197 = arith.constant 0.000000e+00 : f32
    %220 = vector.broadcast %cst_197 : f32 to vector<2x128xf32>
    %c6_198 = arith.constant 6 : index
    %c0_199 = arith.constant 0 : index
    %221 = tpu.strided_load %arg32[%c6_198, %c0_199] {strides = array<i32: 2, 1>} : memref<12x128xf32, #tpu.memory_space<vmem>>, vector<2x128xf32>
    %cst_200 = arith.constant dense<0.000000e+00> : vector<2x128xf32>
    %222 = tpu.matmul %221, %197, %cst_200 {dimension_numbers = #tpu.dot_dimension_numbers<[1], [0], [0], [1], [0, 0, 1, 1], [], []>} : vector<2x128xf32>, vector<128x128xf32>, vector<2x128xf32> -> vector<2x128xf32>
    %223 = arith.addf %220, %222 : vector<2x128xf32>
    %c7_201 = arith.constant 7 : index
    %c0_202 = arith.constant 0 : index
    %224 = tpu.strided_load %arg32[%c7_201, %c0_202] {strides = array<i32: 2, 1>} : memref<12x128xf32, #tpu.memory_space<vmem>>, vector<2x128xf32>
    %cst_203 = arith.constant dense<0.000000e+00> : vector<2x128xf32>
    %225 = tpu.matmul %224, %199, %cst_203 {dimension_numbers = #tpu.dot_dimension_numbers<[1], [0], [0], [1], [0, 0, 1, 1], [], []>} : vector<2x128xf32>, vector<128x128xf32>, vector<2x128xf32> -> vector<2x128xf32>
    %226 = arith.addf %223, %225 : vector<2x128xf32>
    %c8_204 = arith.constant 8 : index
    %c0_205 = arith.constant 0 : index
    %227 = tpu.strided_load %arg32[%c8_204, %c0_205] {strides = array<i32: 2, 1>} : memref<12x128xf32, #tpu.memory_space<vmem>>, vector<2x128xf32>
    %cst_206 = arith.constant dense<0.000000e+00> : vector<2x128xf32>
    %228 = tpu.matmul %227, %201, %cst_206 {dimension_numbers = #tpu.dot_dimension_numbers<[1], [0], [0], [1], [0, 0, 1, 1], [], []>} : vector<2x128xf32>, vector<128x128xf32>, vector<2x128xf32> -> vector<2x128xf32>
    %229 = arith.addf %226, %228 : vector<2x128xf32>
    %230 = vector.broadcast %194 : vector<1x128xf32> to vector<2x128xf32>
    %231 = arith.addf %229, %230 : vector<2x128xf32>
    %cst_207 = arith.constant 0.000000e+00 : f32
    %232 = vector.broadcast %cst_207 : f32 to vector<2x128xf32>
    %233 = arith.cmpf oge, %231, %232 : vector<2x128xf32>
    %234 = vector.broadcast %195 : vector<1x128xf32> to vector<2x128xf32>
    %235 = arith.mulf %234, %231 : vector<2x128xf32>
    %236 = arith.select %233, %231, %235 : vector<2x128xi1>, vector<2x128xf32>
    %c5 = arith.constant 5 : index
    %c0_208 = arith.constant 0 : index
    %237 = vector.load %arg33[%c5, %c0_208] : memref<8x128xf32, #tpu.memory_space<vmem>>, vector<2x128xf32>
    tpu.vector_store %arg33[%c5, %c0_208], %236 {strides = array<i32>} : memref<8x128xf32, #tpu.memory_space<vmem>>, vector<2x128xf32>,
    %c0_209 = arith.constant 0 : index
    %c0_210 = arith.constant 0 : index
    %238 = vector.load %arg14[%c0_209, %c0_210] : memref<1x128xf32, #tpu.memory_space<vmem>>, vector<1x128xf32>
    %c0_211 = arith.constant 0 : index
    %c0_212 = arith.constant 0 : index
    %239 = vector.load %arg22[%c0_211, %c0_212] : memref<1x128xf32, #tpu.memory_space<vmem>>, vector<1x128xf32>
    %c0_213 = arith.constant 0 : index
    %c0_214 = arith.constant 0 : index
    %c0_215 = arith.constant 0 : index
    %240 = vector.load %arg6[%c0_213, %c0_214, %c0_215] : memref<3x128x128xf32, #tpu.memory_space<vmem>>, vector<1x128x128xf32>
    %241 = vector.shape_cast %240 : vector<1x128x128xf32> to vector<128x128xf32>
    %c1_216 = arith.constant 1 : index
    %c0_217 = arith.constant 0 : index
    %c0_218 = arith.constant 0 : index
    %242 = vector.load %arg6[%c1_216, %c0_217, %c0_218] : memref<3x128x128xf32, #tpu.memory_space<vmem>>, vector<1x128x128xf32>
    %243 = vector.shape_cast %242 : vector<1x128x128xf32> to vector<128x128xf32>
    %c2_219 = arith.constant 2 : index
    %c0_220 = arith.constant 0 : index
    %c0_221 = arith.constant 0 : index
    %244 = vector.load %arg6[%c2_219, %c0_220, %c0_221] : memref<3x128x128xf32, #tpu.memory_space<vmem>>, vector<1x128x128xf32>
    %245 = vector.shape_cast %244 : vector<1x128x128xf32> to vector<128x128xf32>
    %cst_222 = arith.constant 0.000000e+00 : f32
    %246 = vector.broadcast %cst_222 : f32 to vector<2x128xf32>
    %c0_223 = arith.constant 0 : index
    %c0_224 = arith.constant 0 : index
    %247 = vector.load %arg33[%c0_223, %c0_224] : memref<8x128xf32, #tpu.memory_space<vmem>>, vector<2x128xf32>
    %cst_225 = arith.constant dense<0.000000e+00> : vector<2x128xf32>
    %248 = tpu.matmul %247, %241, %cst_225 {dimension_numbers = #tpu.dot_dimension_numbers<[1], [0], [0], [1], [0, 0, 1, 1], [], []>} : vector<2x128xf32>, vector<128x128xf32>, vector<2x128xf32> -> vector<2x128xf32>
    %249 = arith.addf %246, %248 : vector<2x128xf32>
    %c1_226 = arith.constant 1 : index
    %c0_227 = arith.constant 0 : index
    %250 = vector.load %arg33[%c1_226, %c0_227] : memref<8x128xf32, #tpu.memory_space<vmem>>, vector<2x128xf32>
    %cst_228 = arith.constant dense<0.000000e+00> : vector<2x128xf32>
    %251 = tpu.matmul %250, %243, %cst_228 {dimension_numbers = #tpu.dot_dimension_numbers<[1], [0], [0], [1], [0, 0, 1, 1], [], []>} : vector<2x128xf32>, vector<128x128xf32>, vector<2x128xf32> -> vector<2x128xf32>
    %252 = arith.addf %249, %251 : vector<2x128xf32>
    %c2_229 = arith.constant 2 : index
    %c0_230 = arith.constant 0 : index
    %253 = vector.load %arg33[%c2_229, %c0_230] : memref<8x128xf32, #tpu.memory_space<vmem>>, vector<2x128xf32>
    %cst_231 = arith.constant dense<0.000000e+00> : vector<2x128xf32>
    %254 = tpu.matmul %253, %245, %cst_231 {dimension_numbers = #tpu.dot_dimension_numbers<[1], [0], [0], [1], [0, 0, 1, 1], [], []>} : vector<2x128xf32>, vector<128x128xf32>, vector<2x128xf32> -> vector<2x128xf32>
    %255 = arith.addf %252, %254 : vector<2x128xf32>
    %256 = vector.broadcast %238 : vector<1x128xf32> to vector<2x128xf32>
    %257 = arith.addf %255, %256 : vector<2x128xf32>
    %cst_232 = arith.constant 0.000000e+00 : f32
    %258 = vector.broadcast %cst_232 : f32 to vector<2x128xf32>
    %259 = arith.cmpf oge, %257, %258 : vector<2x128xf32>
    %260 = vector.broadcast %239 : vector<1x128xf32> to vector<2x128xf32>
    %261 = arith.mulf %260, %257 : vector<2x128xf32>
    %262 = arith.select %259, %257, %261 : vector<2x128xi1>, vector<2x128xf32>
    %c1_233 = arith.constant 1 : index
    %c0_234 = arith.constant 0 : index
    %263 = vector.load %arg34[%c1_233, %c0_234] : memref<8x128xf32, #tpu.memory_space<vmem>>, vector<2x128xf32>
    tpu.vector_store %arg34[%c1_233, %c0_234], %262 {strides = array<i32>} : memref<8x128xf32, #tpu.memory_space<vmem>>, vector<2x128xf32>,
    %c0_235 = arith.constant 0 : index
    %c0_236 = arith.constant 0 : index
    %264 = vector.load %arg27[%c0_235, %c0_236] : memref<4x128xf32, #tpu.memory_space<vmem>>, vector<2x128xf32>
    tpu.vector_store %arg27[%c0_235, %c0_236], %262 {strides = array<i32>} : memref<4x128xf32, #tpu.memory_space<vmem>>, vector<2x128xf32>,
    %cst_237 = arith.constant 0.000000e+00 : f32
    %265 = vector.broadcast %cst_237 : f32 to vector<2x128xf32>
    %c4_238 = arith.constant 4 : index
    %c0_239 = arith.constant 0 : index
    %266 = vector.load %arg33[%c4_238, %c0_239] : memref<8x128xf32, #tpu.memory_space<vmem>>, vector<2x128xf32>
    %cst_240 = arith.constant dense<0.000000e+00> : vector<2x128xf32>
    %267 = tpu.matmul %266, %241, %cst_240 {dimension_numbers = #tpu.dot_dimension_numbers<[1], [0], [0], [1], [0, 0, 1, 1], [], []>} : vector<2x128xf32>, vector<128x128xf32>, vector<2x128xf32> -> vector<2x128xf32>
    %268 = arith.addf %265, %267 : vector<2x128xf32>
    %c5_241 = arith.constant 5 : index
    %c0_242 = arith.constant 0 : index
    %269 = vector.load %arg33[%c5_241, %c0_242] : memref<8x128xf32, #tpu.memory_space<vmem>>, vector<2x128xf32>
    %cst_243 = arith.constant dense<0.000000e+00> : vector<2x128xf32>
    %270 = tpu.matmul %269, %243, %cst_243 {dimension_numbers = #tpu.dot_dimension_numbers<[1], [0], [0], [1], [0, 0, 1, 1], [], []>} : vector<2x128xf32>, vector<128x128xf32>, vector<2x128xf32> -> vector<2x128xf32>
    %271 = arith.addf %268, %270 : vector<2x128xf32>
    %c6_244 = arith.constant 6 : index
    %c0_245 = arith.constant 0 : index
    %272 = vector.load %arg33[%c6_244, %c0_245] : memref<8x128xf32, #tpu.memory_space<vmem>>, vector<2x128xf32>
    %cst_246 = arith.constant dense<0.000000e+00> : vector<2x128xf32>
    %273 = tpu.matmul %272, %245, %cst_246 {dimension_numbers = #tpu.dot_dimension_numbers<[1], [0], [0], [1], [0, 0, 1, 1], [], []>} : vector<2x128xf32>, vector<128x128xf32>, vector<2x128xf32> -> vector<2x128xf32>
    %274 = arith.addf %271, %273 : vector<2x128xf32>
    %275 = vector.broadcast %238 : vector<1x128xf32> to vector<2x128xf32>
    %276 = arith.addf %274, %275 : vector<2x128xf32>
    %cst_247 = arith.constant 0.000000e+00 : f32
    %277 = vector.broadcast %cst_247 : f32 to vector<2x128xf32>
    %278 = arith.cmpf oge, %276, %277 : vector<2x128xf32>
    %279 = vector.broadcast %239 : vector<1x128xf32> to vector<2x128xf32>
    %280 = arith.mulf %279, %276 : vector<2x128xf32>
    %281 = arith.select %278, %276, %280 : vector<2x128xi1>, vector<2x128xf32>
    %c5_248 = arith.constant 5 : index
    %c0_249 = arith.constant 0 : index
    %282 = vector.load %arg34[%c5_248, %c0_249] : memref<8x128xf32, #tpu.memory_space<vmem>>, vector<2x128xf32>
    tpu.vector_store %arg34[%c5_248, %c0_249], %281 {strides = array<i32>} : memref<8x128xf32, #tpu.memory_space<vmem>>, vector<2x128xf32>,
    %c2_250 = arith.constant 2 : index
    %c0_251 = arith.constant 0 : index
    %283 = vector.load %arg27[%c2_250, %c0_251] : memref<4x128xf32, #tpu.memory_space<vmem>>, vector<2x128xf32>
    tpu.vector_store %arg27[%c2_250, %c0_251], %281 {strides = array<i32>} : memref<4x128xf32, #tpu.memory_space<vmem>>, vector<2x128xf32>,
    %c0_252 = arith.constant 0 : index
    %c0_253 = arith.constant 0 : index
    %284 = vector.load %arg15[%c0_252, %c0_253] : memref<1x128xf32, #tpu.memory_space<vmem>>, vector<1x128xf32>
    %c0_254 = arith.constant 0 : index
    %c0_255 = arith.constant 0 : index
    %285 = vector.load %arg23[%c0_254, %c0_255] : memref<1x128xf32, #tpu.memory_space<vmem>>, vector<1x128xf32>
    %c0_256 = arith.constant 0 : index
    %c0_257 = arith.constant 0 : index
    %c0_258 = arith.constant 0 : index
    %286 = vector.load %arg7[%c0_256, %c0_257, %c0_258] : memref<3x128x128xf32, #tpu.memory_space<vmem>>, vector<1x128x128xf32>
    %287 = vector.shape_cast %286 : vector<1x128x128xf32> to vector<128x128xf32>
    %c1_259 = arith.constant 1 : index
    %c0_260 = arith.constant 0 : index
    %c0_261 = arith.constant 0 : index
    %288 = vector.load %arg7[%c1_259, %c0_260, %c0_261] : memref<3x128x128xf32, #tpu.memory_space<vmem>>, vector<1x128x128xf32>
    %289 = vector.shape_cast %288 : vector<1x128x128xf32> to vector<128x128xf32>
    %c2_262 = arith.constant 2 : index
    %c0_263 = arith.constant 0 : index
    %c0_264 = arith.constant 0 : index
    %290 = vector.load %arg7[%c2_262, %c0_263, %c0_264] : memref<3x128x128xf32, #tpu.memory_space<vmem>>, vector<1x128x128xf32>
    %291 = vector.shape_cast %290 : vector<1x128x128xf32> to vector<128x128xf32>
    %cst_265 = arith.constant 0.000000e+00 : f32
    %292 = vector.broadcast %cst_265 : f32 to vector<1x128xf32>
    %c0_266 = arith.constant 0 : index
    %c0_267 = arith.constant 0 : index
    %293 = vector.load %arg34[%c0_266, %c0_267] : memref<8x128xf32, #tpu.memory_space<vmem>>, vector<1x128xf32>
    %cst_268 = arith.constant dense<0.000000e+00> : vector<1x128xf32>
    %294 = tpu.matmul %293, %287, %cst_268 {dimension_numbers = #tpu.dot_dimension_numbers<[1], [0], [0], [1], [0, 0, 1, 1], [], []>} : vector<1x128xf32>, vector<128x128xf32>, vector<1x128xf32> -> vector<1x128xf32>
    %295 = arith.addf %292, %294 : vector<1x128xf32>
    %c1_269 = arith.constant 1 : index
    %c0_270 = arith.constant 0 : index
    %296 = vector.load %arg34[%c1_269, %c0_270] : memref<8x128xf32, #tpu.memory_space<vmem>>, vector<1x128xf32>
    %cst_271 = arith.constant dense<0.000000e+00> : vector<1x128xf32>
    %297 = tpu.matmul %296, %289, %cst_271 {dimension_numbers = #tpu.dot_dimension_numbers<[1], [0], [0], [1], [0, 0, 1, 1], [], []>} : vector<1x128xf32>, vector<128x128xf32>, vector<1x128xf32> -> vector<1x128xf32>
    %298 = arith.addf %295, %297 : vector<1x128xf32>
    %c2_272 = arith.constant 2 : index
    %c0_273 = arith.constant 0 : index
    %299 = vector.load %arg34[%c2_272, %c0_273] : memref<8x128xf32, #tpu.memory_space<vmem>>, vector<1x128xf32>
    %cst_274 = arith.constant dense<0.000000e+00> : vector<1x128xf32>
    %300 = tpu.matmul %299, %291, %cst_274 {dimension_numbers = #tpu.dot_dimension_numbers<[1], [0], [0], [1], [0, 0, 1, 1], [], []>} : vector<1x128xf32>, vector<128x128xf32>, vector<1x128xf32> -> vector<1x128xf32>
    %301 = arith.addf %298, %300 : vector<1x128xf32>
    %302 = arith.addf %301, %284 : vector<1x128xf32>
    %cst_275 = arith.constant 0.000000e+00 : f32
    %303 = vector.broadcast %cst_275 : f32 to vector<1x128xf32>
    %304 = arith.cmpf oge, %302, %303 : vector<1x128xf32>
    %305 = arith.mulf %285, %302 : vector<1x128xf32>
    %306 = arith.select %304, %302, %305 : vector<1x128xi1>, vector<1x128xf32>
    %c1_276 = arith.constant 1 : index
    %c0_277 = arith.constant 0 : index
    %307 = vector.load %arg35[%c1_276, %c0_277] : memref<6x128xf32, #tpu.memory_space<vmem>>, vector<1x128xf32>
    tpu.vector_store %arg35[%c1_276, %c0_277], %306 {strides = array<i32>} : memref<6x128xf32, #tpu.memory_space<vmem>>, vector<1x128xf32>,
    %cst_278 = arith.constant 0.000000e+00 : f32
    %308 = vector.broadcast %cst_278 : f32 to vector<1x128xf32>
    %c4_279 = arith.constant 4 : index
    %c0_280 = arith.constant 0 : index
    %309 = vector.load %arg34[%c4_279, %c0_280] : memref<8x128xf32, #tpu.memory_space<vmem>>, vector<1x128xf32>
    %cst_281 = arith.constant dense<0.000000e+00> : vector<1x128xf32>
    %310 = tpu.matmul %309, %287, %cst_281 {dimension_numbers = #tpu.dot_dimension_numbers<[1], [0], [0], [1], [0, 0, 1, 1], [], []>} : vector<1x128xf32>, vector<128x128xf32>, vector<1x128xf32> -> vector<1x128xf32>
    %311 = arith.addf %308, %310 : vector<1x128xf32>
    %c5_282 = arith.constant 5 : index
    %c0_283 = arith.constant 0 : index
    %312 = vector.load %arg34[%c5_282, %c0_283] : memref<8x128xf32, #tpu.memory_space<vmem>>, vector<1x128xf32>
    %cst_284 = arith.constant dense<0.000000e+00> : vector<1x128xf32>
    %313 = tpu.matmul %312, %289, %cst_284 {dimension_numbers = #tpu.dot_dimension_numbers<[1], [0], [0], [1], [0, 0, 1, 1], [], []>} : vector<1x128xf32>, vector<128x128xf32>, vector<1x128xf32> -> vector<1x128xf32>
    %314 = arith.addf %311, %313 : vector<1x128xf32>
    %c6_285 = arith.constant 6 : index
    %c0_286 = arith.constant 0 : index
    %315 = vector.load %arg34[%c6_285, %c0_286] : memref<8x128xf32, #tpu.memory_space<vmem>>, vector<1x128xf32>
    %cst_287 = arith.constant dense<0.000000e+00> : vector<1x128xf32>
    %316 = tpu.matmul %315, %291, %cst_287 {dimension_numbers = #tpu.dot_dimension_numbers<[1], [0], [0], [1], [0, 0, 1, 1], [], []>} : vector<1x128xf32>, vector<128x128xf32>, vector<1x128xf32> -> vector<1x128xf32>
    %317 = arith.addf %314, %316 : vector<1x128xf32>
    %318 = arith.addf %317, %284 : vector<1x128xf32>
    %cst_288 = arith.constant 0.000000e+00 : f32
    %319 = vector.broadcast %cst_288 : f32 to vector<1x128xf32>
    %320 = arith.cmpf oge, %318, %319 : vector<1x128xf32>
    %321 = arith.mulf %285, %318 : vector<1x128xf32>
    %322 = arith.select %320, %318, %321 : vector<1x128xi1>, vector<1x128xf32>
    %c4_289 = arith.constant 4 : index
    %c0_290 = arith.constant 0 : index
    %323 = vector.load %arg35[%c4_289, %c0_290] : memref<6x128xf32, #tpu.memory_space<vmem>>, vector<1x128xf32>
    tpu.vector_store %arg35[%c4_289, %c0_290], %322 {strides = array<i32>} : memref<6x128xf32, #tpu.memory_space<vmem>>, vector<1x128xf32>,
    %c0_291 = arith.constant 0 : index
    %c0_292 = arith.constant 0 : index
    %324 = vector.load %arg16[%c0_291, %c0_292] : memref<1x128xf32, #tpu.memory_space<vmem>>, vector<1x128xf32>
    %c0_293 = arith.constant 0 : index
    %c0_294 = arith.constant 0 : index
    %325 = vector.load %arg24[%c0_293, %c0_294] : memref<1x128xf32, #tpu.memory_space<vmem>>, vector<1x128xf32>
    %c0_295 = arith.constant 0 : index
    %c0_296 = arith.constant 0 : index
    %c0_297 = arith.constant 0 : index
    %326 = vector.load %arg8[%c0_295, %c0_296, %c0_297] : memref<3x128x128xf32, #tpu.memory_space<vmem>>, vector<1x128x128xf32>
    %327 = vector.shape_cast %326 : vector<1x128x128xf32> to vector<128x128xf32>
    %c1_298 = arith.constant 1 : index
    %c0_299 = arith.constant 0 : index
    %c0_300 = arith.constant 0 : index
    %328 = vector.load %arg8[%c1_298, %c0_299, %c0_300] : memref<3x128x128xf32, #tpu.memory_space<vmem>>, vector<1x128x128xf32>
    %329 = vector.shape_cast %328 : vector<1x128x128xf32> to vector<128x128xf32>
    %c2_301 = arith.constant 2 : index
    %c0_302 = arith.constant 0 : index
    %c0_303 = arith.constant 0 : index
    %330 = vector.load %arg8[%c2_301, %c0_302, %c0_303] : memref<3x128x128xf32, #tpu.memory_space<vmem>>, vector<1x128x128xf32>
    %331 = vector.shape_cast %330 : vector<1x128x128xf32> to vector<128x128xf32>
    %cst_304 = arith.constant 0.000000e+00 : f32
    %332 = vector.broadcast %cst_304 : f32 to vector<1x128xf32>
    %c0_305 = arith.constant 0 : index
    %c0_306 = arith.constant 0 : index
    %333 = vector.load %arg35[%c0_305, %c0_306] : memref<6x128xf32, #tpu.memory_space<vmem>>, vector<1x128xf32>
    %cst_307 = arith.constant dense<0.000000e+00> : vector<1x128xf32>
    %334 = tpu.matmul %333, %327, %cst_307 {dimension_numbers = #tpu.dot_dimension_numbers<[1], [0], [0], [1], [0, 0, 1, 1], [], []>} : vector<1x128xf32>, vector<128x128xf32>, vector<1x128xf32> -> vector<1x128xf32>
    %335 = arith.addf %332, %334 : vector<1x128xf32>
    %c1_308 = arith.constant 1 : index
    %c0_309 = arith.constant 0 : index
    %336 = vector.load %arg35[%c1_308, %c0_309] : memref<6x128xf32, #tpu.memory_space<vmem>>, vector<1x128xf32>
    %cst_310 = arith.constant dense<0.000000e+00> : vector<1x128xf32>
    %337 = tpu.matmul %336, %329, %cst_310 {dimension_numbers = #tpu.dot_dimension_numbers<[1], [0], [0], [1], [0, 0, 1, 1], [], []>} : vector<1x128xf32>, vector<128x128xf32>, vector<1x128xf32> -> vector<1x128xf32>
    %338 = arith.addf %335, %337 : vector<1x128xf32>
    %c2_311 = arith.constant 2 : index
    %c0_312 = arith.constant 0 : index
    %339 = vector.load %arg35[%c2_311, %c0_312] : memref<6x128xf32, #tpu.memory_space<vmem>>, vector<1x128xf32>
    %cst_313 = arith.constant dense<0.000000e+00> : vector<1x128xf32>
    %340 = tpu.matmul %339, %331, %cst_313 {dimension_numbers = #tpu.dot_dimension_numbers<[1], [0], [0], [1], [0, 0, 1, 1], [], []>} : vector<1x128xf32>, vector<128x128xf32>, vector<1x128xf32> -> vector<1x128xf32>
    %341 = arith.addf %338, %340 : vector<1x128xf32>
    %342 = arith.addf %341, %324 : vector<1x128xf32>
    %cst_314 = arith.constant 0.000000e+00 : f32
    %343 = vector.broadcast %cst_314 : f32 to vector<1x128xf32>
    %344 = arith.cmpf oge, %342, %343 : vector<1x128xf32>
    %345 = arith.mulf %325, %342 : vector<1x128xf32>
    %346 = arith.select %344, %342, %345 : vector<1x128xi1>, vector<1x128xf32>
    %c0_315 = arith.constant 0 : index
    %c0_316 = arith.constant 0 : index
    %347 = vector.load %arg28[%c0_315, %c0_316] : memref<2x128xf32, #tpu.memory_space<vmem>>, vector<1x128xf32>
    tpu.vector_store %arg28[%c0_315, %c0_316], %346 {strides = array<i32>} : memref<2x128xf32, #tpu.memory_space<vmem>>, vector<1x128xf32>,
    %cst_317 = arith.constant 0.000000e+00 : f32
    %348 = vector.broadcast %cst_317 : f32 to vector<1x128xf32>
    %c3 = arith.constant 3 : index
    %c0_318 = arith.constant 0 : index
    %349 = vector.load %arg35[%c3, %c0_318] : memref<6x128xf32, #tpu.memory_space<vmem>>, vector<1x128xf32>
    %cst_319 = arith.constant dense<0.000000e+00> : vector<1x128xf32>
    %350 = tpu.matmul %349, %327, %cst_319 {dimension_numbers = #tpu.dot_dimension_numbers<[1], [0], [0], [1], [0, 0, 1, 1], [], []>} : vector<1x128xf32>, vector<128x128xf32>, vector<1x128xf32> -> vector<1x128xf32>
    %351 = arith.addf %348, %350 : vector<1x128xf32>
    %c4_320 = arith.constant 4 : index
    %c0_321 = arith.constant 0 : index
    %352 = vector.load %arg35[%c4_320, %c0_321] : memref<6x128xf32, #tpu.memory_space<vmem>>, vector<1x128xf32>
    %cst_322 = arith.constant dense<0.000000e+00> : vector<1x128xf32>
    %353 = tpu.matmul %352, %329, %cst_322 {dimension_numbers = #tpu.dot_dimension_numbers<[1], [0], [0], [1], [0, 0, 1, 1], [], []>} : vector<1x128xf32>, vector<128x128xf32>, vector<1x128xf32> -> vector<1x128xf32>
    %354 = arith.addf %351, %353 : vector<1x128xf32>
    %c5_323 = arith.constant 5 : index
    %c0_324 = arith.constant 0 : index
    %355 = vector.load %arg35[%c5_323, %c0_324] : memref<6x128xf32, #tpu.memory_space<vmem>>, vector<1x128xf32>
    %cst_325 = arith.constant dense<0.000000e+00> : vector<1x128xf32>
    %356 = tpu.matmul %355, %331, %cst_325 {dimension_numbers = #tpu.dot_dimension_numbers<[1], [0], [0], [1], [0, 0, 1, 1], [], []>} : vector<1x128xf32>, vector<128x128xf32>, vector<1x128xf32> -> vector<1x128xf32>
    %357 = arith.addf %354, %356 : vector<1x128xf32>
    %358 = arith.addf %357, %324 : vector<1x128xf32>
    %cst_326 = arith.constant 0.000000e+00 : f32
    %359 = vector.broadcast %cst_326 : f32 to vector<1x128xf32>
    %360 = arith.cmpf oge, %358, %359 : vector<1x128xf32>
    %361 = arith.mulf %325, %358 : vector<1x128xf32>
    %362 = arith.select %360, %358, %361 : vector<1x128xi1>, vector<1x128xf32>
    %c1_327 = arith.constant 1 : index
    %c0_328 = arith.constant 0 : index
    %363 = vector.load %arg28[%c1_327, %c0_328] : memref<2x128xf32, #tpu.memory_space<vmem>>, vector<1x128xf32>
    tpu.vector_store %arg28[%c1_327, %c0_328], %362 {strides = array<i32>} : memref<2x128xf32, #tpu.memory_space<vmem>>, vector<1x128xf32>,
    return
  }
}

</mosaic_0001>

<bundles_post_ra>
// kernel: _lambda_.1
= control target key start
LH: loop header
LB: loop body
LE: loop exit
PB: predicated region body
PF: predicated region fallthrough
CT: control target
= control target key end

     0   :  { %s3203_s0 = inlined_call_operand.vmem [shape: f32[36,48], index: 0, kind: input, shape index: {}]   ;;  %s3204_s1 = inlined_call_operand.vmem [shape: f32[3,48,128], index: 1, kind: input, shape index: {}]   ;;  %s3205_s2 = inlined_call_operand.vmem [shape: f32[3,128,128], index: 2, kind: input, shape index: {}]   ;;  %s3206_s3 = inlined_call_operand.hbm [shape: f32[3,128,128], index: 3, kind: input, shape index: {}]   ;;  %s3207_s4 = inlined_call_operand.hbm [shape: f32[3,128,128], index: 4, kind: input, shape index: {}]   ;;  %s3208_s5 = inlined_call_operand.hbm [shape: f32[3,128,128], index: 5, kind: input, shape index: {}]   ;;  %s3209_s6 = inlined_call_operand.hbm [shape: f32[3,128,128], index: 6, kind: input, shape index: {}]   ;;  %s3210_s7 = inlined_call_operand.hbm [shape: f32[3,128,128], index: 7, kind: input, shape index: {}]   ;;  %s3211_s8 = inlined_call_operand.hbm [shape: f32[3,128,128], index: 8, kind: input, shape index: {}]   ;;  %s3212_s9 = inlined_call_operand.vmem [shape: f32[1,128], index: 9, kind: input, shape index: {}]   ;;  %s3213_s10 = inlined_call_operand.vmem [shape: f32[1,128], index: 10, kind: input, shape index: {}]   ;;  %s3214_s11 = inlined_call_operand.vmem [shape: f32[1,128], index: 11, kind: input, shape index: {}]   ;;  %s3215_s12 = inlined_call_operand.vmem [shape: f32[1,128], index: 12, kind: input, shape index: {}]   ;;  %s3216_s13 = inlined_call_operand.vmem [shape: f32[1,128], index: 13, kind: input, shape index: {}]   ;;  %s3217_s14 = inlined_call_operand.vmem [shape: f32[1,128], index: 14, kind: input, shape index: {}]   ;;  %s3218_s15 = inlined_call_operand.vmem [shape: f32[1,128], index: 15, kind: input, shape index: {}]   ;;  %s3219_s16 = inlined_call_operand.vmem [shape: f32[1,128], index: 16, kind: input, shape index: {}]   ;;  %s3220_s17 = inlined_call_operand.vmem [shape: f32[1,128], index: 17, kind: input, shape index: {}, may-alias: {17,18,19,20,21,22,23,24}]   ;;  %s3221_s18 = inlined_call_operand.vmem [shape: f32[1,128], index: 18, kind: input, shape index: {}, may-alias: {17,18,19,20,21,22,23,24}]   ;;  %s3222_s19 = inlined_call_operand.vmem [shape: f32[1,128], index: 19, kind: input, shape index: {}, may-alias: {17,18,19,20,21,22,23,24}]   ;;  %s3223_s20 = inlined_call_operand.vmem [shape: f32[1,128], index: 20, kind: input, shape index: {}, may-alias: {17,18,19,20,21,22,23,24}]   ;;  %s3224_s21 = inlined_call_operand.vmem [shape: f32[1,128], index: 21, kind: input, shape index: {}, may-alias: {17,18,19,20,21,22,23,24}]   ;;  %s3225_s22 = inlined_call_operand.vmem [shape: f32[1,128], index: 22, kind: input, shape index: {}, may-alias: {17,18,19,20,21,22,23,24}]   ;;  %s3226_s23 = inlined_call_operand.vmem [shape: f32[1,128], index: 23, kind: input, shape index: {}, may-alias: {17,18,19,20,21,22,23,24}]   ;;  %s3227_s24 = inlined_call_operand.vmem [shape: f32[1,128], index: 24, kind: input, shape index: {}, may-alias: {17,18,19,20,21,22,23,24}]   ;;  %s3228_s25 = inlined_call_operand.vmem [shape: f32[16,128], index: 25, kind: output, shape index: {0}]   ;;  %s3229_s26 = inlined_call_operand.vmem [shape: f32[8,128], index: 26, kind: output, shape index: {1}]   ;;  %s3230_s27 = inlined_call_operand.vmem [shape: f32[4,128], index: 27, kind: output, shape index: {2}]   ;;  %s3231_s28 = inlined_call_operand.hbm [shape: f32[2,128], index: 28, kind: output, shape index: {3}]  }
   0x1   :  { %3235 = sst [smem:[#allocation26_spill]] %s3203_s0 }
   0x2   :  { %3236 = sst [smem:[#allocation27_spill]] %s3204_s1 }
   0x3   :  { %3237 = sst [smem:[#allocation28_spill]] %s3205_s2 }
   0x4   :  { %3238 = sst [smem:[#allocation29_spill]] %s3206_s3 }
   0x5   :  { %3239 = sst [smem:[#allocation30_spill]] %s3207_s4 }
   0x6   :  { %3240 = sst [smem:[#allocation31_spill]] %s3208_s5 }
   0x7   :  { %3241 = sst [smem:[#allocation32_spill]] %s3209_s6 }
   0x8   :  { %3242 = sst [smem:[#allocation33_spill]] %s3210_s7 }
   0x9   :  { %3243 = sst [smem:[#allocation34_spill]] %s3211_s8 }
   0xa   :  { %3244 = sst [smem:[#allocation35_spill]] %s3212_s9 }
   0xb   :  { %3245 = sst [smem:[#allocation36_spill]] %s3213_s10 }
   0xc   :  { %3246 = sst [smem:[#allocation37_spill]] %s3214_s11 }
   0xd   :  { %3247 = sst [smem:[#allocation38_spill]] %s3215_s12 }
   0xe   :  { %3248 = sst [smem:[#allocation39_spill]] %s3227_s24 }
   0xf   :  { %3249 = sst [smem:[#allocation40_spill]] %s3231_s28 }
  0x10   :  { %34 = vsyncpa [#allocation10], 0 }
  0x11   :  { %35 = vsyncpa [#allocation13], 0 }
  0x12   :  { %36 = vsyncpa [#allocation16], 0 }
  0x13   :  { %37 = vsyncpa [#allocation19], 0 }
  0x14   :  { %38 = vsyncpa [#allocation11], 0  ;;  %s3250_s9 = sld [smem:[#allocation30_spill]]  ;;  %s2045_s3 = smov [#allocation12]  }
  0x15   :  { %s64_s6 = sshll.u32 %s2045_s3, 4  ;;  %s3251_s11 = sld [smem:[#allocation32_spill]]  ;;  %s65_s6 = int_to_ptr.vmem [resolvable:$true] %s64_s6 }
  0x16   :  { %s2046_s2 = smov 128   ;;  %s2047_s7 = smov 8  }
  0x17   :  { %s2048_s12 = smov [#allocation15]   ;;  %s3252_s5 = sld [smem:[#allocation29_spill]] }
  0x18   :  { %s90_s1 = sshll.u32 %s2048_s12, 4  ;;  %s3253_s0 = sld [smem:[#allocation31_spill]]  ;;  %s91_s1 = int_to_ptr.vmem [resolvable:$true] %s90_s1 }
  0x19   :  { %s2049_s28 = smov [#allocation9]   ;;  %s3254_s8 = sld [smem:[#allocation33_spill]] }
  0x1a   :  { %s62_s30 = sshll.u32 %s3250_s9, 4  ;;  %s51_s24 = sshll.u32 %s2049_s28, 4  ;;  %s63_s30 = int_to_ptr.hbm [resolvable:$true] %s62_s30  ;;  %s52_s24 = int_to_ptr.vmem [resolvable:$true] %s51_s24 }
  0x1b   :  { %s88_s29 = sshll.u32 %s3251_s11, 4  ;;  %s2051_s10 = smov [#allocation17]   ;;  %s89_s29 = int_to_ptr.hbm [resolvable:$true] %s88_s29 }
  0x1c   :  { %70 = dma.hbm_to_vmem [thread:$0]  %s63_s30, 6144, %s65_s6, [#allocation13], %s2046_s2, %s2046_s2, %s2047_s7  }
  0x1d   :  { %s49_s9 = sshll.u32 %s3252_s5, 4  ;;  %s2050_s30 = smov [#allocation14]   ;;  %s50_s9 = int_to_ptr.hbm [resolvable:$true] %s49_s9 }
  0x1e   :  { %96 = dma.hbm_to_vmem [thread:$0]  %s89_s29, 6144, %s91_s1, [#allocation16], %s2046_s2, %s2046_s2, %s2047_s7  }
  0x1f   :  { %s75_s11 = sshll.u32 %s3253_s0, 4  ;;  %s77_s6 = sshll.u32 %s2050_s30, 4  ;;  %s76_s11 = int_to_ptr.hbm [resolvable:$true] %s75_s11  ;;  %s78_s6 = int_to_ptr.vmem [resolvable:$true] %s77_s6 }
  0x20   :  { %57 = dma.hbm_to_vmem [thread:$0]  %s50_s9, 6144, %s52_s24, [#allocation10], %s2046_s2, %s2046_s2, %s2047_s7  }
  0x21   :  { %s101_s5 = sshll.u32 %s3254_s8, 4  ;;  %s3255_s1 = sld [smem:[#allocation34_spill]]  ;;  %s102_s5 = int_to_ptr.hbm [resolvable:$true] %s101_s5 }
  0x22   :  { %83 = dma.hbm_to_vmem [thread:$0]  %s76_s11, 6144, %s78_s6, [#allocation13], %s2046_s2, %s2046_s2, %s2047_s7  }
  0x23   :  { %s103_s0 = sshll.u32 %s2051_s10, 4  ;;  %s2052_s24 = smov [#allocation18]   ;;  %s104_s0 = int_to_ptr.vmem [resolvable:$true] %s103_s0 }
  0x24   :  { %109 = dma.hbm_to_vmem [thread:$0]  %s102_s5, 6144, %s104_s0, [#allocation16], %s2046_s2, %s2046_s2, %s2047_s7  }
  0x25   :  { %s116_s9 = sshll.u32 %s2052_s24, 4  ;;  %s117_s9 = int_to_ptr.vmem [resolvable:$true] %s116_s9 }
  0x27   :  { %s114_s3 = sshll.u32 %s3255_s1, 4  ;;  %s115_s3 = int_to_ptr.hbm [resolvable:$true] %s114_s3 }
  0x28   :  { %122 = dma.hbm_to_vmem [thread:$0]  %s115_s3, 6144, %s117_s9, [#allocation19], %s2046_s2, %s2046_s2, %s2047_s7  }
  0x29   :  { %2035 = dma.done.wait [#allocation10], 6144  }
  0x2a   :  { %2036 = vsyncadd [#allocation10], 4294961152 }
  0x2b   :  { %2037 = dma.done.wait [#allocation13], 12288  }
  0x2c   :  { %2038 = vsyncadd [#allocation13], 4294955008 }
  0x2d   :  { %2039 = dma.done.wait [#allocation16], 12288  }
  0x2e   :  { %2040 = vsyncadd [#allocation16], 4294955008 }
  0x2f   :  { %2041 = dma.done.wait [#allocation19], 6144  }
  0x30   :  { %2042 = vsyncadd [#allocation19], 4294961152  ;;  %s3256_s6 = sld [smem:[#allocation27_spill]]  ;;  %vm217_vm0 = vcmask 392192   ;;  %v2053_v62 = vmov 0.0  }
  0x31   :  { %s3257_s1 = sld [smem:[#allocation28_spill]]  ;;  %179 = vst [vmem:[#allocation2] sm:$0xff] %v2053_v62 }
  0x32   :  { %s3258_s30 = sld [smem:[#allocation26_spill]]  ;;  %180 = vst [vmem:[#allocation2 + $0x8] sm:$0xff] %v2053_v62 }
  0x33   :  { %181 = vst [vmem:[#allocation2 + $0x10] sm:$0xf] %v2053_v62  ;;  %s3259_s7 = sld [smem:[#allocation35_spill]] }
  0x34   :  { %182 = vst [vmem:[#allocation3] sm:$0xff] %v2053_v62  ;;  %s3260_s10 = sld [smem:[#allocation36_spill]] }
  0x35   :  { %183 = vst [vmem:[#allocation3 + $0x8] sm:$0xff] %v2053_v62  ;;  %s3263_s8 = sld [smem:[#allocation39_spill]] }
  0x36   :  { %v1795_v0 = vld [vmem:[%s3256_s6 + $0x58] sm:$0xff]  ;;  %v1794_v1 = vld [vmem:[%s3256_s6 + $0x50] sm:$0xff]  ;;  %v2245_v2 = vld [vmem:[%s3256_s6 + $0x28] sm:$0xff]  ;;  %184 = vst [vmem:[#allocation3 + $0x10] sm:$0xf] %v2053_v62  ;;  %s3264_s2 = sld [smem:[#allocation40_spill]] }
  0x37   :  { %231 = vmatpush.msra.mxu0 %v1795_v0  ;;  %254 = vmatpush.msra.mxu1 %v2245_v2  ;;  %v2251_v3 = vld [vmem:[%s3256_s6 + $0x20] sm:$0xff]  ;;  %v1793_v4 = vld [vmem:[%s3256_s6 + $0x48] sm:$0xff]  ;;  %v2259_v5 = vld [vmem:[%s3256_s6 + $0x18] sm:$0xff]  ;;  %185 = vst [vmem:[#allocation4] sm:$0xff] %v2053_v62 }
  0x38   :  { %v1792_v6 = vld [vmem:[%s3256_s6 + $0x40] sm:$0xff]  ;;  %v2268_v7 = vld [vmem:[%s3256_s6 + $0x10] sm:$0xff]  ;;  %v1791_v8 = vld [vmem:[%s3256_s6 + $0x38] sm:$0xff]  ;;  %186 = vst [vmem:[#allocation4 + $0x8] sm:$0xf] %v2053_v62 }
  0x39   :  { %232 = vmatpush.msra.mxu0 %v1794_v1  ;;  %255 = vmatpush.msra.mxu1 %v2251_v3  ;;  %v2277_v9 = vld [vmem:[%s3256_s6 + $0x8] sm:$0xff]  ;;  %v1790_v10 = vld [vmem:[%s3256_s6 + $0x30] sm:$0xff]  ;;  %v2286_v11 = vld [vmem:[%s3256_s6] sm:$0xff]  ;;  %187 = vst [vmem:[#allocation5] sm:$0xff] %v2053_v62 }
  0x3a   :  { %v2291_v12 = vld [vmem:[%s3257_s1 + $0xf8] sm:$0xff]  ;;  %v1801_v14 = vld [vmem:[%s3256_s6 + $0x88] sm:$0xff]  ;;  %v1800_v17 = vld [vmem:[%s3256_s6 + $0x80] sm:$0xff]  ;;  %188 = vst [vmem:[#allocation5 + $0x8] sm:$0xf] %v2053_v62 }
  0x3b   :  { %233 = vmatpush.msra.mxu0 %v1793_v4  ;;  %256 = vmatpush.msra.mxu1 %v2259_v5  ;;  %v2296_v13 = vld [vmem:[%s3257_s1 + $0x78] sm:$0xff]  ;;  %v1802_v15 = vld [vmem:[%s3258_s30 + $0x1] ss:$2 sm:$0xff]  ;;  %v214_v16 = vld [vmem:[%s3258_s30] ss:$2 sm:$0xff]  ;;  %189 = vst [vmem:[#allocation6] sm:$0xff] %v2053_v62 }
  0x3c   :  { %436 = vmatpush.msra.mxu2 %v2291_v12  ;;  %456 = vmatpush.msra.mxu3 %v2296_v13  ;;  %v2317_v18 = vld [vmem:[%s3257_s1 + $0xf0] sm:$0xff]  ;;  %v1799_v20 = vld [vmem:[%s3256_s6 + $0x78] sm:$0xff]  ;;  %v2332_v21 = vld [vmem:[%s3257_s1 + $0xe8] sm:$0xff]  ;;  %190 = vst [vmem:[#allocation7] sm:$0xff] %v2053_v62 }
  0x3d   :  { %234 = vmatpush.msra.mxu0 %v1792_v6  ;;  %257 = vmatpush.msra.mxu1 %v2268_v7  ;;  %v2322_v19 = vld [vmem:[%s3257_s1 + $0x70] sm:$0xff]  ;;  %v2337_v22 = vld [vmem:[%s3257_s1 + $0x68] sm:$0xff]  ;;  %v2350_v25 = vld [vmem:[%s3257_s1 + $0xe0] sm:$0xff]  ;;  %191 = vst [vmem:[#allocation8] sm:$0x3f] %v2053_v62 }
  0x3e   :  { %v1798_v23 = vld [vmem:[%s3256_s6 + $0x70] sm:$0xff]  ;;  %437 = vmatpush.msra.mxu2 %v2317_v18  ;;  %457 = vmatpush.msra.mxu3 %v2322_v19  ;;  %v1797_v24 = vld [vmem:[%s3256_s6 + $0x68] sm:$0xff]  ;;  %v2355_v26 = vld [vmem:[%s3257_s1 + $0x60] sm:$0xff] }
  0x3f   :  { %235 = vmatpush.msra.mxu0 %v1791_v8  ;;  %258 = vmatpush.msra.mxu1 %v2277_v9  ;;  %v1796_v27 = vld [vmem:[%s3256_s6 + $0x60] sm:$0xff]  ;;  %v2365_v28 = vld [vmem:[%s3257_s1 + $0xd8] sm:$0xff]  ;;  %v1823_v32 = vld [vmem:[%s3257_s1 + $0xd0] sm:$0xff] }
  0x40   :  { %438 = vmatpush.msra.mxu2 %v2332_v21  ;;  %458 = vmatpush.msra.mxu3 %v2337_v22  ;;  %v2370_v29 = vld [vmem:[%s3257_s1 + $0x58] sm:$0xff]  ;;  %v1805_v30 = vld [vmem:[%s3258_s30 + $0x2] ss:$2 sm:$0xff] }
  0x41   :  { %236 = vmatpush.msra.mxu0 %v1790_v10  ;;  %259 = vmatpush.msra.mxu1 %v2286_v11  ;;  %v1808_v31 = vld [vmem:[%s3258_s30 + $0x13] ss:$2 sm:$0xff]  ;;  %v1822_v34 = vld [vmem:[%s3257_s1 + $0xc8] sm:$0xff]  ;;  %v1811_v41 = vld [vmem:[%s3258_s30 + $0x14] ss:$2 sm:$0xff] }
  0x42   :  { %1803 = vmatmul.msk.f32.vlgmr.msra.gmra.mxu0 %vm217_vm0, %v1802_v15  ;;  %1804 = vmatmul.msk.f32.vlgmr.msra.gmra.mxu1 %vm217_vm0, %v214_v16  ;;  %v2389_v33 = vld [vmem:[%s3257_s1 + $0x50] sm:$0xff]  ;;  %v2399_v35 = vld [vmem:[%s3257_s1 + $0x48] sm:$0xff]  ;;  %v1821_v36 = vld [vmem:[%s3257_s1 + $0xc0] sm:$0xff] }
  0x43   :  { %279 = vmatpush.msrb.mxu0 %v1801_v14  ;;  %318 = vmatpush.msrb.mxu1 %v1795_v0  ;;  %v2409_v37 = vld [vmem:[%s3257_s1 + $0x40] sm:$0xff]  ;;  %v1820_v38 = vld [vmem:[%s3257_s1 + $0xb8] sm:$0xff]  ;;  %v1819_v40 = vld [vmem:[%s3257_s1 + $0xb0] sm:$0xff] }
  0x44   :  { %439 = vmatpush.msra.mxu2 %v2350_v25  ;;  %459 = vmatpush.msra.mxu3 %v2355_v26  ;;  %v2419_v39 = vld [vmem:[%s3257_s1 + $0x38] sm:$0xff]  ;;  %v2437_v43 = vld [vmem:[%s3257_s1 + $0x30] sm:$0xff]  ;;  %v1818_v45 = vld [vmem:[%s3257_s1 + $0xa8] sm:$0xff] }
  0x45   :  { %280 = vmatpush.msrb.mxu0 %v1800_v17  ;;  %319 = vmatpush.msrb.mxu1 %v1794_v1  ;;  %v1807_v42 = vld [vmem:[%s3258_s30 + $0x12] ss:$2 sm:$0xff]  ;;  %v2452_v46 = vld [vmem:[%s3257_s1 + $0x28] sm:$0xff]  ;;  %s3261_s30 = sld [smem:[#allocation37_spill]] }
  0x46   :  { %440 = vmatpush.msra.mxu2 %v2365_v28  ;;  %460 = vmatpush.msra.mxu3 %v2370_v29  ;;  %v2442_v44 = vld [vmem:[%s3257_s1 + $0x178] sm:$0xff]  ;;  %v2459_v47 = vld [vmem:[%s3257_s1 + $0x170] sm:$0xff]  ;;  %v1817_v48 = vld [vmem:[%s3257_s1 + $0xa0] sm:$0xff] }
  0x47   :  { %281 = vmatpush.msrb.mxu0 %v1799_v20  ;;  %320 = vmatpush.msrb.mxu1 %v1793_v4  ;;  %v2468_v49 = vld [vmem:[%s3257_s1 + $0x20] sm:$0xff]  ;;  %v2474_v50 = vld [vmem:[%s3257_s1 + $0x168] sm:$0xff]  ;;  %v1816_v51 = vld [vmem:[%s3257_s1 + $0x98] sm:$0xff] }
  0x48   :  { %441 = vmatpush.msra.mxu2 %v1823_v32  ;;  %461 = vmatpush.msra.mxu3 %v2389_v33  ;;  %v2484_v52 = vld [vmem:[%s3257_s1 + $0x18] sm:$0xff]  ;;  %v1841_v53 = vld [vmem:[%s3257_s1 + $0x160] sm:$0xff]  ;;  %v1815_v54 = vld [vmem:[%s3257_s1 + $0x90] sm:$0xff] }
  0x49   :  { %282 = vmatpush.msrb.mxu0 %v1798_v23  ;;  %321 = vmatpush.msrb.mxu1 %v1792_v6  ;;  %v2502_v55 = vld [vmem:[%s3257_s1 + $0x10] sm:$0xff]  ;;  %v1840_v56 = vld [vmem:[%s3257_s1 + $0x158] sm:$0xff]  ;;  %v1814_v57 = vld [vmem:[%s3257_s1 + $0x88] sm:$0xff] }
  0x4a   :  { %442 = vmatpush.msra.mxu2 %v1822_v34  ;;  %462 = vmatpush.msra.mxu3 %v2399_v35  ;;  %v2514_v58 = vld [vmem:[%s3257_s1 + $0x8] sm:$0xff]  ;;  %v1839_v59 = vld [vmem:[%s3257_s1 + $0x150] sm:$0xff]  ;;  %v1813_v60 = vld [vmem:[%s3257_s1 + $0x80] sm:$0xff] }
  0x4b   :  { %283 = vmatpush.msrb.mxu0 %v1797_v24  ;;  %322 = vmatpush.msrb.mxu1 %v1791_v8  ;;  %v2525_v61 = vld [vmem:[%s3257_s1] sm:$0xff]  ;;  %v1838_v63 = vld [vmem:[%s3257_s1 + $0x148] sm:$0xff]  ;;  %v1836_v1 = vld [vmem:[%s3257_s1 + $0x138] sm:$0xff] }
  0x4c   :  { %443 = vmatpush.msra.mxu2 %v1821_v36  ;;  %463 = vmatpush.msra.mxu3 %v2409_v37  ;;  %v1837_v0 = vld [vmem:[%s3257_s1 + $0x140] sm:$0xff]  ;;  %v1831_v6 = vld [vmem:[%s3257_s1 + $0x110] sm:$0xff]  ;;  %v2591_v16 = vld [vmem:[#allocation9 + $0x70] sm:$0xff] }
  0x4d   :  { %284 = vmatpush.msrb.mxu0 %v1796_v27  ;;  %323 = vmatpush.msrb.mxu1 %v1790_v10  ;;  %v1833_v4 = vld [vmem:[%s3257_s1 + $0x120] sm:$0xff]  ;;  %v2667_v62 = vld [vmem:[#allocation9 + $0x10] sm:$0xff] }
  0x4e   :  { %1806 = vmatmul.msk.f32.vlgmr.msrb.gmra.mxu0 %vm217_vm0, %v1805_v30  ;;  %1809 = vmatmul.msk.f32.vlgmr.msrb.gmra.mxu1 %vm217_vm0, %v1808_v31  ;;  %v1829_v8 = vld [vmem:[%s3257_s1 + $0x100] sm:$0xff]  ;;  %v2620_v30 = vld [vmem:[#allocation9 + $0x50] sm:$0xff] }
  0x4f   :  { %366 = vmatpush.msra.mxu1 %v1801_v14  ;;  %341 = vmatpush.msra.mxu0 %v2245_v2  ;;  %v1835_v2 = vld [vmem:[%s3257_s1 + $0x130] sm:$0xff]  ;;  %v2587_v15 = vld [vmem:[%s3259_s7] ss:$0 sm:$0xff]  ;;  %s1771_s7 = sshll.u32 %s3264_s2, 4  ;;  %s1772_s7 = int_to_ptr.hbm [resolvable:$true] %s1771_s7 }
  0x50   :  { %444 = vmatpush.msra.mxu2 %v1820_v38  ;;  %464 = vmatpush.msra.mxu3 %v2419_v39 }
  0x51   :  { %367 = vmatpush.msra.mxu1 %v1800_v17  ;;  %342 = vmatpush.msra.mxu0 %v2251_v3  ;;  %v1834_v3 = vld [vmem:[%s3257_s1 + $0x128] sm:$0xff] }
  0x52   :  { %445 = vmatpush.msra.mxu2 %v1819_v40  ;;  %465 = vmatpush.msra.mxu3 %v2437_v43 }
  0x53   :  { %368 = vmatpush.msra.mxu1 %v1799_v20  ;;  %343 = vmatpush.msra.mxu0 %v2259_v5  ;;  %v1832_v5 = vld [vmem:[%s3257_s1 + $0x118] sm:$0xff] }
  0x54   :  { %446 = vmatpush.msra.mxu2 %v1818_v45  ;;  %466 = vmatpush.msra.mxu3 %v2452_v46 }
  0x55   :  { %369 = vmatpush.msra.mxu1 %v1798_v23  ;;  %344 = vmatpush.msra.mxu0 %v2268_v7  ;;  %v1830_v7 = vld [vmem:[%s3257_s1 + $0x108] sm:$0xff]  ;;  %s3262_s1 = sld [smem:[#allocation38_spill]] }
  0x56   :  { %447 = vmatpush.msra.mxu2 %v1817_v48  ;;  %467 = vmatpush.msra.mxu3 %v2468_v49  ;;  %v2604_v23 = vld [vmem:[#allocation9 + $0xe0] sm:$0xff] }
  0x57   :  { %370 = vmatpush.msra.mxu1 %v1797_v24  ;;  %345 = vmatpush.msra.mxu0 %v2277_v9  ;;  %v2606_v24 = vld [vmem:[#allocation9 + $0x60] sm:$0xff] }
  0x58   :  { %448 = vmatpush.msra.mxu2 %v1816_v51  ;;  %468 = vmatpush.msra.mxu3 %v2484_v52 }
  0x59   :  { %371 = vmatpush.msra.mxu1 %v1796_v27  ;;  %346 = vmatpush.msra.mxu0 %v2286_v11  ;;  %v2578_v11 = vld [vmem:[#allocation9 + $0xf8] sm:$0xff] }
  0x5a   :  { %1812 = vmatmul.msk.f32.vlgmr.msra.gmra.mxu1 %vm217_vm0, %v1811_v41  ;;  %1810 = vmatmul.msk.f32.vlgmr.msra.gmra.mxu0 %vm217_vm0, %v1807_v42  ;;  %v2613_v27 = vld [vmem:[#allocation9 + $0x58] sm:$0xff] }
  0x5b   :  { %477 = vmatpush.msrb.mxu0 %v2442_v44  ;;  %512 = vmatpush.msrb.mxu1 %v2291_v12  ;;  %v2580_v12 = vld [vmem:[#allocation9 + $0x78] sm:$0xff] }
  0x5c   :  { %449 = vmatpush.msra.mxu2 %v1815_v54  ;;  %469 = vmatpush.msra.mxu3 %v2502_v55  ;;  %v606_v41 = vld [vmem:[#allocation9 + $0xb8] sm:$0xff] }
  0x5d   :  { %478 = vmatpush.msrb.mxu0 %v2459_v47  ;;  %513 = vmatpush.msrb.mxu1 %v2317_v18  ;;  %v2593_v18 = vld [vmem:[#allocation9 + $0xe8] sm:$0xff]  ;;  %v2638_v42 = vld [vmem:[#allocation9 + $0x38] sm:$0xff] }
  0x5e   :  { %450 = vmatpush.msra.mxu2 %v1814_v57  ;;  %470 = vmatpush.msra.mxu3 %v2514_v58 }
  0x5f   :  { %479 = vmatpush.msrb.mxu0 %v2474_v50  ;;  %514 = vmatpush.msrb.mxu1 %v2332_v21  ;;  %v2600_v21 = vld [vmem:[%s3220_s17] ss:$0 sm:$0xff] }
  0x60   :  { %451 = vmatpush.msra.mxu2 %v1813_v60  ;;  %471 = vmatpush.msra.mxu3 %v2525_v61 }
  0x61   :  { %480 = vmatpush.msrb.mxu0 %v1841_v53  ;;  %515 = vmatpush.msrb.mxu1 %v2350_v25 }
  0x62   :  { %532 = vmatpush.msrb.mxu2 %v2296_v13  ;;  %553 = vmatpush.msrb.mxu3 %v2442_v44  ;;  %v2582_v13 = vld [vmem:[#allocation9 + $0xf0] sm:$0xff] }
  0x63   :  { %516 = vmatpush.msrb.mxu1 %v2365_v28  ;;  %481 = vmatpush.msrb.mxu0 %v1840_v56  ;;  %v605_v44 = vld [vmem:[#allocation9 + $0xb0] sm:$0xff] }
  0x64   :  { %533 = vmatpush.msrb.mxu2 %v2322_v19  ;;  %554 = vmatpush.msrb.mxu3 %v2459_v47  ;;  %v2595_v19 = vld [vmem:[#allocation9 + $0x68] sm:$0xff] }
  0x65   :  { %517 = vmatpush.msrb.mxu1 %v1823_v32  ;;  %482 = vmatpush.msrb.mxu0 %v1839_v59  ;;  %v2624_v32 = vld [vmem:[#allocation9 + $0x178] sm:$0xff] }
  0x66   :  { %534 = vmatpush.msrb.mxu2 %v2337_v22  ;;  %555 = vmatpush.msrb.mxu3 %v2474_v50  ;;  %v604_v50 = vld [vmem:[#allocation9 + $0xa8] sm:$0xff] }
  0x67   :  { %518 = vmatpush.msrb.mxu1 %v1822_v34  ;;  %483 = vmatpush.msrb.mxu0 %v1838_v63  ;;  %v2626_v34 = vld [vmem:[#allocation9 + $0x48] sm:$0xff] }
  0x68   :  { %535 = vmatpush.msrb.mxu2 %v2355_v26  ;;  %556 = vmatpush.msrb.mxu3 %v1841_v53  ;;  %v2611_v26 = vld [vmem:[#allocation9 + $0xd8] sm:$0xff]  ;;  %v603_v53 = vld [vmem:[#allocation9 + $0xa0] sm:$0xff] }
  0x69   :  { %519 = vmatpush.msrb.mxu1 %v1821_v36  ;;  %484 = vmatpush.msrb.mxu0 %v1837_v0  ;;  %v607_v36 = vld [vmem:[#allocation9 + $0xc0] sm:$0xff] }
  0x6a   :  { %536 = vmatpush.msrb.mxu2 %v2370_v29  ;;  %557 = vmatpush.msrb.mxu3 %v1840_v56  ;;  %v2618_v29 = vld [vmem:[#allocation9 + $0xd0] sm:$0xff]  ;;  %v602_v56 = vld [vmem:[#allocation9 + $0x98] sm:$0xff] }
  0x6b   :  { %520 = vmatpush.msrb.mxu1 %v1820_v38  ;;  %485 = vmatpush.msrb.mxu0 %v1836_v1  ;;  %v2636_v38 = vld [vmem:[#allocation9 + $0x168] sm:$0xff] }
  0x6c   :  { %537 = vmatpush.msrb.mxu2 %v2389_v33  ;;  %558 = vmatpush.msrb.mxu3 %v1839_v59  ;;  %v608_v33 = vld [vmem:[#allocation9 + $0xc8] sm:$0xff] }
  0x6d   :  { %521 = vmatpush.msrb.mxu1 %v1819_v40  ;;  %486 = vmatpush.msrb.mxu0 %v1835_v2 }
  0x6e   :  { %538 = vmatpush.msrb.mxu2 %v2399_v35  ;;  %559 = vmatpush.msrb.mxu3 %v1838_v63  ;;  %v2630_v35 = vld [vmem:[#allocation9 + $0x170] sm:$0xff]  ;;  %v627_v63 = vld [vmem:[#allocation9 + $0x158] sm:$0xff] }
  0x6f   :  { %522 = vmatpush.msrb.mxu1 %v1818_v45  ;;  %487 = vmatpush.msrb.mxu0 %v1834_v3  ;;  %v2642_v45 = vld [vmem:[#allocation9 + $0x30] sm:$0xff] }
  0x70   :  { %539 = vmatpush.msrb.mxu2 %v2409_v37  ;;  %560 = vmatpush.msrb.mxu3 %v1837_v0  ;;  %v2632_v37 = vld [vmem:[#allocation9 + $0x40] sm:$0xff]  ;;  %v600_v0 = vld [vmem:[#allocation9 + $0x88] sm:$0xff] }
  0x71   :  { %523 = vmatpush.msrb.mxu1 %v1817_v48  ;;  %488 = vmatpush.msrb.mxu0 %v1833_v4 }
  0x72   :  { %540 = vmatpush.msrb.mxu2 %v2419_v39  ;;  %561 = vmatpush.msrb.mxu3 %v1836_v1  ;;  %v583_v1 = vld [vmem:[#allocation9 + $0x8] sm:$0xff] }
  0x73   :  { %524 = vmatpush.msrb.mxu1 %v1816_v51  ;;  %489 = vmatpush.msrb.mxu0 %v1832_v5  ;;  %v2648_v51 = vld [vmem:[#allocation9 + $0x28] sm:$0xff] }
  0x74   :  { %541 = vmatpush.msrb.mxu2 %v2437_v43  ;;  %562 = vmatpush.msrb.mxu3 %v1835_v2  ;;  %v626_v2 = vld [vmem:[#allocation9 + $0x150] sm:$0xff] }
  0x75   :  { %525 = vmatpush.msrb.mxu1 %v1815_v54  ;;  %490 = vmatpush.msrb.mxu0 %v1831_v6  ;;  %v2652_v54 = vld [vmem:[#allocation9 + $0x20] sm:$0xff] }
  0x76   :  { %542 = vmatpush.msrb.mxu2 %v2452_v46  ;;  %563 = vmatpush.msrb.mxu3 %v1834_v3  ;;  %v599_v3 = vld [vmem:[#allocation9 + $0x80] sm:$0xff] }
  0x77   :  { %526 = vmatpush.msrb.mxu1 %v1814_v57  ;;  %491 = vmatpush.msrb.mxu0 %v1830_v7  ;;  %v2658_v57 = vld [vmem:[#allocation9 + $0x18] sm:$0xff] }
  0x78   :  { %543 = vmatpush.msrb.mxu2 %v2468_v49  ;;  %564 = vmatpush.msrb.mxu3 %v1833_v4  ;;  %v2646_v49 = vld [vmem:[#allocation9 + $0x160] sm:$0xff] }
  0x79   :  { %527 = vmatpush.msrb.mxu1 %v1813_v60  ;;  %492 = vmatpush.msrb.mxu0 %v1829_v8  ;;  %v582_v4 = vld [vmem:[#allocation9] sm:$0xff] }
  0x7a   :  { %544 = vmatpush.msrb.mxu2 %v2484_v52  ;;  %565 = vmatpush.msrb.mxu3 %v1832_v5  ;;  %v625_v5 = vld [vmem:[#allocation9 + $0x148] sm:$0xff] }
  0x7b   :  { %635 = vmatpush.msra.mxu0 %v2578_v11  ;;  %655 = vmatpush.msra.mxu1 %v2580_v12 }
  0x7c   :  { %545 = vmatpush.msrb.mxu2 %v2502_v55  ;;  %566 = vmatpush.msrb.mxu3 %v1831_v6  ;;  %v624_v6 = vld [vmem:[#allocation9 + $0x140] sm:$0xff] }
  0x7d   :  { %636 = vmatpush.msra.mxu0 %v2582_v13  ;;  %656 = vmatpush.msra.mxu1 %v2591_v16 }
  0x7e   :  { %546 = vmatpush.msrb.mxu2 %v2514_v58  ;;  %567 = vmatpush.msrb.mxu3 %v1830_v7  ;;  %v623_v7 = vld [vmem:[#allocation9 + $0x138] sm:$0xff] }
  0x7f   :  { %637 = vmatpush.msra.mxu0 %v2593_v18  ;;  %657 = vmatpush.msra.mxu1 %v2595_v19 }
  0x80   :  { %547 = vmatpush.msrb.mxu2 %v2525_v61  ;;  %568 = vmatpush.msrb.mxu3 %v1829_v8  ;;  %v601_v61 = vld [vmem:[#allocation9 + $0x90] sm:$0xff] }
  0x81   :  { %638 = vmatpush.msra.mxu0 %v2604_v23  ;;  %658 = vmatpush.msra.mxu1 %v2606_v24  ;;  %v622_v8 = vld [vmem:[#allocation9 + $0x130] sm:$0xff] }
  0x83   :  { %639 = vmatpush.msra.mxu0 %v2611_v26  ;;  %659 = vmatpush.msra.mxu1 %v2613_v27 }
  0x85   :  { %640 = vmatpush.msra.mxu0 %v2618_v29  ;;  %660 = vmatpush.msra.mxu1 %v2620_v30 }
  0x87   :  { %641 = vmatpush.msra.mxu0 %v608_v33  ;;  %661 = vmatpush.msra.mxu1 %v2626_v34 }
  0x89   :  { %642 = vmatpush.msra.mxu0 %v607_v36  ;;  %662 = vmatpush.msra.mxu1 %v2632_v37 }
  0x8b   :  { %643 = vmatpush.msra.mxu0 %v606_v41  ;;  %663 = vmatpush.msra.mxu1 %v2638_v42 }
  0x8d   :  { %644 = vmatpush.msra.mxu0 %v605_v44  ;;  %664 = vmatpush.msra.mxu1 %v2642_v45 }
  0x8f   :  { %645 = vmatpush.msra.mxu0 %v604_v50  ;;  %665 = vmatpush.msra.mxu1 %v2648_v51 }
  0x91   :  { %646 = vmatpush.msra.mxu0 %v603_v53  ;;  %666 = vmatpush.msra.mxu1 %v2652_v54 }
  0x93   :  { %647 = vmatpush.msra.mxu0 %v602_v56  ;;  %667 = vmatpush.msra.mxu1 %v2658_v57 }
  0x95   :  { %648 = vmatpush.msra.mxu0 %v601_v61  ;;  %668 = vmatpush.msra.mxu1 %v2667_v62 }
  0x97   :  { %649 = vmatpush.msra.mxu0 %v600_v0  ;;  %669 = vmatpush.msra.mxu1 %v583_v1 }
  0x99   :  { %650 = vmatpush.msra.mxu0 %v599_v3  ;;  %670 = vmatpush.msra.mxu1 %v582_v4 }
  0xbf   :  { %v238_v9 = vpop.f32.mrf.mxu0  ;;  %v261_v10 = vpop.f32.mrf.mxu1 }
  0xc0   :  { %v262_v14 = vadd.f32 %v261_v10, %v238_v9  ;;  %v621_v9 = vld [vmem:[#allocation9 + $0x128] sm:$0xff]  ;;  %v620_v10 = vld [vmem:[#allocation9 + $0x120] sm:$0xff] }
  0xcb   :  { %v286_v17 = vpop.f32.mrf.mxu0  ;;  %v325_v22 = vpop.f32.mrf.mxu1 }
  0xcc   :  { %v289_v20 = vadd.f32 %v286_v17, %v262_v14  ;;  %v616_v14 = vld [vmem:[#allocation9 + $0x100] sm:$0xff]  ;;  %v1857_v17 = vld [vmem:[%s3260_s10] ss:$0 sm:$0xff] }
  0xce   :  { %v293_v25 = vadd.f32 %v2587_v15, %v289_v20  ;;  %v2693_v20 = vld [vmem:[#allocation12 + $0x78] sm:$0xff] }
  0xd0   :  { %vm294_vm1 = vcmp.ge.f32.partialorder %v293_v25, 0.0  ;;  %v298_v28 = vmul.f32 %v2600_v21, %v293_v25 }
  0xd2   :  { %v299_v31 = vsel %vm294_vm1, %v293_v25, %v298_v28  ;;  %v1858_v25 = vld [vmem:[%s3221_s18] ss:$0 sm:$0xff] }
  0xd3   :  { %300 = vst [vmem:[#allocation2 + $0x1] sm:$0xff] %v299_v31  ;;  %452 = vmatmul.f32.vlgmr.msra.gmra.mxu2 %v299_v31 }
  0xd4   :  { %677 = vmatpush.msra.mxu2 %v2624_v32 }
  0xd6   :  { %678 = vmatpush.msra.mxu2 %v2630_v35 }
  0xd7   :  { %v348_v39 = vpop.f32.mrf.mxu0  ;;  %v373_v40 = vpop.f32.mrf.mxu1 }
  0xd8   :  { %v349_v43 = vadd.f32 %v348_v39, %v325_v22  ;;  %679 = vmatpush.msra.mxu2 %v2636_v38  ;;  %v2737_v39 = vld [vmem:[#allocation12 + $0xc0] sm:$0xff] }
  0xda   :  { %v376_v46 = vadd.f32 %v373_v40, %v349_v43  ;;  %v434_v47 = vld [vmem:[#allocation2] sm:$0xff]  ;;  %680 = vmatpush.msra.mxu2 %v2646_v49  ;;  %v2739_v40 = vld [vmem:[#allocation12 + $0x40] sm:$0xff] }
  0xdb   :  { %v476_v48 = vld [vmem:[#allocation2 + $0x2] sm:$0xff]  ;;  %472 = vmatmul.f32.vlgmr.msra.gmra.mxu3 %v434_v47 }
  0xdc   :  { %493 = vmatmul.f32.vlgmr.msrb.gmra.mxu0 %v476_v48  ;;  %v377_v52 = vadd.f32 %v2587_v15, %v376_v46  ;;  %713 = vmatpush.msra.mxu3 %v2578_v11  ;;  %v619_v11 = vld [vmem:[#allocation9 + $0x118] sm:$0xff] }
  0xdd   :  { %681 = vmatpush.msra.mxu2 %v627_v63  ;;  %733 = vmatpush.msrb.mxu0 %v2580_v12  ;;  %v618_v12 = vld [vmem:[#allocation9 + $0x110] sm:$0xff]  ;;  %v2745_v46 = vld [vmem:[#allocation12 + $0x38] sm:$0xff] }
  0xde   :  { %vm378_vm2 = vcmp.ge.f32.partialorder %v377_v52, 0.0  ;;  %v379_v55 = vmul.f32 %v2600_v21, %v377_v52  ;;  %714 = vmatpush.msra.mxu3 %v2582_v13  ;;  %v617_v13 = vld [vmem:[#allocation9 + $0x108] sm:$0xff]  ;;  %v2695_v21 = vld [vmem:[#allocation12 + $0xf0] sm:$0xff]  ;;  %v2747_v47 = vld [vmem:[#allocation12 + $0x178] sm:$0xff] }
  0xdf   :  { %682 = vmatpush.msra.mxu2 %v626_v2  ;;  %734 = vmatpush.msrb.mxu0 %v2591_v16 }
  0xe0   :  { %v380_v58 = vsel %vm378_vm2, %v377_v52, %v379_v55  ;;  %715 = vmatpush.msra.mxu3 %v2593_v18  ;;  %v2749_v52 = vld [vmem:[#allocation12 + $0x30] sm:$0xff] }
  0xe1   :  { %381 = vst [vmem:[#allocation2 + $0xb] sm:$0xff] %v380_v58  ;;  %528 = vmatmul.f32.vlgmr.msrb.gmra.mxu1 %v380_v58  ;;  %683 = vmatpush.msra.mxu2 %v625_v5  ;;  %v2752_v55 = vld [vmem:[#allocation12 + $0x170] sm:$0xff]  ;;  %v805_v58 = vld [vmem:[#allocation12 + $0xa8] sm:$0xff] }
  0xe2   :  { %716 = vmatpush.msra.mxu3 %v2604_v23  ;;  %755 = vmatpush.msrb.mxu1 %v2624_v32  ;;  %v2699_v23 = vld [vmem:[#allocation12 + $0x70] sm:$0xff]  ;;  %v2716_v32 = vld [vmem:[#allocation12 + $0xd8] sm:$0xff] }
  0xe3   :  { %684 = vmatpush.msra.mxu2 %v624_v6  ;;  %735 = vmatpush.msrb.mxu0 %v2595_v19  ;;  %v2691_v19 = vld [vmem:[#allocation12 + $0xf8] sm:$0xff] }
  0xe4   :  { %717 = vmatpush.msra.mxu3 %v2611_v26  ;;  %756 = vmatpush.msrb.mxu1 %v2630_v35  ;;  %v2704_v26 = vld [vmem:[#allocation12 + $0xe8] sm:$0xff]  ;;  %v2722_v35 = vld [vmem:[#allocation12 + $0xd0] sm:$0xff] }
  0xe5   :  { %685 = vmatpush.msra.mxu2 %v623_v7  ;;  %736 = vmatpush.msrb.mxu0 %v2606_v24 }
  0xe6   :  { %718 = vmatpush.msra.mxu3 %v2618_v29  ;;  %757 = vmatpush.msrb.mxu1 %v2636_v38  ;;  %v2710_v29 = vld [vmem:[#allocation12 + $0xe0] sm:$0xff]  ;;  %v2733_v38 = vld [vmem:[#allocation12 + $0x48] sm:$0xff] }
  0xe7   :  { %686 = vmatpush.msra.mxu2 %v622_v8  ;;  %737 = vmatpush.msrb.mxu0 %v2613_v27  ;;  %v2706_v27 = vld [vmem:[#allocation12 + $0x68] sm:$0xff] }
  0xe8   :  { %v510_v59 = vld [vmem:[#allocation2 + $0xa] sm:$0xff]  ;;  %719 = vmatpush.msra.mxu3 %v608_v33  ;;  %758 = vmatpush.msrb.mxu1 %v2646_v49  ;;  %v2718_v33 = vld [vmem:[#allocation12 + $0x58] sm:$0xff] }
  0xe9   :  { %v552_v60 = vld [vmem:[#allocation2 + $0xc] sm:$0xff]  ;;  %548 = vmatmul.f32.vlgmr.msrb.gmra.mxu2 %v510_v59  ;;  %738 = vmatpush.msrb.mxu0 %v2620_v30 }
  0xea   :  { %569 = vmatmul.f32.vlgmr.msrb.gmra.mxu3 %v552_v60  ;;  %687 = vmatpush.msra.mxu2 %v621_v9  ;;  %v2712_v30 = vld [vmem:[#allocation12 + $0x60] sm:$0xff]  ;;  %v2758_v59 = vld [vmem:[#allocation12 + $0x168] sm:$0xff] }
  0xeb   :  { %720 = vmatpush.msra.mxu3 %v607_v36  ;;  %759 = vmatpush.msrb.mxu1 %v627_v63  ;;  %v2724_v36 = vld [vmem:[#allocation12 + $0x50] sm:$0xff]  ;;  %v2762_v60 = vld [vmem:[#allocation12 + $0x20] sm:$0xff] }
  0xec   :  { %688 = vmatpush.msra.mxu2 %v620_v10  ;;  %739 = vmatpush.msrb.mxu0 %v2626_v34  ;;  %v2765_v63 = vld [vmem:[#allocation12 + $0x160] sm:$0xff] }
  0xed   :  { %721 = vmatpush.msra.mxu3 %v606_v41  ;;  %760 = vmatpush.msrb.mxu1 %v626_v2  ;;  %v828_v2 = vld [vmem:[#allocation12 + $0x158] sm:$0xff] }
  0xee   :  { %689 = vmatpush.msra.mxu2 %v619_v11  ;;  %740 = vmatpush.msrb.mxu0 %v2632_v37  ;;  %v2731_v37 = vld [vmem:[#allocation12 + $0xc8] sm:$0xff] }
  0xef   :  { %722 = vmatpush.msra.mxu3 %v605_v44  ;;  %761 = vmatpush.msrb.mxu1 %v625_v5 }
  0xf0   :  { %690 = vmatpush.msra.mxu2 %v618_v12  ;;  %741 = vmatpush.msrb.mxu0 %v2638_v42 }
  0xf1   :  { %723 = vmatpush.msra.mxu3 %v604_v50  ;;  %762 = vmatpush.msrb.mxu1 %v624_v6  ;;  %v802_v6 = vld [vmem:[#allocation12 + $0x90] sm:$0xff] }
  0xf2   :  { %691 = vmatpush.msra.mxu2 %v617_v13  ;;  %742 = vmatpush.msrb.mxu0 %v2642_v45  ;;  %v807_v45 = vld [vmem:[#allocation12 + $0xb8] sm:$0xff] }
  0xf3   :  { %724 = vmatpush.msra.mxu3 %v603_v53  ;;  %763 = vmatpush.msrb.mxu1 %v623_v7  ;;  %v785_v7 = vld [vmem:[#allocation12 + $0x10] sm:$0xff] }
  0xf4   :  { %692 = vmatpush.msra.mxu2 %v616_v14  ;;  %743 = vmatpush.msrb.mxu0 %v2648_v51 }
  0xf5   :  { %725 = vmatpush.msra.mxu3 %v602_v56  ;;  %764 = vmatpush.msrb.mxu1 %v622_v8  ;;  %v2755_v56 = vld [vmem:[#allocation12 + $0x28] sm:$0xff]  ;;  %v827_v8 = vld [vmem:[#allocation12 + $0x150] sm:$0xff] }
  0xf6   :  { %744 = vmatpush.msrb.mxu0 %v2652_v54  ;;  %835 = vmatpush.msrb.mxu2 %v2691_v19  ;;  %v806_v54 = vld [vmem:[#allocation12 + $0xb0] sm:$0xff] }
  0xf7   :  { %726 = vmatpush.msra.mxu3 %v601_v61  ;;  %765 = vmatpush.msrb.mxu1 %v621_v9  ;;  %v801_v9 = vld [vmem:[#allocation12 + $0x88] sm:$0xff] }
  0xf8   :  { %745 = vmatpush.msrb.mxu0 %v2658_v57  ;;  %836 = vmatpush.msrb.mxu2 %v2695_v21 }
  0xf9   :  { %727 = vmatpush.msra.mxu3 %v600_v0  ;;  %766 = vmatpush.msrb.mxu1 %v620_v10  ;;  %v2769_v0 = vld [vmem:[#allocation12 + $0x18] sm:$0xff]  ;;  %v784_v10 = vld [vmem:[#allocation12 + $0x8] sm:$0xff] }
  0xfa   :  { %746 = vmatpush.msrb.mxu0 %v2667_v62  ;;  %837 = vmatpush.msrb.mxu2 %v2704_v26  ;;  %v804_v62 = vld [vmem:[#allocation12 + $0xa0] sm:$0xff] }
  0xfb   :  { %728 = vmatpush.msra.mxu3 %v599_v3  ;;  %767 = vmatpush.msrb.mxu1 %v619_v11  ;;  %v826_v11 = vld [vmem:[#allocation12 + $0x148] sm:$0xff] }
  0xfc   :  { %747 = vmatpush.msrb.mxu0 %v583_v1  ;;  %838 = vmatpush.msrb.mxu2 %v2710_v29  ;;  %v803_v1 = vld [vmem:[#allocation12 + $0x98] sm:$0xff] }
  0xfd   :  { %768 = vmatpush.msrb.mxu1 %v618_v12  ;;  %855 = vmatpush.msrb.mxu3 %v2693_v20  ;;  %v800_v12 = vld [vmem:[#allocation12 + $0x80] sm:$0xff] }
  0xfe   :  { %748 = vmatpush.msrb.mxu0 %v582_v4  ;;  %839 = vmatpush.msrb.mxu2 %v2716_v32 }
  0xff   :  { %769 = vmatpush.msrb.mxu1 %v617_v13  ;;  %856 = vmatpush.msrb.mxu3 %v2699_v23  ;;  %v783_v13 = vld [vmem:[#allocation12] sm:$0xff] }
 0x100   :  { %840 = vmatpush.msrb.mxu2 %v2722_v35 }
 0x101   :  { %770 = vmatpush.msrb.mxu1 %v616_v14  ;;  %857 = vmatpush.msrb.mxu3 %v2706_v27  ;;  %v825_v14 = vld [vmem:[#allocation12 + $0x140] sm:$0xff] }
 0x102   :  { %841 = vmatpush.msrb.mxu2 %v2731_v37 }
 0x103   :  { %858 = vmatpush.msrb.mxu3 %v2712_v30 }
 0x104   :  { %842 = vmatpush.msrb.mxu2 %v2737_v39 }
 0x105   :  { %859 = vmatpush.msrb.mxu3 %v2718_v33 }
 0x106   :  { %843 = vmatpush.msrb.mxu2 %v807_v45 }
 0x107   :  { %860 = vmatpush.msrb.mxu3 %v2724_v36 }
 0x108   :  { %844 = vmatpush.msrb.mxu2 %v806_v54 }
 0x109   :  { %861 = vmatpush.msrb.mxu3 %v2733_v38 }
 0x10a   :  { %845 = vmatpush.msrb.mxu2 %v805_v58 }
 0x10b   :  { %862 = vmatpush.msrb.mxu3 %v2739_v40 }
 0x10c   :  { %846 = vmatpush.msrb.mxu2 %v804_v62 }
 0x10d   :  { %863 = vmatpush.msrb.mxu3 %v2745_v46 }
 0x10e   :  { %847 = vmatpush.msrb.mxu2 %v803_v1 }
 0x10f   :  { %864 = vmatpush.msrb.mxu3 %v2749_v52 }
 0x110   :  { %848 = vmatpush.msrb.mxu2 %v802_v6 }
 0x111   :  { %865 = vmatpush.msrb.mxu3 %v2755_v56 }
 0x112   :  { %849 = vmatpush.msrb.mxu2 %v801_v9 }
 0x113   :  { %866 = vmatpush.msrb.mxu3 %v2762_v60 }
 0x114   :  { %850 = vmatpush.msrb.mxu2 %v800_v12 }
 0x115   :  { %867 = vmatpush.msrb.mxu3 %v2769_v0 }
 0x117   :  { %868 = vmatpush.msrb.mxu3 %v785_v7 }
 0x119   :  { %869 = vmatpush.msrb.mxu3 %v784_v10 }
 0x11b   :  { %870 = vmatpush.msrb.mxu3 %v783_v13 }
 0x156   :  { %v453_v15 = vpop.f32.mrf.mxu2 }
 0x159   :  { %v494_v22 = vpop.f32.mrf.mxu0 }
 0x15e   :  { %v473_v16 = vpop.f32.mrf.mxu3  ;;  %v529_v41 = vpop.f32.mrf.mxu1 }
 0x15f   :  { %v474_v18 = vadd.f32 %v473_v16, %v453_v15  ;;  %v824_v15 = vld [vmem:[#allocation12 + $0x138] sm:$0xff]  ;;  %v823_v16 = vld [vmem:[#allocation12 + $0x130] sm:$0xff] }
 0x161   :  { %v497_v24 = vadd.f32 %v494_v22, %v474_v18  ;;  %v821_v18 = vld [vmem:[#allocation12 + $0x120] sm:$0xff] }
 0x162   :  { %v817_v22 = vld [vmem:[#allocation12 + $0x100] sm:$0xff] }
 0x163   :  { %v501_v28 = vadd.f32 %v1857_v17, %v497_v24 }
 0x165   :  { %vm502_vm3 = vcmp.ge.f32.partialorder %v501_v28, 0.0  ;;  %v506_v31 = vmul.f32 %v1858_v25, %v501_v28 }
 0x167   :  { %v507_v34 = vsel %vm502_vm3, %v501_v28, %v506_v31  ;;  %v2803_v28 = vld [vmem:[#allocation14 + $0xf8] sm:$0xff] }
 0x168   :  { %508 = vst [vmem:[#allocation3 + $0x1] sm:$0xff] %v507_v34 }
 0x169   :  { %509 = vst [vmem:[%s3228_s25] sm:$0xff] %v507_v34  ;;  %v2816_v34 = vld [vmem:[#allocation14 + $0xe8] sm:$0xff] }
 0x16c   :  { %v549_v42 = vpop.f32.mrf.mxu2 }
 0x16d   :  { %v550_v43 = vadd.f32 %v549_v42, %v529_v41  ;;  %v570_v44 = vpop.f32.mrf.mxu3  ;;  %v2830_v41 = vld [vmem:[#allocation14 + $0x58] sm:$0xff] }
 0x16f   :  { %v573_v48 = vadd.f32 %v570_v44, %v550_v43  ;;  %v634_v49 = vld [vmem:[#allocation3 + $0x1] ss:$2 sm:$0xf]  ;;  %v632_v50 = vld [vmem:[#allocation3] ss:$2 sm:$0xf] }
 0x170   :  { %651 = vmatmul.f32.vlgmr.msra.gmra.mxu0 %v634_v49  ;;  %671 = vmatmul.f32.vlgmr.msra.gmra.mxu1 %v632_v50  ;;  %v676_v51 = vld [vmem:[#allocation3 + $0x2] ss:$2 sm:$0xf] }
 0x171   :  { %v574_v53 = vadd.f32 %v1857_v17, %v573_v48  ;;  %693 = vmatmul.f32.vlgmr.msra.gmra.mxu2 %v676_v51  ;;  %876 = vmatpush.msra.mxu0 %v2747_v47  ;;  %v822_v17 = vld [vmem:[#allocation12 + $0x128] sm:$0xff]  ;;  %v1008_v43 = vld [vmem:[#allocation14 + $0xd0] sm:$0xff]  ;;  %v2841_v48 = vld [vmem:[#allocation14 + $0x40] sm:$0xff] }
 0x172   :  { %911 = vmatpush.msra.mxu1 %v2691_v19  ;;  %931 = vmatpush.msra.mxu2 %v2693_v20  ;;  %v820_v19 = vld [vmem:[#allocation12 + $0x118] sm:$0xff]  ;;  %v819_v20 = vld [vmem:[#allocation12 + $0x110] sm:$0xff] }
 0x173   :  { %vm575_vm4 = vcmp.ge.f32.partialorder %v574_v53, 0.0  ;;  %v576_v57 = vmul.f32 %v1858_v25, %v574_v53  ;;  %877 = vmatpush.msra.mxu0 %v2752_v55  ;;  %v2834_v44 = vld [vmem:[#allocation14 + $0x50] sm:$0xff] }
 0x174   :  { %912 = vmatpush.msra.mxu1 %v2695_v21  ;;  %932 = vmatpush.msra.mxu2 %v2699_v23  ;;  %v818_v21 = vld [vmem:[#allocation12 + $0x108] sm:$0xff] }
 0x175   :  { %v577_v61 = vsel %vm575_vm4, %v574_v53, %v576_v57  ;;  %878 = vmatpush.msra.mxu0 %v2758_v59  ;;  %v2844_v53 = vld [vmem:[#allocation14 + $0x38] sm:$0xff] }
 0x176   :  { %578 = vst [vmem:[#allocation3 + $0xb] sm:$0xff] %v577_v61  ;;  %913 = vmatpush.msra.mxu1 %v2704_v26  ;;  %933 = vmatpush.msra.mxu2 %v2706_v27  ;;  %v1859_v26 = vld [vmem:[%s3261_s30] ss:$0 sm:$0xff] }
 0x177   :  { %579 = vst [vmem:[%s3228_s25 + $0x8] sm:$0xff] %v577_v61  ;;  %879 = vmatpush.msra.mxu0 %v2765_v63  ;;  %v1004_v61 = vld [vmem:[#allocation14 + $0xb0] sm:$0xff] }
 0x178   :  { %914 = vmatpush.msra.mxu1 %v2710_v29  ;;  %934 = vmatpush.msra.mxu2 %v2712_v30  ;;  %v2805_v29 = vld [vmem:[#allocation14 + $0x78] sm:$0xff]  ;;  %v2807_v30 = vld [vmem:[#allocation14 + $0xf0] sm:$0xff] }
 0x179   :  { %880 = vmatpush.msra.mxu0 %v828_v2 }
 0x17a   :  { %915 = vmatpush.msra.mxu1 %v2716_v32  ;;  %935 = vmatpush.msra.mxu2 %v2718_v33  ;;  %v1860_v32 = vld [vmem:[%s3222_s19] ss:$0 sm:$0xff]  ;;  %v2814_v33 = vld [vmem:[#allocation14 + $0x70] sm:$0xff]  ;;  %s2054_s19 = smov [#allocation20]  }
 0x17b   :  { %881 = vmatpush.msra.mxu0 %v827_v8  ;;  %s1769_s5 = sshll.u32 %s2054_s19, 4  ;;  %s1770_s5 = int_to_ptr.vmem [resolvable:$true] %s1769_s5 }
 0x17c   :  { %916 = vmatpush.msra.mxu1 %v2722_v35  ;;  %936 = vmatpush.msra.mxu2 %v2724_v36  ;;  %v2818_v35 = vld [vmem:[#allocation14 + $0x68] sm:$0xff] }
 0x17d   :  { %v712_v3 = vld [vmem:[#allocation3 + $0xb] ss:$2 sm:$0xf]  ;;  %v710_v4 = vld [vmem:[#allocation3 + $0xa] ss:$2 sm:$0xf]  ;;  %882 = vmatpush.msra.mxu0 %v826_v11 }
 0x17e   :  { %729 = vmatmul.f32.vlgmr.msra.gmra.mxu3 %v712_v3  ;;  %749 = vmatmul.f32.vlgmr.msrb.gmra.mxu0 %v710_v4  ;;  %v754_v5 = vld [vmem:[#allocation3 + $0xc] ss:$2 sm:$0xf] }
 0x17f   :  { %771 = vmatmul.f32.vlgmr.msrb.gmra.mxu1 %v754_v5  ;;  %883 = vmatpush.msra.mxu0 %v825_v14  ;;  %v2862_v4 = vld [vmem:[#allocation14 + $0x20] sm:$0xff] }
 0x180   :  { %917 = vmatpush.msra.mxu1 %v2731_v37  ;;  %952 = vmatpush.msra.mxu3 %v2747_v47  ;;  %v2822_v37 = vld [vmem:[#allocation14 + $0xe0] sm:$0xff] }
 0x181   :  { %884 = vmatpush.msra.mxu0 %v824_v15  ;;  %937 = vmatpush.msra.mxu2 %v2733_v38  ;;  %v2824_v38 = vld [vmem:[#allocation14 + $0x60] sm:$0xff] }
 0x182   :  { %918 = vmatpush.msra.mxu1 %v2737_v39  ;;  %953 = vmatpush.msra.mxu3 %v2752_v55  ;;  %v1006_v47 = vld [vmem:[#allocation14 + $0xc0] sm:$0xff] }
 0x183   :  { %885 = vmatpush.msra.mxu0 %v823_v16  ;;  %938 = vmatpush.msra.mxu2 %v2739_v40  ;;  %v2828_v40 = vld [vmem:[#allocation14 + $0xd8] sm:$0xff]  ;;  %v1002_v5 = vld [vmem:[#allocation14 + $0xa0] sm:$0xff] }
 0x184   :  { %919 = vmatpush.msra.mxu1 %v807_v45  ;;  %954 = vmatpush.msra.mxu3 %v2758_v59  ;;  %v1007_v45 = vld [vmem:[#allocation14 + $0xc8] sm:$0xff] }
 0x185   :  { %886 = vmatpush.msra.mxu0 %v822_v17  ;;  %939 = vmatpush.msra.mxu2 %v2745_v46  ;;  %v2838_v46 = vld [vmem:[#allocation14 + $0x48] sm:$0xff] }
 0x186   :  { %920 = vmatpush.msra.mxu1 %v806_v54  ;;  %955 = vmatpush.msra.mxu3 %v2765_v63  ;;  %v2846_v54 = vld [vmem:[#allocation14 + $0x178] sm:$0xff] }
 0x187   :  { %887 = vmatpush.msra.mxu0 %v821_v18  ;;  %940 = vmatpush.msra.mxu2 %v2749_v52  ;;  %v1005_v52 = vld [vmem:[#allocation14 + $0xb8] sm:$0xff] }
 0x188   :  { %921 = vmatpush.msra.mxu1 %v805_v58  ;;  %956 = vmatpush.msra.mxu3 %v828_v2  ;;  %v2858_v2 = vld [vmem:[#allocation14 + $0x168] sm:$0xff] }
 0x189   :  { %888 = vmatpush.msra.mxu0 %v820_v19  ;;  %941 = vmatpush.msra.mxu2 %v2755_v56 }
 0x18a   :  { %922 = vmatpush.msra.mxu1 %v804_v62  ;;  %957 = vmatpush.msra.mxu3 %v827_v8  ;;  %v2852_v62 = vld [vmem:[#allocation14 + $0x170] sm:$0xff] }
 0x18b   :  { %889 = vmatpush.msra.mxu0 %v819_v20  ;;  %942 = vmatpush.msra.mxu2 %v2762_v60  ;;  %v2849_v60 = vld [vmem:[#allocation14 + $0x30] sm:$0xff] }
 0x18c   :  { %923 = vmatpush.msra.mxu1 %v803_v1  ;;  %958 = vmatpush.msra.mxu3 %v826_v11  ;;  %v1003_v1 = vld [vmem:[#allocation14 + $0xa8] sm:$0xff]  ;;  %v1001_v11 = vld [vmem:[#allocation14 + $0x98] sm:$0xff] }
 0x18d   :  { %890 = vmatpush.msra.mxu0 %v818_v21  ;;  %943 = vmatpush.msra.mxu2 %v2769_v0  ;;  %v2855_v0 = vld [vmem:[#allocation14 + $0x28] sm:$0xff] }
 0x18e   :  { %924 = vmatpush.msra.mxu1 %v802_v6  ;;  %959 = vmatpush.msra.mxu3 %v825_v14  ;;  %v2865_v6 = vld [vmem:[#allocation14 + $0x160] sm:$0xff]  ;;  %v1000_v14 = vld [vmem:[#allocation14 + $0x90] sm:$0xff] }
 0x18f   :  { %891 = vmatpush.msra.mxu0 %v817_v22  ;;  %944 = vmatpush.msra.mxu2 %v785_v7 }
 0x190   :  { %925 = vmatpush.msra.mxu1 %v801_v9  ;;  %960 = vmatpush.msra.mxu3 %v824_v15  ;;  %v2877_v15 = vld [vmem:[#allocation14 + $0x10] sm:$0xff] }
 0x191   :  { %945 = vmatpush.msra.mxu2 %v784_v10  ;;  %1034 = vmatpush.msrb.mxu0 %v2803_v28 }
 0x192   :  { %926 = vmatpush.msra.mxu1 %v800_v12  ;;  %961 = vmatpush.msra.mxu3 %v823_v16  ;;  %v2874_v12 = vld [vmem:[#allocation14 + $0x18] sm:$0xff]  ;;  %v1025_v16 = vld [vmem:[#allocation14 + $0x150] sm:$0xff] }
 0x193   :  { %946 = vmatpush.msra.mxu2 %v783_v13  ;;  %1035 = vmatpush.msrb.mxu0 %v2807_v30  ;;  %v1026_v13 = vld [vmem:[#allocation14 + $0x158] sm:$0xff] }
 0x194   :  { %962 = vmatpush.msra.mxu3 %v822_v17  ;;  %1054 = vmatpush.msrb.mxu1 %v2805_v29  ;;  %v999_v17 = vld [vmem:[#allocation14 + $0x88] sm:$0xff] }
 0x195   :  { %1036 = vmatpush.msrb.mxu0 %v2816_v34 }
 0x196   :  { %963 = vmatpush.msra.mxu3 %v821_v18  ;;  %1055 = vmatpush.msrb.mxu1 %v2814_v33  ;;  %v982_v18 = vld [vmem:[#allocation14 + $0x8] sm:$0xff] }
 0x197   :  { %1037 = vmatpush.msrb.mxu0 %v2822_v37 }
 0x198   :  { %964 = vmatpush.msra.mxu3 %v820_v19  ;;  %1056 = vmatpush.msrb.mxu1 %v2818_v35  ;;  %v1024_v19 = vld [vmem:[#allocation14 + $0x148] sm:$0xff] }
 0x199   :  { %1038 = vmatpush.msrb.mxu0 %v2828_v40 }
 0x19a   :  { %965 = vmatpush.msra.mxu3 %v819_v20  ;;  %1057 = vmatpush.msrb.mxu1 %v2824_v38  ;;  %v998_v20 = vld [vmem:[#allocation14 + $0x80] sm:$0xff] }
 0x19b   :  { %1039 = vmatpush.msrb.mxu0 %v1008_v43 }
 0x19c   :  { %966 = vmatpush.msra.mxu3 %v818_v21  ;;  %1058 = vmatpush.msrb.mxu1 %v2830_v41  ;;  %v981_v21 = vld [vmem:[#allocation14] sm:$0xff] }
 0x19d   :  { %1040 = vmatpush.msrb.mxu0 %v1007_v45 }
 0x19e   :  { %967 = vmatpush.msra.mxu3 %v817_v22  ;;  %1059 = vmatpush.msrb.mxu1 %v2834_v44  ;;  %v1023_v22 = vld [vmem:[#allocation14 + $0x140] sm:$0xff] }
 0x19f   :  { %1041 = vmatpush.msrb.mxu0 %v1006_v47 }
 0x1a0   :  { %1060 = vmatpush.msrb.mxu1 %v2838_v46 }
 0x1a1   :  { %1042 = vmatpush.msrb.mxu0 %v1005_v52 }
 0x1a2   :  { %1061 = vmatpush.msrb.mxu1 %v2841_v48 }
 0x1a3   :  { %1043 = vmatpush.msrb.mxu0 %v1004_v61 }
 0x1a4   :  { %1062 = vmatpush.msrb.mxu1 %v2844_v53 }
 0x1a5   :  { %1044 = vmatpush.msrb.mxu0 %v1003_v1 }
 0x1a6   :  { %1063 = vmatpush.msrb.mxu1 %v2849_v60 }
 0x1a7   :  { %1045 = vmatpush.msrb.mxu0 %v1002_v5 }
 0x1a8   :  { %1064 = vmatpush.msrb.mxu1 %v2855_v0 }
 0x1a9   :  { %1046 = vmatpush.msrb.mxu0 %v1001_v11 }
 0x1aa   :  { %1065 = vmatpush.msrb.mxu1 %v2862_v4 }
 0x1ab   :  { %1047 = vmatpush.msrb.mxu0 %v1000_v14 }
 0x1ac   :  { %1066 = vmatpush.msrb.mxu1 %v2874_v12 }
 0x1ad   :  { %1048 = vmatpush.msrb.mxu0 %v999_v17 }
 0x1ae   :  { %1067 = vmatpush.msrb.mxu1 %v2877_v15 }
 0x1af   :  { %1049 = vmatpush.msrb.mxu0 %v998_v20 }
 0x1b0   :  { %1068 = vmatpush.msrb.mxu1 %v982_v18 }
 0x1b2   :  { %1069 = vmatpush.msrb.mxu1 %v981_v21 }
 0x1ed   :  { %v652_v23 = vpop.f32.mrf.mxu0  ;;  %v672_v24 = vpop.f32.mrf.mxu1 }
 0x1ee   :  { %v673_v25 = vadd.f32 %v672_v24, %v652_v23  ;;  %v1022_v23 = vld [vmem:[#allocation14 + $0x138] sm:$0xff]  ;;  %v1021_v24 = vld [vmem:[#allocation14 + $0x130] sm:$0xff] }
 0x1f4   :  { %v694_v27 = vpop.f32.mrf.mxu2 }
 0x1f5   :  { %v697_v31 = vadd.f32 %v694_v27, %v673_v25  ;;  %v1020_v25 = vld [vmem:[#allocation14 + $0x128] sm:$0xff]  ;;  %v1018_v27 = vld [vmem:[#allocation14 + $0x118] sm:$0xff] }
 0x1f7   :  { %v701_v36 = vadd.f32 %v1859_v26, %v697_v31 }
 0x1f9   :  { %vm702_vm5 = vcmp.ge.f32.partialorder %v701_v36, 0.0  ;;  %v706_v39 = vmul.f32 %v1860_v32, %v701_v36 }
 0x1fb   :  { %v707_v42 = vsel %vm702_vm5, %v701_v36, %v706_v39  ;;  %v750_v49 = vpop.f32.mrf.mxu0  ;;  %v2901_v36 = vld [vmem:[#allocation15 + $0xf8] sm:$0xff] }
 0x1fc   :  { %708 = vst [vmem:[#allocation4 + $0x1] sm:$0xf] %v707_v42  ;;  %v772_v55 = vpop.f32.mrf.mxu1  ;;  %v2916_v42 = vld [vmem:[#allocation15 + $0xe8] sm:$0xff] }
 0x201   :  { %v730_v50 = vpop.f32.mrf.mxu3 }
 0x202   :  { %v751_v51 = vadd.f32 %v750_v49, %v730_v50  ;;  %v2931_v49 = vld [vmem:[#allocation15 + $0x58] sm:$0xff] }
 0x203   :  { %v834_v56 = vld [vmem:[#allocation4 + $0x1] sm:$0xf] }
 0x204   :  { %v833_v57 = vld [vmem:[#allocation4] sm:$0xf]  ;;  %v775_v59 = vadd.f32 %v772_v55, %v751_v51  ;;  %851 = vmatmul.f32.vlgmr.msrb.gmra.mxu2 %v834_v56  ;;  %v1209_v51 = vld [vmem:[#allocation15 + $0xd0] sm:$0xff]  ;;  %v1207_v55 = vld [vmem:[#allocation15 + $0xc0] sm:$0xff] }
 0x205   :  { %v875_v58 = vld [vmem:[#allocation4 + $0x2] sm:$0xf]  ;;  %871 = vmatmul.f32.vlgmr.msrb.gmra.mxu3 %v833_v57  ;;  %1076 = vmatpush.msrb.mxu2 %v2846_v54  ;;  %v2947_v56 = vld [vmem:[#allocation15 + $0x40] sm:$0xff] }
 0x206   :  { %892 = vmatmul.f32.vlgmr.msra.gmra.mxu0 %v875_v58  ;;  %v776_v63 = vadd.f32 %v1859_v26, %v775_v59  ;;  %1112 = vmatpush.msrb.mxu3 %v2803_v28  ;;  %v1019_v26 = vld [vmem:[#allocation14 + $0x120] sm:$0xff]  ;;  %v1017_v28 = vld [vmem:[#allocation14 + $0x110] sm:$0xff] }
 0x207   :  { %1077 = vmatpush.msrb.mxu2 %v2852_v62  ;;  %1132 = vmatpush.msra.mxu0 %v2805_v29  ;;  %v1016_v29 = vld [vmem:[#allocation14 + $0x108] sm:$0xff] }
 0x208   :  { %vm777_vm6 = vcmp.ge.f32.partialorder %v776_v63, 0.0  ;;  %v778_v3 = vmul.f32 %v1860_v32, %v776_v63  ;;  %1113 = vmatpush.msrb.mxu3 %v2807_v30  ;;  %v1015_v30 = vld [vmem:[#allocation14 + $0x100] sm:$0xff] }
 0x209   :  { %1078 = vmatpush.msrb.mxu2 %v2858_v2  ;;  %1133 = vmatpush.msra.mxu0 %v2814_v33 }
 0x20a   :  { %v779_v7 = vsel %vm777_vm6, %v776_v63, %v778_v3  ;;  %1114 = vmatpush.msrb.mxu3 %v2816_v34  ;;  %v1861_v34 = vld [vmem:[%s3262_s1] ss:$0 sm:$0xff] }
 0x20b   :  { %780 = vst [vmem:[#allocation4 + $0x7] sm:$0xf] %v779_v7  ;;  %1079 = vmatpush.msrb.mxu2 %v2865_v6  ;;  %1134 = vmatpush.msra.mxu0 %v2818_v35 }
 0x20c   :  { %1115 = vmatpush.msrb.mxu3 %v2822_v37  ;;  %v2903_v37 = vld [vmem:[#allocation15 + $0x78] sm:$0xff] }
 0x20d   :  { %1080 = vmatpush.msrb.mxu2 %v1026_v13  ;;  %1135 = vmatpush.msra.mxu0 %v2824_v38  ;;  %v2905_v38 = vld [vmem:[#allocation15 + $0xf0] sm:$0xff] }
 0x20e   :  { %1116 = vmatpush.msrb.mxu3 %v2828_v40  ;;  %v2910_v40 = vld [vmem:[%s3223_s20] ss:$0 sm:$0xff] }
 0x20f   :  { %1081 = vmatpush.msrb.mxu2 %v1025_v16  ;;  %1136 = vmatpush.msra.mxu0 %v2830_v41  ;;  %v2914_v41 = vld [vmem:[#allocation15 + $0x70] sm:$0xff] }
 0x210   :  { %1117 = vmatpush.msrb.mxu3 %v1008_v43  ;;  %v2918_v43 = vld [vmem:[#allocation15 + $0x68] sm:$0xff] }
 0x211   :  { %1082 = vmatpush.msrb.mxu2 %v1024_v19  ;;  %1137 = vmatpush.msra.mxu0 %v2834_v44 }
 0x212   :  { %v910_v8 = vld [vmem:[#allocation4 + $0x7] sm:$0xf]  ;;  %1118 = vmatpush.msrb.mxu3 %v1007_v45  ;;  %v2922_v45 = vld [vmem:[#allocation15 + $0xe0] sm:$0xff] }
 0x213   :  { %v909_v9 = vld [vmem:[#allocation4 + $0x6] sm:$0xf]  ;;  %927 = vmatmul.f32.vlgmr.msra.gmra.mxu1 %v910_v8  ;;  %1083 = vmatpush.msrb.mxu2 %v1023_v22 }
 0x214   :  { %v951_v10 = vld [vmem:[#allocation4 + $0x8] sm:$0xf]  ;;  %947 = vmatmul.f32.vlgmr.msra.gmra.mxu2 %v909_v9  ;;  %1119 = vmatpush.msrb.mxu3 %v1006_v47  ;;  %v2962_v8 = vld [vmem:[#allocation15 + $0x168] sm:$0xff] }
 0x215   :  { %968 = vmatmul.f32.vlgmr.msra.gmra.mxu3 %v951_v10  ;;  %1154 = vmatpush.msra.mxu1 %v2846_v54  ;;  %v2944_v54 = vld [vmem:[#allocation15 + $0x48] sm:$0xff] }
 0x216   :  { %1120 = vmatpush.msrb.mxu3 %v1005_v52  ;;  %1084 = vmatpush.msrb.mxu2 %v1022_v23  ;;  %v2935_v52 = vld [vmem:[#allocation15 + $0x50] sm:$0xff]  ;;  %v1204_v9 = vld [vmem:[#allocation15 + $0xa8] sm:$0xff] }
 0x217   :  { %1155 = vmatpush.msra.mxu1 %v2852_v62  ;;  %1138 = vmatpush.msra.mxu0 %v2838_v46  ;;  %v2924_v46 = vld [vmem:[#allocation15 + $0x60] sm:$0xff]  ;;  %v2953_v62 = vld [vmem:[#allocation15 + $0x38] sm:$0xff]  ;;  %v2965_v10 = vld [vmem:[#allocation15 + $0x28] sm:$0xff] }
 0x218   :  { %1121 = vmatpush.msrb.mxu3 %v1004_v61  ;;  %1085 = vmatpush.msrb.mxu2 %v1021_v24  ;;  %v1206_v61 = vld [vmem:[#allocation15 + $0xb8] sm:$0xff] }
 0x219   :  { %1156 = vmatpush.msra.mxu1 %v2858_v2  ;;  %1139 = vmatpush.msra.mxu0 %v2841_v48  ;;  %v2929_v48 = vld [vmem:[#allocation15 + $0xd8] sm:$0xff] }
 0x21a   :  { %1122 = vmatpush.msrb.mxu3 %v1003_v1  ;;  %1086 = vmatpush.msrb.mxu2 %v1020_v25 }
 0x21b   :  { %1157 = vmatpush.msra.mxu1 %v2865_v6  ;;  %1140 = vmatpush.msra.mxu0 %v2844_v53  ;;  %v2942_v53 = vld [vmem:[#allocation15 + $0xc8] sm:$0xff]  ;;  %v2959_v6 = vld [vmem:[#allocation15 + $0x30] sm:$0xff] }
 0x21c   :  { %1123 = vmatpush.msrb.mxu3 %v1002_v5  ;;  %1087 = vmatpush.msrb.mxu2 %v1019_v26  ;;  %v1205_v5 = vld [vmem:[#allocation15 + $0xb0] sm:$0xff] }
 0x21d   :  { %1158 = vmatpush.msra.mxu1 %v1026_v13  ;;  %1141 = vmatpush.msra.mxu0 %v2849_v60  ;;  %v2951_v60 = vld [vmem:[#allocation15 + $0x178] sm:$0xff]  ;;  %v1203_v13 = vld [vmem:[#allocation15 + $0xa0] sm:$0xff] }
 0x21e   :  { %1124 = vmatpush.msrb.mxu3 %v1001_v11  ;;  %1088 = vmatpush.msrb.mxu2 %v1018_v27 }
 0x21f   :  { %1159 = vmatpush.msra.mxu1 %v1025_v16  ;;  %1142 = vmatpush.msra.mxu0 %v2855_v0  ;;  %v2977_v16 = vld [vmem:[#allocation15 + $0x158] sm:$0xff] }
 0x220   :  { %1125 = vmatpush.msrb.mxu3 %v1000_v14  ;;  %1089 = vmatpush.msrb.mxu2 %v1017_v28  ;;  %v2973_v14 = vld [vmem:[#allocation15 + $0x20] sm:$0xff] }
 0x221   :  { %1160 = vmatpush.msra.mxu1 %v1024_v19  ;;  %1143 = vmatpush.msra.mxu0 %v2862_v4  ;;  %v2956_v4 = vld [vmem:[#allocation15 + $0x170] sm:$0xff] }
 0x222   :  { %1126 = vmatpush.msrb.mxu3 %v999_v17  ;;  %1090 = vmatpush.msrb.mxu2 %v1016_v29 }
 0x223   :  { %1161 = vmatpush.msra.mxu1 %v1023_v22  ;;  %1144 = vmatpush.msra.mxu0 %v2874_v12  ;;  %v2970_v12 = vld [vmem:[#allocation15 + $0x160] sm:$0xff]  ;;  %v1226_v22 = vld [vmem:[#allocation15 + $0x150] sm:$0xff] }
 0x224   :  { %1127 = vmatpush.msrb.mxu3 %v998_v20  ;;  %1091 = vmatpush.msrb.mxu2 %v1015_v30  ;;  %v1202_v20 = vld [vmem:[#allocation15 + $0x98] sm:$0xff] }
 0x225   :  { %1162 = vmatpush.msra.mxu1 %v1022_v23  ;;  %1145 = vmatpush.msra.mxu0 %v2877_v15  ;;  %v1201_v23 = vld [vmem:[#allocation15 + $0x90] sm:$0xff] }
 0x226   :  { %1234 = vmatpush.msra.mxu2 %v2901_v36  ;;  %1254 = vmatpush.msra.mxu3 %v2903_v37 }
 0x227   :  { %1163 = vmatpush.msra.mxu1 %v1021_v24  ;;  %1146 = vmatpush.msra.mxu0 %v982_v18  ;;  %v2992_v24 = vld [vmem:[#allocation15 + $0x10] sm:$0xff] }
 0x228   :  { %1235 = vmatpush.msra.mxu2 %v2905_v38  ;;  %1255 = vmatpush.msra.mxu3 %v2914_v41 }
 0x229   :  { %1164 = vmatpush.msra.mxu1 %v1020_v25  ;;  %1147 = vmatpush.msra.mxu0 %v981_v21  ;;  %v2989_v21 = vld [vmem:[#allocation15 + $0x18] sm:$0xff]  ;;  %v1225_v25 = vld [vmem:[#allocation15 + $0x148] sm:$0xff] }
 0x22a   :  { %1236 = vmatpush.msra.mxu2 %v2916_v42  ;;  %1256 = vmatpush.msra.mxu3 %v2918_v43 }
 0x22b   :  { %1165 = vmatpush.msra.mxu1 %v1019_v26  ;;  %v1200_v26 = vld [vmem:[#allocation15 + $0x88] sm:$0xff] }
 0x22c   :  { %1237 = vmatpush.msra.mxu2 %v2922_v45  ;;  %1257 = vmatpush.msra.mxu3 %v2924_v46 }
 0x22d   :  { %1166 = vmatpush.msra.mxu1 %v1018_v27  ;;  %v1183_v27 = vld [vmem:[#allocation15 + $0x8] sm:$0xff] }
 0x22e   :  { %1238 = vmatpush.msra.mxu2 %v2929_v48  ;;  %1258 = vmatpush.msra.mxu3 %v2931_v49 }
 0x22f   :  { %1167 = vmatpush.msra.mxu1 %v1017_v28  ;;  %v1224_v28 = vld [vmem:[#allocation15 + $0x140] sm:$0xff] }
 0x230   :  { %1239 = vmatpush.msra.mxu2 %v1209_v51  ;;  %1259 = vmatpush.msra.mxu3 %v2935_v52 }
 0x231   :  { %1168 = vmatpush.msra.mxu1 %v1016_v29  ;;  %v1199_v29 = vld [vmem:[#allocation15 + $0x80] sm:$0xff] }
 0x232   :  { %1240 = vmatpush.msra.mxu2 %v2942_v53  ;;  %1260 = vmatpush.msra.mxu3 %v2944_v54 }
 0x233   :  { %1169 = vmatpush.msra.mxu1 %v1015_v30  ;;  %v1182_v30 = vld [vmem:[#allocation15] sm:$0xff] }
 0x234   :  { %1241 = vmatpush.msra.mxu2 %v1207_v55  ;;  %1261 = vmatpush.msra.mxu3 %v2947_v56 }
 0x236   :  { %1242 = vmatpush.msra.mxu2 %v1206_v61  ;;  %1262 = vmatpush.msra.mxu3 %v2953_v62 }
 0x238   :  { %1243 = vmatpush.msra.mxu2 %v1205_v5  ;;  %1263 = vmatpush.msra.mxu3 %v2959_v6 }
 0x23a   :  { %1244 = vmatpush.msra.mxu2 %v1204_v9  ;;  %1264 = vmatpush.msra.mxu3 %v2965_v10 }
 0x23c   :  { %1245 = vmatpush.msra.mxu2 %v1203_v13  ;;  %1265 = vmatpush.msra.mxu3 %v2973_v14 }
 0x23e   :  { %1246 = vmatpush.msra.mxu2 %v1202_v20  ;;  %1266 = vmatpush.msra.mxu3 %v2989_v21 }
 0x240   :  { %1247 = vmatpush.msra.mxu2 %v1201_v23  ;;  %1267 = vmatpush.msra.mxu3 %v2992_v24 }
 0x242   :  { %1248 = vmatpush.msra.mxu2 %v1200_v26  ;;  %1268 = vmatpush.msra.mxu3 %v1183_v27 }
 0x244   :  { %1249 = vmatpush.msra.mxu2 %v1199_v29  ;;  %1269 = vmatpush.msra.mxu3 %v1182_v30 }
 0x283   :  { %v893_v35 = vpop.f32.mrf.mxu0 }
 0x287   :  { %v852_v31 = vpop.f32.mrf.mxu2 }
 0x288   :  { %v872_v32 = vpop.f32.mrf.mxu3 }
 0x289   :  { %v873_v33 = vadd.f32 %v872_v32, %v852_v31  ;;  %v1223_v31 = vld [vmem:[#allocation15 + $0x138] sm:$0xff]  ;;  %v1222_v32 = vld [vmem:[#allocation15 + $0x130] sm:$0xff] }
 0x28b   :  { %v896_v39 = vadd.f32 %v893_v35, %v873_v33  ;;  %v1221_v33 = vld [vmem:[#allocation15 + $0x128] sm:$0xff]  ;;  %v1219_v35 = vld [vmem:[#allocation15 + $0x118] sm:$0xff] }
 0x28d   :  { %v900_v44 = vadd.f32 %v1861_v34, %v896_v39 }
 0x28f   :  { %vm901_vm7 = vcmp.ge.f32.partialorder %v900_v44, 0.0  ;;  %v905_v47 = vmul.f32 %v2910_v40, %v900_v44 }
 0x290   :  { %v928_v57 = vpop.f32.mrf.mxu1 }
 0x291   :  { %v906_v50 = vsel %vm901_vm7, %v900_v44, %v905_v47  ;;  %v3022_v47 = vld [vmem:[#allocation17 + $0x70] sm:$0xff] }
 0x292   :  { %907 = vst [vmem:[#allocation5 + $0x1] sm:$0xf] %v906_v50 }
 0x293   :  { %908 = vst [vmem:[%s3229_s26] sm:$0xf] %v906_v50 }
 0x297   :  { %v948_v58 = vpop.f32.mrf.mxu2 }
 0x298   :  { %v949_v59 = vadd.f32 %v948_v58, %v928_v57  ;;  %v969_v63 = vpop.f32.mrf.mxu3  ;;  %v3031_v57 = vld [vmem:[#allocation17 + $0x58] sm:$0xff] }
 0x299   :  { %v1033_v0 = vld [vmem:[#allocation5 + $0x1] ss:$2 sm:$0x3]  ;;  %v1031_v1 = vld [vmem:[#allocation5] ss:$2 sm:$0x3] }
 0x29a   :  { %v972_v2 = vadd.f32 %v969_v63, %v949_v59  ;;  %1050 = vmatmul.f32.vlgmr.msrb.gmra.mxu0 %v1033_v0  ;;  %1070 = vmatmul.f32.vlgmr.msrb.gmra.mxu1 %v1031_v1  ;;  %v1075_v3 = vld [vmem:[#allocation5 + $0x2] ss:$2 sm:$0x3]  ;;  %v3034_v59 = vld [vmem:[#allocation17 + $0x50] sm:$0xff]  ;;  %v3041_v1 = vld [vmem:[#allocation17 + $0x40] sm:$0xff] }
 0x29b   :  { %1092 = vmatmul.f32.vlgmr.msrb.gmra.mxu2 %v1075_v3  ;;  %1275 = vmatpush.msrb.mxu0 %v2951_v60  ;;  %v1408_v58 = vld [vmem:[#allocation17 + $0xd8] sm:$0xff]  ;;  %v1405_v3 = vld [vmem:[#allocation17 + $0xc0] sm:$0xff] }
 0x29c   :  { %v973_v7 = vadd.f32 %v1861_v34, %v972_v2  ;;  %1310 = vmatpush.msrb.mxu1 %v2901_v36  ;;  %1330 = vmatpush.msrb.mxu2 %v2903_v37  ;;  %v1220_v34 = vld [vmem:[#allocation15 + $0x120] sm:$0xff]  ;;  %v1218_v36 = vld [vmem:[#allocation15 + $0x110] sm:$0xff]  ;;  %v1217_v37 = vld [vmem:[#allocation15 + $0x108] sm:$0xff] }
 0x29d   :  { %1276 = vmatpush.msrb.mxu0 %v2956_v4  ;;  %v3043_v2 = vld [vmem:[#allocation17 + $0x178] sm:$0xff] }
 0x29e   :  { %vm974_vm8 = vcmp.ge.f32.partialorder %v973_v7, 0.0  ;;  %v975_v11 = vmul.f32 %v2910_v40, %v973_v7  ;;  %1311 = vmatpush.msrb.mxu1 %v2905_v38  ;;  %1331 = vmatpush.msrb.mxu2 %v2914_v41  ;;  %v1216_v38 = vld [vmem:[#allocation15 + $0x100] sm:$0xff] }
 0x29f   :  { %1277 = vmatpush.msrb.mxu0 %v2962_v8 }
 0x2a0   :  { %v976_v15 = vsel %vm974_vm8, %v973_v7, %v975_v11  ;;  %1312 = vmatpush.msrb.mxu1 %v2916_v42  ;;  %1332 = vmatpush.msrb.mxu2 %v2918_v43  ;;  %v1863_v42 = vld [vmem:[%s3216_s13] ss:$0 sm:$0xff]  ;;  %v3048_v11 = vld [vmem:[#allocation17 + $0x170] sm:$0xff] }
 0x2a1   :  { %977 = vst [vmem:[#allocation5 + $0x7] sm:$0xf] %v976_v15  ;;  %1278 = vmatpush.msrb.mxu0 %v2970_v12 }
 0x2a2   :  { %978 = vst [vmem:[%s3229_s26 + $0x4] sm:$0xf] %v976_v15  ;;  %1313 = vmatpush.msrb.mxu1 %v2922_v45  ;;  %1333 = vmatpush.msrb.mxu2 %v2924_v46  ;;  %v1864_v45 = vld [vmem:[%s3224_s21] ss:$0 sm:$0xff]  ;;  %v3057_v15 = vld [vmem:[#allocation17 + $0x28] sm:$0xff] }
 0x2a3   :  { %1279 = vmatpush.msrb.mxu0 %v2977_v16  ;;  %v3020_v46 = vld [vmem:[#allocation17 + $0x78] sm:$0xff] }
 0x2a4   :  { %1314 = vmatpush.msrb.mxu1 %v2929_v48  ;;  %1334 = vmatpush.msrb.mxu2 %v2931_v49  ;;  %v1412_v48 = vld [vmem:[#allocation17 + $0xf8] sm:$0xff]  ;;  %v1411_v49 = vld [vmem:[#allocation17 + $0xf0] sm:$0xff] }
 0x2a5   :  { %1280 = vmatpush.msrb.mxu0 %v1226_v22 }
 0x2a6   :  { %1315 = vmatpush.msrb.mxu1 %v1209_v51  ;;  %1335 = vmatpush.msrb.mxu2 %v2935_v52  ;;  %v3025_v51 = vld [vmem:[#allocation17 + $0x68] sm:$0xff] }
 0x2a7   :  { %1281 = vmatpush.msrb.mxu0 %v1225_v25  ;;  %v1410_v52 = vld [vmem:[#allocation17 + $0xe8] sm:$0xff] }
 0x2a8   :  { %v1111_v17 = vld [vmem:[#allocation5 + $0x7] ss:$2 sm:$0x3]  ;;  %v1109_v18 = vld [vmem:[#allocation5 + $0x6] ss:$2 sm:$0x3]  ;;  %1316 = vmatpush.msrb.mxu1 %v2942_v53  ;;  %1336 = vmatpush.msrb.mxu2 %v2944_v54 }
 0x2a9   :  { %1128 = vmatmul.f32.vlgmr.msrb.gmra.mxu3 %v1111_v17  ;;  %1148 = vmatmul.f32.vlgmr.msra.gmra.mxu0 %v1109_v18  ;;  %v1153_v19 = vld [vmem:[#allocation5 + $0x8] ss:$2 sm:$0x3] }
 0x2aa   :  { %1170 = vmatmul.f32.vlgmr.msra.gmra.mxu1 %v1153_v19  ;;  %1282 = vmatpush.msrb.mxu0 %v1224_v28  ;;  %v3028_v54 = vld [vmem:[#allocation17 + $0x60] sm:$0xff] }
 0x2ab   :  { %1317 = vmatpush.msrb.mxu1 %v1207_v55  ;;  %1351 = vmatpush.msrb.mxu3 %v2951_v60  ;;  %v1409_v55 = vld [vmem:[#allocation17 + $0xe0] sm:$0xff]  ;;  %v1407_v60 = vld [vmem:[#allocation17 + $0xd0] sm:$0xff] }
 0x2ac   :  { %1283 = vmatpush.msrb.mxu0 %v1223_v31  ;;  %1337 = vmatpush.msrb.mxu2 %v2947_v56  ;;  %v3060_v17 = vld [vmem:[#allocation17 + $0x160] sm:$0xff] }
 0x2ad   :  { %1318 = vmatpush.msrb.mxu1 %v1206_v61  ;;  %1352 = vmatpush.msrb.mxu3 %v2956_v4  ;;  %v3037_v61 = vld [vmem:[#allocation17 + $0x48] sm:$0xff] }
 0x2ae   :  { %1284 = vmatpush.msrb.mxu0 %v1222_v32  ;;  %1338 = vmatpush.msrb.mxu2 %v2953_v62  ;;  %v1406_v62 = vld [vmem:[#allocation17 + $0xc8] sm:$0xff] }
 0x2af   :  { %1319 = vmatpush.msrb.mxu1 %v1205_v5  ;;  %1353 = vmatpush.msrb.mxu3 %v2962_v8 }
 0x2b0   :  { %1285 = vmatpush.msrb.mxu0 %v1221_v33  ;;  %1339 = vmatpush.msrb.mxu2 %v2959_v6 }
 0x2b1   :  { %1320 = vmatpush.msrb.mxu1 %v1204_v9  ;;  %1354 = vmatpush.msrb.mxu3 %v2970_v12  ;;  %v3045_v9 = vld [vmem:[#allocation17 + $0x38] sm:$0xff]  ;;  %v3051_v12 = vld [vmem:[#allocation17 + $0x30] sm:$0xff] }
 0x2b2   :  { %1286 = vmatpush.msrb.mxu0 %v1220_v34  ;;  %1340 = vmatpush.msrb.mxu2 %v2965_v10 }
 0x2b3   :  { %1321 = vmatpush.msrb.mxu1 %v1203_v13  ;;  %1355 = vmatpush.msrb.mxu3 %v2977_v16 }
 0x2b4   :  { %1287 = vmatpush.msrb.mxu0 %v1219_v35  ;;  %1341 = vmatpush.msrb.mxu2 %v2973_v14  ;;  %v3054_v14 = vld [vmem:[#allocation17 + $0x168] sm:$0xff] }
 0x2b5   :  { %1322 = vmatpush.msrb.mxu1 %v1202_v20  ;;  %1356 = vmatpush.msrb.mxu3 %v1226_v22  ;;  %v1404_v22 = vld [vmem:[#allocation17 + $0xb8] sm:$0xff] }
 0x2b6   :  { %1288 = vmatpush.msrb.mxu0 %v1218_v36  ;;  %1342 = vmatpush.msrb.mxu2 %v2989_v21 }
 0x2b7   :  { %1323 = vmatpush.msrb.mxu1 %v1201_v23  ;;  %1357 = vmatpush.msrb.mxu3 %v1225_v25  ;;  %v3065_v23 = vld [vmem:[#allocation17 + $0x20] sm:$0xff]  ;;  %v1403_v25 = vld [vmem:[#allocation17 + $0xb0] sm:$0xff] }
 0x2b8   :  { %1289 = vmatpush.msrb.mxu0 %v1217_v37  ;;  %1343 = vmatpush.msrb.mxu2 %v2992_v24  ;;  %v1425_v24 = vld [vmem:[#allocation17 + $0x158] sm:$0xff] }
 0x2b9   :  { %1324 = vmatpush.msrb.mxu1 %v1200_v26  ;;  %1358 = vmatpush.msrb.mxu3 %v1224_v28  ;;  %v3068_v26 = vld [vmem:[#allocation17 + $0x18] sm:$0xff]  ;;  %v1402_v28 = vld [vmem:[#allocation17 + $0xa8] sm:$0xff] }
 0x2ba   :  { %1290 = vmatpush.msrb.mxu0 %v1216_v38  ;;  %1344 = vmatpush.msrb.mxu2 %v1183_v27  ;;  %v1424_v27 = vld [vmem:[#allocation17 + $0x150] sm:$0xff] }
 0x2bb   :  { %1325 = vmatpush.msrb.mxu1 %v1199_v29  ;;  %1359 = vmatpush.msrb.mxu3 %v1223_v31  ;;  %v3070_v29 = vld [vmem:[#allocation17 + $0x10] sm:$0xff]  ;;  %v1401_v31 = vld [vmem:[#allocation17 + $0xa0] sm:$0xff] }
 0x2bc   :  { %1345 = vmatpush.msrb.mxu2 %v1182_v30  ;;  %1432 = vmatpush.msra.mxu0 %v1412_v48  ;;  %v1423_v30 = vld [vmem:[#allocation17 + $0x148] sm:$0xff] }
 0x2bd   :  { %1360 = vmatpush.msrb.mxu3 %v1222_v32  ;;  %1452 = vmatpush.msra.mxu1 %v3020_v46  ;;  %v3074_v32 = vld [vmem:[#allocation17 + $0x8] sm:$0xff] }
 0x2be   :  { %1433 = vmatpush.msra.mxu0 %v1411_v49 }
 0x2bf   :  { %1361 = vmatpush.msrb.mxu3 %v1221_v33  ;;  %1453 = vmatpush.msra.mxu1 %v3022_v47  ;;  %v1422_v33 = vld [vmem:[#allocation17 + $0x140] sm:$0xff] }
 0x2c0   :  { %1434 = vmatpush.msra.mxu0 %v1410_v52 }
 0x2c1   :  { %1362 = vmatpush.msrb.mxu3 %v1220_v34  ;;  %1454 = vmatpush.msra.mxu1 %v3025_v51  ;;  %v1400_v34 = vld [vmem:[#allocation17 + $0x98] sm:$0xff] }
 0x2c2   :  { %1435 = vmatpush.msra.mxu0 %v1409_v55 }
 0x2c3   :  { %1363 = vmatpush.msrb.mxu3 %v1219_v35  ;;  %1455 = vmatpush.msra.mxu1 %v3028_v54  ;;  %v3077_v35 = vld [vmem:[#allocation17] sm:$0xff] }
 0x2c4   :  { %1436 = vmatpush.msra.mxu0 %v1408_v58 }
 0x2c5   :  { %1364 = vmatpush.msrb.mxu3 %v1218_v36  ;;  %1456 = vmatpush.msra.mxu1 %v3031_v57  ;;  %v1421_v36 = vld [vmem:[#allocation17 + $0x138] sm:$0xff] }
 0x2c6   :  { %1437 = vmatpush.msra.mxu0 %v1407_v60 }
 0x2c7   :  { %1365 = vmatpush.msrb.mxu3 %v1217_v37  ;;  %1457 = vmatpush.msra.mxu1 %v3034_v59  ;;  %v1399_v37 = vld [vmem:[#allocation17 + $0x90] sm:$0xff] }
 0x2c8   :  { %1438 = vmatpush.msra.mxu0 %v1406_v62 }
 0x2c9   :  { %1366 = vmatpush.msrb.mxu3 %v1216_v38  ;;  %1458 = vmatpush.msra.mxu1 %v3037_v61  ;;  %v1420_v38 = vld [vmem:[#allocation17 + $0x130] sm:$0xff] }
 0x2ca   :  { %1439 = vmatpush.msra.mxu0 %v1405_v3 }
 0x2cb   :  { %1459 = vmatpush.msra.mxu1 %v3041_v1 }
 0x2cc   :  { %1440 = vmatpush.msra.mxu0 %v1404_v22 }
 0x2cd   :  { %1460 = vmatpush.msra.mxu1 %v3045_v9 }
 0x2ce   :  { %1441 = vmatpush.msra.mxu0 %v1403_v25 }
 0x2cf   :  { %1461 = vmatpush.msra.mxu1 %v3051_v12 }
 0x2d0   :  { %1442 = vmatpush.msra.mxu0 %v1402_v28 }
 0x2d1   :  { %1462 = vmatpush.msra.mxu1 %v3057_v15 }
 0x2d2   :  { %1443 = vmatpush.msra.mxu0 %v1401_v31 }
 0x2d3   :  { %1463 = vmatpush.msra.mxu1 %v3065_v23 }
 0x2d4   :  { %1444 = vmatpush.msra.mxu0 %v1400_v34 }
 0x2d5   :  { %1464 = vmatpush.msra.mxu1 %v3068_v26 }
 0x2d6   :  { %1445 = vmatpush.msra.mxu0 %v1399_v37 }
 0x2d7   :  { %1465 = vmatpush.msra.mxu1 %v3070_v29 }
 0x2d9   :  { %1466 = vmatpush.msra.mxu1 %v3074_v32 }
 0x2db   :  { %1467 = vmatpush.msra.mxu1 %v3077_v35 }
 0x317   :  { %v1051_v39 = vpop.f32.mrf.mxu0  ;;  %v1071_v40 = vpop.f32.mrf.mxu1 }
 0x318   :  { %v1072_v41 = vadd.f32 %v1071_v40, %v1051_v39  ;;  %v1398_v39 = vld [vmem:[#allocation17 + $0x88] sm:$0xff] }
 0x319   :  { %v1419_v40 = vld [vmem:[#allocation17 + $0x128] sm:$0xff]  ;;  %1446 = vmatpush.msra.mxu0 %v1398_v39 }
 0x31e   :  { %v1093_v43 = vpop.f32.mrf.mxu2 }
 0x31f   :  { %v1096_v44 = vadd.f32 %v1093_v43, %v1072_v41  ;;  %v1397_v41 = vld [vmem:[#allocation17 + $0x80] sm:$0xff]  ;;  %v1417_v43 = vld [vmem:[#allocation17 + $0x118] sm:$0xff] }
 0x320   :  { %1447 = vmatpush.msra.mxu0 %v1397_v41 }
 0x321   :  { %v1100_v50 = vadd.f32 %v1863_v42, %v1096_v44  ;;  %v1416_v44 = vld [vmem:[#allocation17 + $0x110] sm:$0xff] }
 0x323   :  { %vm1101_vm9 = vcmp.ge.f32.partialorder %v1100_v50, 0.0  ;;  %v1105_v53 = vmul.f32 %v1864_v45, %v1100_v50 }
 0x325   :  { %v1106_v56 = vsel %vm1101_vm9, %v1100_v50, %v1105_v53  ;;  %v1602_v53 = vld [vmem:[#allocation18 + $0xf8] sm:$0xff] }
 0x326   :  { %1107 = vst [vmem:[#allocation6 + $0x1] sm:$0x3] %v1106_v56  ;;  %v1149_v63 = vpop.f32.mrf.mxu0  ;;  %v3104_v56 = vld [vmem:[%s3225_s22] ss:$0 sm:$0xff] }
 0x327   :  { %v1171_v8 = vpop.f32.mrf.mxu1 }
 0x32c   :  { %v1129_v0 = vpop.f32.mrf.mxu3 }
 0x32d   :  { %v1150_v4 = vadd.f32 %v1149_v63, %v1129_v0  ;;  %v1233_v5 = vld [vmem:[#allocation6 + $0x1] sm:$0x3]  ;;  %v1598_v0 = vld [vmem:[#allocation18 + $0xd8] sm:$0xff] }
 0x32e   :  { %v1232_v6 = vld [vmem:[#allocation6] sm:$0x3]  ;;  %v1274_v7 = vld [vmem:[#allocation6 + $0x2] sm:$0x3]  ;;  %1250 = vmatmul.f32.vlgmr.msra.gmra.mxu2 %v1233_v5 }
 0x32f   :  { %1270 = vmatmul.f32.vlgmr.msra.gmra.mxu3 %v1232_v6  ;;  %v1174_v10 = vadd.f32 %v1171_v8, %v1150_v4  ;;  %1291 = vmatmul.f32.vlgmr.msrb.gmra.mxu0 %v1274_v7  ;;  %v3123_v4 = vld [vmem:[#allocation18 + $0x58] sm:$0xff]  ;;  %v1596_v5 = vld [vmem:[#allocation18 + $0xc8] sm:$0xff]  ;;  %v3129_v6 = vld [vmem:[#allocation18 + $0x50] sm:$0xff] }
 0x330   :  { %1473 = vmatpush.msra.mxu2 %v3043_v2  ;;  %1501 = vmatpush.msra.mxu3 %v1412_v48  ;;  %v1414_v48 = vld [vmem:[#allocation17 + $0x100] sm:$0xff]  ;;  %v3132_v8 = vld [vmem:[#allocation18 + $0x48] sm:$0xff] }
 0x331   :  { %v1175_v13 = vadd.f32 %v1863_v42, %v1174_v10  ;;  %v1418_v42 = vld [vmem:[#allocation17 + $0x120] sm:$0xff]  ;;  %1521 = vmatpush.msrb.mxu0 %v3020_v46  ;;  %v1430_v46 = vld [vmem:[#allocation7] sm:$0x1] }
 0x332   :  { %1474 = vmatpush.msra.mxu2 %v3048_v11  ;;  %1502 = vmatpush.msra.mxu3 %v1411_v49  ;;  %v1595_v7 = vld [vmem:[#allocation18 + $0xc0] sm:$0xff] }
 0x333   :  { %vm1176_vm10 = vcmp.ge.f32.partialorder %v1175_v13, 0.0  ;;  %v1177_v16 = vmul.f32 %v1864_v45, %v1175_v13  ;;  %1522 = vmatpush.msrb.mxu0 %v3022_v47  ;;  %v1415_v45 = vld [vmem:[#allocation17 + $0x108] sm:$0xff] }
 0x334   :  { %1475 = vmatpush.msra.mxu2 %v3054_v14  ;;  %1503 = vmatpush.msra.mxu3 %v1410_v52 }
 0x335   :  { %v1178_v18 = vsel %vm1176_vm10, %v1175_v13, %v1177_v16  ;;  %1523 = vmatpush.msrb.mxu0 %v3025_v51  ;;  %v3098_v51 = vld [vmem:[%s3217_s14] ss:$0 sm:$0xff] }
 0x336   :  { %1179 = vst [vmem:[#allocation6 + $0x5] sm:$0x3] %v1178_v18  ;;  %1476 = vmatpush.msra.mxu2 %v3060_v17  ;;  %1504 = vmatpush.msra.mxu3 %v1409_v55  ;;  %v3138_v16 = vld [vmem:[#allocation18 + $0x178] sm:$0xff]  ;;  %v1593_v18 = vld [vmem:[#allocation18 + $0xb0] sm:$0xff] }
 0x337   :  { %1524 = vmatpush.msrb.mxu0 %v3028_v54  ;;  %v1601_v54 = vld [vmem:[#allocation18 + $0xf0] sm:$0xff] }
 0x338   :  { %1505 = vmatpush.msra.mxu3 %v1408_v58  ;;  %1477 = vmatpush.msra.mxu2 %v1425_v24  ;;  %v1600_v58 = vld [vmem:[#allocation18 + $0xe8] sm:$0xff] }
 0x339   :  { %1525 = vmatpush.msrb.mxu0 %v3031_v57  ;;  %v3106_v57 = vld [vmem:[#allocation18 + $0x78] sm:$0xff] }
 0x33a   :  { %1506 = vmatpush.msra.mxu3 %v1407_v60  ;;  %1478 = vmatpush.msra.mxu2 %v1424_v27 }
 0x33b   :  { %1526 = vmatpush.msrb.mxu0 %v3034_v59  ;;  %v3109_v59 = vld [vmem:[#allocation18 + $0x70] sm:$0xff] }
 0x33c   :  { %1507 = vmatpush.msra.mxu3 %v1406_v62  ;;  %1479 = vmatpush.msra.mxu2 %v1423_v30  ;;  %v3114_v62 = vld [vmem:[#allocation18 + $0x68] sm:$0xff] }
 0x33d   :  { %v1309_v19 = vld [vmem:[#allocation6 + $0x5] sm:$0x3]  ;;  %1527 = vmatpush.msrb.mxu0 %v3037_v61  ;;  %v1599_v61 = vld [vmem:[#allocation18 + $0xe0] sm:$0xff] }
 0x33e   :  { %v1308_v20 = vld [vmem:[#allocation6 + $0x4] sm:$0x3]  ;;  %v1350_v21 = vld [vmem:[#allocation6 + $0x6] sm:$0x3]  ;;  %1326 = vmatmul.f32.vlgmr.msrb.gmra.mxu1 %v1309_v19  ;;  %1508 = vmatpush.msra.mxu3 %v1405_v3  ;;  %v1597_v3 = vld [vmem:[#allocation18 + $0xd0] sm:$0xff] }
 0x33f   :  { %1346 = vmatmul.f32.vlgmr.msrb.gmra.mxu2 %v1308_v20  ;;  %1367 = vmatmul.f32.vlgmr.msrb.gmra.mxu3 %v1350_v21  ;;  %v3140_v19 = vld [vmem:[#allocation18 + $0x38] sm:$0xff]  ;;  %v1592_v21 = vld [vmem:[#allocation18 + $0xa8] sm:$0xff] }
 0x340   :  { %1509 = vmatpush.msra.mxu3 %v1404_v22  ;;  %1480 = vmatpush.msra.mxu2 %v1422_v33  ;;  %v3143_v22 = vld [vmem:[#allocation18 + $0x30] sm:$0xff] }
 0x341   :  { %1542 = vmatpush.msrb.mxu1 %v3043_v2  ;;  %1528 = vmatpush.msrb.mxu0 %v3041_v1  ;;  %v3119_v1 = vld [vmem:[#allocation18 + $0x60] sm:$0xff] }
 0x342   :  { %1510 = vmatpush.msra.mxu3 %v1403_v25  ;;  %1481 = vmatpush.msra.mxu2 %v1421_v36  ;;  %v3148_v25 = vld [vmem:[#allocation18 + $0x28] sm:$0xff] }
 0x343   :  { %1543 = vmatpush.msrb.mxu1 %v3048_v11  ;;  %1529 = vmatpush.msrb.mxu0 %v3045_v9  ;;  %v1594_v11 = vld [vmem:[#allocation18 + $0xb8] sm:$0xff] }
 0x344   :  { %1511 = vmatpush.msra.mxu3 %v1402_v28  ;;  %1482 = vmatpush.msra.mxu2 %v1420_v38  ;;  %v1590_v28 = vld [vmem:[#allocation18 + $0x98] sm:$0xff] }
 0x345   :  { %1544 = vmatpush.msrb.mxu1 %v3054_v14  ;;  %1530 = vmatpush.msrb.mxu0 %v3051_v12  ;;  %v3135_v12 = vld [vmem:[#allocation18 + $0x40] sm:$0xff] }
 0x346   :  { %1512 = vmatpush.msra.mxu3 %v1401_v31  ;;  %1483 = vmatpush.msra.mxu2 %v1419_v40  ;;  %v1589_v31 = vld [vmem:[#allocation18 + $0x90] sm:$0xff] }
 0x347   :  { %1545 = vmatpush.msrb.mxu1 %v3060_v17  ;;  %1531 = vmatpush.msrb.mxu0 %v3057_v15 }
 0x348   :  { %1513 = vmatpush.msra.mxu3 %v1400_v34  ;;  %1484 = vmatpush.msra.mxu2 %v1418_v42 }
 0x349   :  { %1546 = vmatpush.msrb.mxu1 %v1425_v24  ;;  %1532 = vmatpush.msrb.mxu0 %v3065_v23  ;;  %v1591_v24 = vld [vmem:[#allocation18 + $0xa0] sm:$0xff] }
 0x34a   :  { %1514 = vmatpush.msra.mxu3 %v1399_v37  ;;  %1485 = vmatpush.msra.mxu2 %v1417_v43  ;;  %v1618_v37 = vld [vmem:[#allocation18 + $0x170] sm:$0xff] }
 0x34b   :  { %1547 = vmatpush.msrb.mxu1 %v1424_v27  ;;  %1533 = vmatpush.msrb.mxu0 %v3068_v26  ;;  %v1499_v27 = vld [vmem:[#allocation7 + $0x4] sm:$0x1] }
 0x34c   :  { %1515 = vmatpush.msra.mxu3 %v1398_v39  ;;  %1486 = vmatpush.msra.mxu2 %v1416_v44  ;;  %v3165_v39 = vld [vmem:[#allocation18 + $0x8] sm:$0xff] }
 0x34d   :  { %1548 = vmatpush.msrb.mxu1 %v1423_v30  ;;  %1534 = vmatpush.msrb.mxu0 %v3070_v29  ;;  %v3152_v29 = vld [vmem:[#allocation18 + $0x20] sm:$0xff] }
 0x34e   :  { %1516 = vmatpush.msra.mxu3 %v1397_v41  ;;  %1487 = vmatpush.msra.mxu2 %v1415_v45  ;;  %v3167_v41 = vld [vmem:[#allocation18] sm:$0xff] }
 0x34f   :  { %1468 = vmatmul.f32.vlgmr.msra.gmra.mxu1 %v1430_v46  ;;  %1535 = vmatpush.msrb.mxu0 %v3074_v32  ;;  %v3155_v32 = vld [vmem:[#allocation18 + $0x18] sm:$0xff] }
 0x350   :  { %1488 = vmatpush.msra.mxu2 %v1414_v48  ;;  %1549 = vmatpush.msrb.mxu1 %v1422_v33  ;;  %v1611_v46 = vld [vmem:[#allocation18 + $0x138] sm:$0xff] }
 0x351   :  { %1642 = vmatpush.msrb.mxu3 %v3106_v57  ;;  %1536 = vmatpush.msrb.mxu0 %v3077_v35  ;;  %v1588_v35 = vld [vmem:[#allocation18 + $0x88] sm:$0xff] }
 0x352   :  { %1550 = vmatpush.msrb.mxu1 %v1421_v36  ;;  %1622 = vmatpush.msrb.mxu2 %v1602_v53  ;;  %v3162_v36 = vld [vmem:[#allocation18 + $0x10] sm:$0xff] }
 0x353   :  { %1643 = vmatpush.msrb.mxu3 %v3109_v59 }
 0x354   :  { %1551 = vmatpush.msrb.mxu1 %v1420_v38  ;;  %1623 = vmatpush.msrb.mxu2 %v1601_v54  ;;  %v1587_v38 = vld [vmem:[#allocation18 + $0x80] sm:$0xff] }
 0x355   :  { %1644 = vmatpush.msrb.mxu3 %v3114_v62 }
 0x356   :  { %1552 = vmatpush.msrb.mxu1 %v1419_v40  ;;  %1624 = vmatpush.msrb.mxu2 %v1600_v58  ;;  %v1617_v40 = vld [vmem:[#allocation18 + $0x168] sm:$0xff] }
 0x357   :  { %1645 = vmatpush.msrb.mxu3 %v3119_v1 }
 0x358   :  { %1553 = vmatpush.msrb.mxu1 %v1418_v42  ;;  %1625 = vmatpush.msrb.mxu2 %v1599_v61  ;;  %v1616_v42 = vld [vmem:[#allocation18 + $0x160] sm:$0xff] }
 0x359   :  { %1646 = vmatpush.msrb.mxu3 %v3123_v4 }
 0x35a   :  { %1554 = vmatpush.msrb.mxu1 %v1417_v43  ;;  %1626 = vmatpush.msrb.mxu2 %v1598_v0  ;;  %v1615_v43 = vld [vmem:[#allocation18 + $0x158] sm:$0xff] }
 0x35b   :  { %1647 = vmatpush.msrb.mxu3 %v3129_v6 }
 0x35c   :  { %1555 = vmatpush.msrb.mxu1 %v1416_v44  ;;  %1627 = vmatpush.msrb.mxu2 %v1597_v3  ;;  %v1614_v44 = vld [vmem:[#allocation18 + $0x150] sm:$0xff] }
 0x35d   :  { %1648 = vmatpush.msrb.mxu3 %v3132_v8 }
 0x35e   :  { %1556 = vmatpush.msrb.mxu1 %v1415_v45  ;;  %1628 = vmatpush.msrb.mxu2 %v1596_v5  ;;  %v1613_v45 = vld [vmem:[#allocation18 + $0x148] sm:$0xff] }
 0x35f   :  { %1649 = vmatpush.msrb.mxu3 %v3135_v12 }
 0x360   :  { %1557 = vmatpush.msrb.mxu1 %v1414_v48  ;;  %1629 = vmatpush.msrb.mxu2 %v1595_v7  ;;  %v1612_v48 = vld [vmem:[#allocation18 + $0x140] sm:$0xff] }
 0x361   :  { %1650 = vmatpush.msrb.mxu3 %v3140_v19 }
 0x362   :  { %1691 = vmatpush.msra.mxu1 %v1602_v53  ;;  %1630 = vmatpush.msrb.mxu2 %v1594_v11  ;;  %v1606_v53 = vld [vmem:[#allocation18 + $0x110] sm:$0xff] }
 0x363   :  { %1651 = vmatpush.msrb.mxu3 %v3143_v22 }
 0x364   :  { %1692 = vmatpush.msra.mxu1 %v1601_v54  ;;  %1631 = vmatpush.msrb.mxu2 %v1593_v18  ;;  %v1605_v54 = vld [vmem:[#allocation18 + $0x108] sm:$0xff] }
 0x365   :  { %1652 = vmatpush.msrb.mxu3 %v3148_v25 }
 0x366   :  { %1693 = vmatpush.msra.mxu1 %v1600_v58  ;;  %1632 = vmatpush.msrb.mxu2 %v1592_v21 }
 0x367   :  { %1653 = vmatpush.msrb.mxu3 %v3152_v29 }
 0x368   :  { %1694 = vmatpush.msra.mxu1 %v1599_v61  ;;  %1633 = vmatpush.msrb.mxu2 %v1591_v24  ;;  %v1378_v61 = vld [vmem:[%s3218_s15] sm:$0x1] }
 0x369   :  { %1654 = vmatpush.msrb.mxu3 %v3155_v32 }
 0x36a   :  { %1695 = vmatpush.msra.mxu1 %v1598_v0  ;;  %1634 = vmatpush.msrb.mxu2 %v1590_v28  ;;  %v1379_v0 = vld [vmem:[%s3226_s23] sm:$0x1] }
 0x36b   :  { %1655 = vmatpush.msrb.mxu3 %v3162_v36 }
 0x36c   :  { %1696 = vmatpush.msra.mxu1 %v1597_v3  ;;  %1635 = vmatpush.msrb.mxu2 %v1589_v31 }
 0x36d   :  { %1656 = vmatpush.msrb.mxu3 %v3165_v39 }
 0x36e   :  { %1697 = vmatpush.msra.mxu1 %v1596_v5  ;;  %1636 = vmatpush.msrb.mxu2 %v1588_v35 }
 0x36f   :  { %1657 = vmatpush.msrb.mxu3 %v3167_v41 }
 0x370   :  { %1698 = vmatpush.msra.mxu1 %v1595_v7  ;;  %1637 = vmatpush.msrb.mxu2 %v1587_v38 }
 0x372   :  { %1699 = vmatpush.msra.mxu1 %v1594_v11  ;;  %v1689_v11 = vld [vmem:[#allocation8 + $0x3] sm:$0x1] }
 0x374   :  { %1700 = vmatpush.msra.mxu1 %v1593_v18 }
 0x376   :  { %1701 = vmatpush.msra.mxu1 %v1592_v21  ;;  %v1569_v21 = vld [vmem:[%s3263_s8] sm:$0x1] }
 0x378   :  { %1702 = vmatpush.msra.mxu1 %v1591_v24 }
 0x37a   :  { %1703 = vmatpush.msra.mxu1 %v1590_v28 }
 0x37c   :  { %1704 = vmatpush.msra.mxu1 %v1589_v31 }
 0x37e   :  { %1705 = vmatpush.msra.mxu1 %v1588_v35 }
 0x380   :  { %1706 = vmatpush.msra.mxu1 %v1587_v38 }
 0x3ac   :  { %v1292_v52 = vpop.f32.mrf.mxu0 }
 0x3b1   :  { %v1251_v47 = vpop.f32.mrf.mxu2 }
 0x3b2   :  { %v1271_v49 = vpop.f32.mrf.mxu3 }
 0x3b3   :  { %v1272_v50 = vadd.f32 %v1271_v49, %v1251_v47  ;;  %v1610_v47 = vld [vmem:[#allocation18 + $0x130] sm:$0xff]  ;;  %v1609_v49 = vld [vmem:[#allocation18 + $0x128] sm:$0xff] }
 0x3b5   :  { %v1295_v55 = vadd.f32 %v1292_v52, %v1272_v50  ;;  %v1608_v50 = vld [vmem:[#allocation18 + $0x120] sm:$0xff]  ;;  %v1607_v52 = vld [vmem:[#allocation18 + $0x118] sm:$0xff] }
 0x3b7   :  { %v1299_v60 = vadd.f32 %v3098_v51, %v1295_v55  ;;  %v1604_v55 = vld [vmem:[#allocation18 + $0x100] sm:$0xff] }
 0x3b9   :  { %vm1300_vm11 = vcmp.ge.f32.partialorder %v1299_v60, 0.0  ;;  %v1304_v63 = vmul.f32 %v3104_v56, %v1299_v60 }
 0x3bb   :  { %v1305_v2 = vsel %vm1300_vm11, %v1299_v60, %v1304_v63  ;;  %v1327_v9 = vpop.f32.mrf.mxu1  ;;  %v1731_v60 = vld [vmem:[#allocation8 + $0x5] sm:$0x1] }
 0x3bc   :  { %1306 = vst [vmem:[#allocation7 + $0x1] sm:$0x3] %v1305_v2 }
 0x3bd   :  { %1307 = vst [vmem:[%s3230_s27] sm:$0x3] %v1305_v2 }
 0x3c2   :  { %v1347_v10 = vpop.f32.mrf.mxu2  ;;  %v1368_v17 = vpop.f32.mrf.mxu3 }
 0x3c3   :  { %v1348_v13 = vadd.f32 %v1347_v10, %v1327_v9  ;;  %v1431_v14 = vld [vmem:[#allocation7 + $0x1] sm:$0x1]  ;;  %v1472_v15 = vld [vmem:[#allocation7 + $0x2] sm:$0x1] }
 0x3c4   :  { %1448 = vmatmul.f32.vlgmr.msra.gmra.mxu0 %v1431_v14  ;;  %1489 = vmatmul.f32.vlgmr.msra.gmra.mxu2 %v1472_v15 }
 0x3c5   :  { %v1371_v20 = vadd.f32 %v1368_v17, %v1348_v13  ;;  %1663 = vmatpush.msra.mxu0 %v3138_v16  ;;  %1711 = vmatpush.msra.mxu2 %v3106_v57 }
 0x3c7   :  { %v1372_v23 = vadd.f32 %v3098_v51, %v1371_v20  ;;  %1664 = vmatpush.msra.mxu0 %v1618_v37  ;;  %1712 = vmatpush.msra.mxu2 %v3109_v59  ;;  %v1620_v51 = vld [vmem:[#allocation8] sm:$0x1] }
 0x3c9   :  { %vm1373_vm12 = vcmp.ge.f32.partialorder %v1372_v23, 0.0  ;;  %v1374_v26 = vmul.f32 %v3104_v56, %v1372_v23  ;;  %1665 = vmatpush.msra.mxu0 %v1617_v40  ;;  %1713 = vmatpush.msra.mxu2 %v3114_v62  ;;  %v1662_v56 = vld [vmem:[#allocation8 + $0x2] sm:$0x1] }
 0x3cb   :  { %v1375_v30 = vsel %vm1373_vm12, %v1372_v23, %v1374_v26  ;;  %1666 = vmatpush.msra.mxu0 %v1616_v42  ;;  %1714 = vmatpush.msra.mxu2 %v3119_v1 }
 0x3cc   :  { %1376 = vst [vmem:[#allocation7 + $0x5] sm:$0x3] %v1375_v30  ;;  %1537 = vmatmul.f32.vlgmr.msrb.gmra.mxu0 %v1499_v27  ;;  %v1469_v58 = vpop.f32.mrf.mxu1 }
 0x3cd   :  { %1377 = vst [vmem:[%s3230_s27 + $0x2] sm:$0x3] %v1375_v30  ;;  %1667 = vmatpush.msra.mxu0 %v1615_v43  ;;  %1715 = vmatpush.msra.mxu2 %v3123_v4 }
 0x3cf   :  { %1668 = vmatpush.msra.mxu0 %v1614_v44  ;;  %1716 = vmatpush.msra.mxu2 %v3129_v6 }
 0x3d1   :  { %1669 = vmatpush.msra.mxu0 %v1613_v45  ;;  %1717 = vmatpush.msra.mxu2 %v3132_v8 }
 0x3d3   :  { %v1500_v33 = vld [vmem:[#allocation7 + $0x5] sm:$0x1]  ;;  %v1541_v34 = vld [vmem:[#allocation7 + $0x6] sm:$0x1]  ;;  %1670 = vmatpush.msra.mxu0 %v1612_v48  ;;  %1718 = vmatpush.msra.mxu2 %v3135_v12 }
 0x3d4   :  { %1517 = vmatmul.f32.vlgmr.msra.gmra.mxu3 %v1500_v33  ;;  %1558 = vmatmul.f32.vlgmr.msrb.gmra.mxu1 %v1541_v34 }
 0x3d5   :  { %1732 = vmatpush.msra.mxu3 %v3138_v16  ;;  %1671 = vmatpush.msra.mxu0 %v1611_v46 }
 0x3d6   :  { %1719 = vmatpush.msra.mxu2 %v3140_v19  ;;  %v1568_v19 = vld [vmem:[%s3219_s16] sm:$0x1] }
 0x3d7   :  { %1733 = vmatpush.msra.mxu3 %v1618_v37  ;;  %1672 = vmatpush.msra.mxu0 %v1610_v47 }
 0x3d8   :  { %1720 = vmatpush.msra.mxu2 %v3143_v22 }
 0x3d9   :  { %1734 = vmatpush.msra.mxu3 %v1617_v40  ;;  %1673 = vmatpush.msra.mxu0 %v1609_v49 }
 0x3da   :  { %1721 = vmatpush.msra.mxu2 %v3148_v25 }
 0x3db   :  { %1735 = vmatpush.msra.mxu3 %v1616_v42  ;;  %1674 = vmatpush.msra.mxu0 %v1608_v50 }
 0x3dc   :  { %1658 = vmatmul.f32.vlgmr.msrb.gmra.mxu3 %v1620_v51  ;;  %1722 = vmatpush.msra.mxu2 %v3152_v29 }
 0x3dd   :  { %1736 = vmatpush.msra.mxu3 %v1615_v43  ;;  %1675 = vmatpush.msra.mxu0 %v1607_v52 }
 0x3de   :  { %1723 = vmatpush.msra.mxu2 %v3155_v32 }
 0x3df   :  { %1737 = vmatpush.msra.mxu3 %v1614_v44  ;;  %1676 = vmatpush.msra.mxu0 %v1606_v53 }
 0x3e0   :  { %1724 = vmatpush.msra.mxu2 %v3162_v36 }
 0x3e1   :  { %1738 = vmatpush.msra.mxu3 %v1613_v45  ;;  %1677 = vmatpush.msra.mxu0 %v1605_v54 }
 0x3e2   :  { %1725 = vmatpush.msra.mxu2 %v3165_v39 }
 0x3e3   :  { %1739 = vmatpush.msra.mxu3 %v1612_v48  ;;  %1678 = vmatpush.msra.mxu0 %v1604_v55 }
 0x3e4   :  { %1679 = vmatmul.f32.vlgmr.msra.gmra.mxu0 %v1662_v56  ;;  %1726 = vmatpush.msra.mxu2 %v3167_v41 }
 0x3e5   :  { %1740 = vmatpush.msra.mxu3 %v1611_v46 }
 0x3e7   :  { %1741 = vmatpush.msra.mxu3 %v1610_v47 }
 0x3e9   :  { %1742 = vmatpush.msra.mxu3 %v1609_v49 }
 0x3eb   :  { %1743 = vmatpush.msra.mxu3 %v1608_v50 }
 0x3ed   :  { %1744 = vmatpush.msra.mxu3 %v1607_v52 }
 0x3ef   :  { %1745 = vmatpush.msra.mxu3 %v1606_v53 }
 0x3f1   :  { %1746 = vmatpush.msra.mxu3 %v1605_v54 }
 0x3f3   :  { %1747 = vmatpush.msra.mxu3 %v1604_v55 }
 0x3f4   :  { %1748 = vmatmul.f32.vlgmr.msra.gmra.mxu3 %v1731_v60 }
 0x441   :  { %v1449_v57 = vpop.f32.mrf.mxu0 }
 0x442   :  { %v1470_v59 = vadd.f32 %v1469_v58, %v1449_v57 }
 0x447   :  { %v1490_v62 = vpop.f32.mrf.mxu2 }
 0x448   :  { %v1493_v63 = vadd.f32 %v1490_v62, %v1470_v59 }
 0x449   :  { %v1538_v4 = vpop.f32.mrf.mxu0 }
 0x44a   :  { %v1494_v1 = vadd.f32 %v1493_v63, %v1378_v61 }
 0x44c   :  { %vm1495_vm13 = vcmp.ge.f32.partialorder %v1494_v1, 0.0  ;;  %v1496_v2 = vmul.f32 %v1494_v1, %v1379_v0 }
 0x44e   :  { %v1497_v3 = vsel %vm1495_vm13, %v1494_v1, %v1496_v2 }
 0x44f   :  { %1498 = vst [vmem:[#allocation8 + $0x1] sm:$0x1] %v1497_v3 }
 0x451   :  { %v1559_v8 = vpop.f32.mrf.mxu1 }
 0x456   :  { %v1621_v5 = vld [vmem:[#allocation8 + $0x1] sm:$0x1] }
 0x457   :  { %1638 = vmatmul.f32.vlgmr.msrb.gmra.mxu2 %v1621_v5  ;;  %v1518_v6 = vpop.f32.mrf.mxu3 }
 0x458   :  { %v1539_v7 = vadd.f32 %v1538_v4, %v1518_v6 }
 0x45a   :  { %v1562_v9 = vadd.f32 %v1559_v8, %v1539_v7 }
 0x45c   :  { %v1563_v10 = vadd.f32 %v1562_v9, %v1378_v61 }
 0x45e   :  { %vm1564_vm14 = vcmp.ge.f32.partialorder %v1563_v10, 0.0  ;;  %v1565_v12 = vmul.f32 %v1563_v10, %v1379_v0 }
 0x45f   :  { %1727 = vmatmul.f32.vlgmr.msra.gmra.mxu2 %v1689_v11  ;;  %v1659_v15 = vpop.f32.mrf.mxu3 }
 0x460   :  { %v1566_v13 = vsel %vm1564_vm14, %v1563_v10, %v1565_v12 }
 0x461   :  { %1567 = vst [vmem:[#allocation8 + $0x4] sm:$0x1] %v1566_v13  ;;  %v1680_v17 = vpop.f32.mrf.mxu0 }
 0x468   :  { %v1690_v14 = vld [vmem:[#allocation8 + $0x4] sm:$0x1] }
 0x469   :  { %1707 = vmatmul.f32.vlgmr.msra.gmra.mxu1 %v1690_v14 }
 0x477   :  { %v1749_v27 = vpop.f32.mrf.mxu3 }
 0x4da   :  { %v1639_v16 = vpop.f32.mrf.mxu2 }
 0x4db   :  { %v1660_v18 = vadd.f32 %v1659_v15, %v1639_v16 }
 0x4dd   :  { %v1683_v20 = vadd.f32 %v1680_v17, %v1660_v18 }
 0x4df   :  { %v1684_v22 = vadd.f32 %v1683_v20, %v1568_v19 }
 0x4e1   :  { %vm1685_vm15 = vcmp.ge.f32.partialorder %v1684_v22, 0.0  ;;  %v1686_v23 = vmul.f32 %v1684_v22, %v1569_v21 }
 0x4e2   :  { %v1728_v25 = vpop.f32.mrf.mxu2 }
 0x4e3   :  { %v1687_v24 = vsel %vm1685_vm15, %v1684_v22, %v1686_v23 }
 0x4e4   :  { %1688 = vst [vmem:[#allocation20] sm:$0x1] %v1687_v24 }
 0x4e6   :  { %v1708_v26 = vpop.f32.mrf.mxu1 }
 0x4e7   :  { %v1729_v28 = vadd.f32 %v1728_v25, %v1708_v26 }
 0x4e9   :  { %v1752_v29 = vadd.f32 %v1749_v27, %v1729_v28 }
 0x4eb   :  { %v1753_v30 = vadd.f32 %v1752_v29, %v1568_v19 }
 0x4ed   :  { %vm1754_vm0 = vcmp.ge.f32.partialorder %v1753_v30, 0.0  ;;  %v1755_v31 = vmul.f32 %v1753_v30, %v1569_v21 }
 0x4ef   :  { %v1756_v32 = vsel %vm1754_vm0, %v1753_v30, %v1755_v31 }
 0x4f0   :  { %1757 = vst [vmem:[#allocation20 + $0x1] sm:$0x1] %v1756_v32 }
 0x4f1   :  { %1774 = dma.vmem_to_hbm [thread:$0]  %s1770_s5, 32, %s1772_s7, [#allocation11]  }
 0x4f2   :  { %2043 = dma.done.wait [#allocation11], 32  }
 0x4f3   :  { %2044 = vsyncadd [#allocation11], 4294967264 }
 0x4f4   :  { %1785 = vsyncpa [#allocation10], 1 }
 0x4f5   :  { %1786 = vsyncpa [#allocation13], 1 }
 0x4f6   :  { %1787 = vsyncpa [#allocation16], 1 }
 0x4f7   :  { %1788 = vsyncpa [#allocation19], 1 }
 0x4f8   :  { %1789 = vsyncpa [#allocation11], 1 }

</bundles_post_ra>
